<compile_context>
chip_gen: v7x
topology: tpu7x:2x2x1
jax: 0.10.0
libtpu: 0.0.40
codegen_flags: <defaults>
</compile_context>

<pallas_src>
import functools
import math

import jax
import jax.numpy as jnp
from jax.experimental import pallas as pl
from jax.experimental.pallas import tpu as pltpu


# ------------------------------ in-kernel math ------------------------------

def _layernorm(x, g, b, eps):
    """Row-wise LayerNorm in f32. x: [M, D]; g, b: [1, D]."""
    mean = jnp.mean(x, axis=-1, keepdims=True)
    xc = x - mean
    var = jnp.mean(xc * xc, axis=-1, keepdims=True)
    return (xc * jax.lax.rsqrt(var + eps)) * g + b


def _mha(x, wqkv, bqkv, wo, bo, heads, ctx_ref):
    """Multi-head self-attention on one sequence. x: [S, D] f32.

    Fused (D, 3D) bf16 QKV matmul (f32 accumulate).  Per-head softmax in f32
    with an exact divide.  Per-head contexts are written into a VMEM scratch
    at lane offset h*hd so the merged-head out-projection is ONE [S,D]x[D,D]
    matmul with full MXU K-fill (instead of `heads` K=hd pushes + adds).
    """
    S, D = x.shape
    hd = D // heads
    scale = 1.0 / math.sqrt(hd)
    qkv = jnp.dot(x.astype(wqkv.dtype), wqkv,
                  preferred_element_type=jnp.float32) + bqkv            # [S, 3D]
    for h in range(heads):                          # static unroll, VMEM-resident
        q = qkv[:, h * hd:(h + 1) * hd]
        k = qkv[:, D + h * hd:D + (h + 1) * hd]
        v = qkv[:, 2 * D + h * hd:2 * D + (h + 1) * hd]
        s = jax.lax.dot_general(
            q.astype(jnp.bfloat16), k.astype(jnp.bfloat16),
            (((1,), (1,)), ((), ())),
            preferred_element_type=jnp.float32) * scale                 # [S, S]
        s = s - jnp.max(s, axis=-1, keepdims=True)
        p = jnp.exp(s)
        p = p / jnp.sum(p, axis=-1, keepdims=True)      # exact divide (tiny S)
        ctx_ref[:, h * hd:(h + 1) * hd] = jnp.dot(
            p.astype(jnp.bfloat16), v.astype(jnp.bfloat16),
            preferred_element_type=jnp.float32)
    ctx = ctx_ref[...]                                                   # [S, D]
    return jnp.dot(ctx.astype(wo.dtype), wo,
                   preferred_element_type=jnp.float32) + bo


def _mlp(x, w1, b1, w2, b2, act):
    h = jnp.dot(x.astype(w1.dtype), w1, preferred_element_type=jnp.float32) + b1
    if act == "relu":
        h = jnp.maximum(h, 0.0)
    else:                                           # CLIP quick-GELU
        h = h * jax.nn.sigmoid(1.702 * h)
    return jnp.dot(h.astype(w2.dtype), w2, preferred_element_type=jnp.float32) + b2


def _transformer_layer(x, ln1_g, ln1_b, wqkv, bqkv, wo, bo,
                       ln2_g, ln2_b, w1, b1, w2, b2, ctx_ref,
                       *, heads, eps, pre_ln, act):
    if pre_ln:   # CLIP vision encoder layer (pre-LN, quick-GELU MLP)
        x = x + _mha(_layernorm(x, ln1_g, ln1_b, eps),
                     wqkv, bqkv, wo, bo, heads, ctx_ref)
        x = x + _mlp(_layernorm(x, ln2_g, ln2_b, eps), w1, b1, w2, b2, act)
    else:        # nn.TransformerEncoderLayer, norm_first=False (ReLU FFN)
        x = _layernorm(x + _mha(x, wqkv, bqkv, wo, bo, heads, ctx_ref),
                       ln1_g, ln1_b, eps)
        x = _layernorm(x + _mlp(x, w1, b1, w2, b2, act), ln2_g, ln2_b, eps)
    return x


def _small_linear_tanh_rows(x_smem, w, b, n_rows):
    """Tiny-K Linear + Tanh on the VPU (no MXU): x lives in SMEM, each output
    row is built as K scalar-times-vector FMAs.  x_smem: [N, K] (K = 2 or 3);
    w: [K, D]; b: [1, D].  Returns a list of [1, D] rows."""
    K = w.shape[0]
    rows = []
    for n in range(n_rows):
        acc = b
        for k in range(K):
            acc = acc + x_smem[n, k] * w[k:k + 1, :]
        rows.append(jnp.tanh(acc))
    return rows


# ------------------------- fused transformer stacks -------------------------

def _vision_stack_kernel(patches_ref, patch_w_ref, cls_ref, pos_cls_ref,
                         pos_tok_ref, pre_g_ref, pre_b_ref,
                         ln1_g, ln1_b, wqkv, bqkv, wo, bo,
                         ln2_g, ln2_b, w1, b1, w2, b2,
                         o_ref, ctx_ref, *, heads, eps):
    """Grid = (batch, layers).  Layer-0 prologue fuses the patch-embed
    conv-as-matmul (bias-free) + CLS token + position embeddings + CLIP
    pre-LayerNorm.  The activation block stays VMEM-resident across the layer
    axis (constant output block index) -> the whole vision tower is ONE
    pallas_call with no HBM activation round-trips between layers."""
    @pl.when(pl.program_id(1) == 0)
    def _():
        g, beta = pre_g_ref[...], pre_b_ref[...]
        tok = jnp.dot(patches_ref[...].astype(patch_w_ref.dtype), patch_w_ref[...],
                      preferred_element_type=jnp.float32) + pos_tok_ref[...]
        o_ref[0, 1:, :] = _layernorm(tok, g, beta, eps)
        o_ref[0, 0:1, :] = _layernorm(cls_ref[...] + pos_cls_ref[...], g, beta, eps)

    o_ref[0] = _transformer_layer(
        o_ref[0], ln1_g[...], ln1_b[...], wqkv[...], bqkv[...], wo[...], bo[...],
        ln2_g[...], ln2_b[...], w1[...], b1[...], w2[...], b2[...], ctx_ref,
        heads=heads, eps=eps, pre_ln=True, act="quick_gelu")


def _encoder_stack_kernel(cam_ref, cam_w_ref, cam_b_ref,
                          poly_ref, poly_w_ref, poly_b_ref,
                          cls_cam_ref, cls_poly_ref, cls_im_ref, img_ref,
                          ln1_g, ln1_b, wqkv, bqkv, wo, bo,
                          ln2_g, ln2_b, w1, b1, w2, b2,
                          o_ref, ctx_ref, *, heads, eps):
    """Grid = (1, layers).  Layer-0 prologue fuses the cam/poly Linear+Tanh
    projections (VPU scalar FMAs, inputs via SMEM) and the token concatenation
    cat([cls_cam, cam, cls_poly, poly, cls_im, image_cls]); the 10-token
    activation block then stays VMEM-resident across both post-LN layers."""
    n_cam = cam_ref.shape[0]
    n_poly = poly_ref.shape[0]
    b_img = img_ref.shape[0]

    @pl.when(pl.program_id(1) == 0)
    def _():
        cam_rows = _small_linear_tanh_rows(cam_ref, cam_w_ref[...],
                                           cam_b_ref[...], n_cam)
        poly_rows = _small_linear_tanh_rows(poly_ref, poly_w_ref[...],
                                            poly_b_ref[...], n_poly)
        r = 0
        o_ref[0, r:r + 1, :] = cls_cam_ref[...]
        r += 1
        for n in range(n_cam):
            o_ref[0, r + n:r + n + 1, :] = cam_rows[n]
        r += n_cam
        o_ref[0, r:r + 1, :] = cls_poly_ref[...]
        r += 1
        for n in range(n_poly):
            o_ref[0, r + n:r + n + 1, :] = poly_rows[n]
        r += n_poly
        o_ref[0, r:r + 1, :] = cls_im_ref[...]
        r += 1
        o_ref[0, r:r + b_img, :] = img_ref[...]

    o_ref[0] = _transformer_layer(
        o_ref[0], ln1_g[...], ln1_b[...], wqkv[...], bqkv[...], wo[...], bo[...],
        ln2_g[...], ln2_b[...], w1[...], b1[...], w2[...], b2[...], ctx_ref,
        heads=heads, eps=eps, pre_ln=False, act="relu")


# ------------------------------ pallas wrappers ------------------------------

def _layer_weight_specs(D, Dff):
    """BlockSpecs for per-layer weights stacked along a leading L axis; the
    block index depends only on the layer grid axis."""
    def wspec(*dims):
        return pl.BlockSpec((None,) + dims, lambda b, l: (l,) + (0,) * len(dims))
    return [wspec(1, D), wspec(1, D),            # ln1
            wspec(D, 3 * D), wspec(1, 3 * D),    # fused qkv (bf16 weight)
            wspec(D, D), wspec(1, D),            # attention out-projection
            wspec(1, D), wspec(1, D),            # ln2
            wspec(D, Dff), wspec(1, Dff),        # fc1
            wspec(Dff, D), wspec(1, D)]          # fc2


def _layer_weight_args(p):
    return (p["ln1_g"], p["ln1_b"], p["wqkv"], p["bqkv"], p["wo"], p["bo"],
            p["ln2_g"], p["ln2_b"], p["w1"], p["b1"], p["w2"], p["b2"])


def _const_spec(*dims):
    return pl.BlockSpec(dims, lambda b, l: (0,) * len(dims))


def clip_vision_tower(patches, params, *, cfg):
    """CLIP-style vision tower as ONE pallas_call (embed prologue + L layers)."""
    B, Np, Kp = patches.shape
    D = cfg["D"]
    S = Np + 1
    L, _, Dff = params["vt"]["w1"].shape
    return pl.pallas_call(
        functools.partial(_vision_stack_kernel, heads=cfg["VT_HEADS"], eps=1e-5),
        out_shape=jax.ShapeDtypeStruct((B, S, D), jnp.float32),
        grid=(B, L),
        in_specs=[
            pl.BlockSpec((None, Np, Kp), lambda b, l: (b, 0, 0)),   # patches
            _const_spec(Kp, D),                                     # patch_w (bf16)
            _const_spec(1, D), _const_spec(1, D), _const_spec(Np, D),
            _const_spec(1, D), _const_spec(1, D),                   # pre-LN g/b
        ] + _layer_weight_specs(D, Dff),
        out_specs=pl.BlockSpec((1, S, D), lambda b, l: (b, 0, 0)),
        scratch_shapes=[pltpu.VMEM((S, D), jnp.float32)],           # merged-head ctx
        compiler_params=pltpu.CompilerParams(
            dimension_semantics=("parallel", "arbitrary"),
            vmem_limit_bytes=32 * 1024 * 1024),
    )(patches, params["patch_w"], params["cls_token"], params["pos_cls"],
      params["pos_tok"], params["pre_ln_g"], params["pre_ln_b"],
      *_layer_weight_args(params["vt"]))


def encoder_block(cam, poly, img_cls, params, *, cfg):
    """cam/poly projections + token concat + 2x post-LN TransformerEncoderLayer
    as ONE pallas_call."""
    D = cfg["D"]
    T = 3 + cam.shape[0] + poly.shape[0] + img_cls.shape[0]
    L, _, Dff = params["enc"]["w1"].shape
    smem = pl.BlockSpec(memory_space=pltpu.MemorySpace.SMEM)
    return pl.pallas_call(
        functools.partial(_encoder_stack_kernel, heads=cfg["ENC_HEADS"], eps=1e-5),
        out_shape=jax.ShapeDtypeStruct((1, T, D), jnp.float32),
        grid=(1, L),
        in_specs=[
            smem, _const_spec(3, D), _const_spec(1, D),              # cam
            smem, _const_spec(2, D), _const_spec(1, D),              # poly
            _const_spec(1, D), _const_spec(1, D), _const_spec(1, D), # cls tokens
            _const_spec(*img_cls.shape),                             # image CLS feats
        ] + _layer_weight_specs(D, Dff),
        out_specs=pl.BlockSpec((1, T, D), lambda b, l: (0, 0, 0)),
        scratch_shapes=[pltpu.VMEM((T, D), jnp.float32)],            # merged-head ctx
        compiler_params=pltpu.CompilerParams(
            dimension_semantics=("parallel", "arbitrary"),
            vmem_limit_bytes=32 * 1024 * 1024),
    )(cam, params["cam_w"], params["cam_b"],
      poly, params["poly_w"], params["poly_b"],
      params["cls_cam"], params["cls_poly"], params["cls_im"], img_cls,
      *_layer_weight_args(params["enc"]))


# ----------------------------------- model -----------------------------------

def clip_encoder_forward(image, cameraposition, polygon, params, *, cfg):
    """Forward of CLIPEncoderCameraPolygonText (eval semantics), 2 pallas_calls."""
    B, C, H, W = image.shape
    P = cfg["P"]
    Hp, Wp = H // P, W // P

    # ---- vision_tower(image); outputs[0][:, 0, :] (last_hidden_state CLS) ----
    patches = (image.reshape(B, C, Hp, P, Wp, P)
                    .transpose(0, 2, 4, 1, 3, 5)          # conv-as-matmul layout
                    .reshape(B, Hp * Wp, C * P * P))
    vt_out = clip_vision_tower(patches, params, cfg=cfg)  # [B, S, D]
    img_cls = vt_out[:, 0, :]                             # no post-LN on outputs[0]

    # ---- cam/poly proj + cat([cls_cam, cam, cls_poly, poly, cls_im, img]) +
    #      2x post-LN TransformerEncoderLayer, all in one pallas_call ----
    enc = encoder_block(cameraposition, polygon, img_cls, params, cfg=cfg)
    return enc[:, 0:1, :]                                 # [1, 1, D]


# ------------------------------ parameter init ------------------------------

def init_params(key, cfg):
    D = cfg["D"]
    Np = (cfg["IMG"] // cfg["P"]) ** 2
    keys = iter(jax.random.split(key, 64))

    def w(shape, scale=0.02, dtype=jnp.float32):
        return (scale * jax.random.normal(next(keys), shape)).astype(dtype)

    def zeros(s):
        return jnp.zeros(s, jnp.float32)

    def ones(s):
        return jnp.ones(s, jnp.float32)

    def layer_stack(L, Dff):
        # Matmul weights in bf16 (halves streamed-weight DMA, native MXU rate);
        # biases / LN params stay f32 (v5e VPU has no bf16 path).
        return dict(
            ln1_g=ones((L, 1, D)), ln1_b=zeros((L, 1, D)),
            wqkv=w((L, D, 3 * D), dtype=jnp.bfloat16), bqkv=zeros((L, 1, 3 * D)),
            wo=w((L, D, D), dtype=jnp.bfloat16), bo=zeros((L, 1, D)),
            ln2_g=ones((L, 1, D)), ln2_b=zeros((L, 1, D)),
            w1=w((L, D, Dff), dtype=jnp.bfloat16), b1=zeros((L, 1, Dff)),
            w2=w((L, Dff, D), dtype=jnp.bfloat16), b2=zeros((L, 1, D)),
        )

    return dict(
        # CLIP-style vision tower (synthetic, scaled-down)
        patch_w=w((cfg["C"] * cfg["P"] * cfg["P"], D), dtype=jnp.bfloat16),
        cls_token=w((1, D)),
        pos_cls=w((1, D)),
        pos_tok=w((Np, D)),
        pre_ln_g=ones((1, D)), pre_ln_b=zeros((1, D)),
        vt=layer_stack(cfg["VT_LAYERS"], cfg["VT_MLP"]),
        # cam / poly projections (Linear + Tanh), un-padded K = 3 / 2
        cam_w=w((3, D)), cam_b=zeros((1, D)),
        poly_w=w((2, D)), poly_b=zeros((1, D)),
        # learned CLS tokens (torch.randn(1, D) analogues)
        cls_cam=w((1, D), scale=1.0),
        cls_poly=w((1, D), scale=1.0),
        cls_im=w((1, D), scale=1.0),
        # transformer_encoder_block
        enc=layer_stack(cfg["ENC_LAYERS"], cfg["ENC_FF"]),
    )


# ------------------------------------ main ------------------------------------

if __name__ == "__main__":
    # Scaled-down stand-in for CLIP-L/14 (1024 hidden) + 2 encoder layers.
    # At production dims prefer D/Dff multiples of 256 (v6e/v7x MXU K-fill)
    # and tile Dff / the 3D QKV output dim so streamed weight blocks stay a
    # few MB under the v7x 64 MiB VMEM.
    cfg = dict(B=2, C=3, IMG=32, P=8, D=128,
               VT_HEADS=4, VT_LAYERS=2, VT_MLP=512,
               ENC_HEADS=4, ENC_LAYERS=2, ENC_FF=256,
               N_CAM=1, N_POLY=4)

    key = jax.random.PRNGKey(0)
    kp, kimg, kcam, kpoly = jax.random.split(key, 4)
    params = init_params(kp, cfg)
    image = jax.random.normal(
        kimg, (cfg["B"], cfg["C"], cfg["IMG"], cfg["IMG"]), jnp.float32)   # NCHW
    cameraposition = jax.random.normal(kcam, (cfg["N_CAM"], 3), jnp.float32)
    polygon = jax.random.normal(kpoly, (cfg["N_POLY"], 2), jnp.float32)

    fwd = jax.jit(functools.partial(clip_encoder_forward, cfg=cfg))
    out = jax.block_until_ready(fwd(image, cameraposition, polygon, params))
    assert out.shape == (1, 1, cfg["D"]), out.shape
    assert out.dtype == jnp.float32
    assert bool(jnp.all(jnp.isfinite(out)))
    print("KERNEL_OK")
</pallas_src>

<mosaic_0001>
module attributes {stable_mosaic.version = 11 : i64} {
  func.func @_vision_stack_kernel(%arg0: i32, %arg1: i32, %arg2: memref<1x16x192xf32, #tpu.memory_space<vmem>>, %arg3: memref<192x128xbf16, #tpu.memory_space<vmem>>, %arg4: memref<1x128xf32, #tpu.memory_space<vmem>>, %arg5: memref<1x128xf32, #tpu.memory_space<vmem>>, %arg6: memref<16x128xf32, #tpu.memory_space<vmem>>, %arg7: memref<1x128xf32, #tpu.memory_space<vmem>>, %arg8: memref<1x128xf32, #tpu.memory_space<vmem>>, %arg9: memref<1x1x128xf32, #tpu.memory_space<vmem>>, %arg10: memref<1x1x128xf32, #tpu.memory_space<vmem>>, %arg11: memref<1x128x384xbf16, #tpu.memory_space<vmem>>, %arg12: memref<1x1x384xf32, #tpu.memory_space<vmem>>, %arg13: memref<1x128x128xbf16, #tpu.memory_space<vmem>>, %arg14: memref<1x1x128xf32, #tpu.memory_space<vmem>>, %arg15: memref<1x1x128xf32, #tpu.memory_space<vmem>>, %arg16: memref<1x1x128xf32, #tpu.memory_space<vmem>>, %arg17: memref<1x128x512xbf16, #tpu.memory_space<vmem>>, %arg18: memref<1x1x512xf32, #tpu.memory_space<vmem>>, %arg19: memref<1x512x128xbf16, #tpu.memory_space<vmem>>, %arg20: memref<1x1x128xf32, #tpu.memory_space<vmem>>, %arg21: memref<1x17x128xf32, #tpu.memory_space<vmem>>, %arg22: memref<17x128xf32, #tpu.memory_space<vmem>>) attributes {dimension_semantics = [#tpu.dimension_semantics<parallel>, #tpu.dimension_semantics<arbitrary>], iteration_bounds = array<i64: 2, 2>, scalar_prefetch = 0 : i64, scratch_operands = 1 : i64, tpu.core_type = #tpu.core_type<tc>, window_params = [{transform_indices = @transform_0, window_bounds = array<i64: 1, 16, 192>}, {pipeline_mode = #tpu.pipeline_mode<synchronous>, transform_indices = @transform_1, window_bounds = array<i64: 192, 128>}, {pipeline_mode = #tpu.pipeline_mode<synchronous>, transform_indices = @transform_2, window_bounds = array<i64: 1, 128>}, {pipeline_mode = #tpu.pipeline_mode<synchronous>, transform_indices = @transform_3, window_bounds = array<i64: 1, 128>}, {pipeline_mode = #tpu.pipeline_mode<synchronous>, transform_indices = @transform_4, window_bounds = array<i64: 16, 128>}, {pipeline_mode = #tpu.pipeline_mode<synchronous>, transform_indices = @transform_5, window_bounds = array<i64: 1, 128>}, {pipeline_mode = #tpu.pipeline_mode<synchronous>, transform_indices = @transform_6, window_bounds = array<i64: 1, 128>}, {transform_indices = @transform_7, window_bounds = array<i64: 1, 1, 128>}, {transform_indices = @transform_8, window_bounds = array<i64: 1, 1, 128>}, {transform_indices = @transform_9, window_bounds = array<i64: 1, 128, 384>}, {transform_indices = @transform_10, window_bounds = array<i64: 1, 1, 384>}, {transform_indices = @transform_11, window_bounds = array<i64: 1, 128, 128>}, {transform_indices = @transform_12, window_bounds = array<i64: 1, 1, 128>}, {transform_indices = @transform_13, window_bounds = array<i64: 1, 1, 128>}, {transform_indices = @transform_14, window_bounds = array<i64: 1, 1, 128>}, {transform_indices = @transform_15, window_bounds = array<i64: 1, 128, 512>}, {transform_indices = @transform_16, window_bounds = array<i64: 1, 1, 512>}, {transform_indices = @transform_17, window_bounds = array<i64: 1, 512, 128>}, {transform_indices = @transform_18, window_bounds = array<i64: 1, 1, 128>}, {transform_indices = @transform_19, window_bounds = array<i64: 1, 17, 128>}]} {
    %c0_i32 = arith.constant 0 : i32
    %0 = arith.cmpi eq, %arg1, %c0_i32 : i32
    %1 = arith.extui %0 : i1 to i32
    %c0_i32_0 = arith.constant 0 : i32
    %2 = arith.cmpi ne, %1, %c0_i32_0 : i32
    scf.if %2 {
      %c0_84 = arith.constant 0 : index
      %c0_85 = arith.constant 0 : index
      %183 = vector.load %arg7[%c0_84, %c0_85] : memref<1x128xf32, #tpu.memory_space<vmem>>, vector<1x128xf32>
      %c0_86 = arith.constant 0 : index
      %c0_87 = arith.constant 0 : index
      %184 = vector.load %arg8[%c0_86, %c0_87] : memref<1x128xf32, #tpu.memory_space<vmem>>, vector<1x128xf32>
      %c0_88 = arith.constant 0 : index
      %c0_89 = arith.constant 0 : index
      %c0_90 = arith.constant 0 : index
      %185 = vector.load %arg2[%c0_88, %c0_89, %c0_90] : memref<1x16x192xf32, #tpu.memory_space<vmem>>, vector<1x16x192xf32>
      %186 = vector.shape_cast %185 : vector<1x16x192xf32> to vector<16x192xf32>
      %187 = arith.truncf %186 : vector<16x192xf32> to vector<16x192xbf16>
      %c0_91 = arith.constant 0 : index
      %c0_92 = arith.constant 0 : index
      %188 = vector.load %arg3[%c0_91, %c0_92] : memref<192x128xbf16, #tpu.memory_space<vmem>>, vector<192x128xbf16>
      %cst_93 = arith.constant dense<0.000000e+00> : vector<16x128xf32>
      %189 = tpu.matmul %187, %188, %cst_93 {dimension_numbers = #tpu.dot_dimension_numbers<[1], [0], [0], [1], [0, 0, 1, 1], [], []>} : vector<16x192xbf16>, vector<192x128xbf16>, vector<16x128xf32> -> vector<16x128xf32>
      %c0_94 = arith.constant 0 : index
      %c0_95 = arith.constant 0 : index
      %190 = vector.load %arg6[%c0_94, %c0_95] : memref<16x128xf32, #tpu.memory_space<vmem>>, vector<16x128xf32>
      %191 = arith.addf %189, %190 : vector<16x128xf32>
      %cst_96 = arith.constant dense<0.000000e+00> : vector<16xf32>
      %192 = vector.multi_reduction <add>, %191, %cst_96 [1] : vector<16x128xf32> to vector<16xf32>
      %193 = vector.shape_cast %192 : vector<16xf32> to vector<16x1xf32>
      %cst_97 = arith.constant 1.280000e+02 : f32
      %194 = vector.broadcast %cst_97 : f32 to vector<16x1xf32>
      %195 = arith.divf %193, %194 : vector<16x1xf32>
      %196 = vector.broadcast %195 : vector<16x1xf32> to vector<16x128xf32>
      %197 = arith.subf %191, %196 : vector<16x128xf32>
      %198 = arith.mulf %197, %197 : vector<16x128xf32>
      %cst_98 = arith.constant dense<0.000000e+00> : vector<16xf32>
      %199 = vector.multi_reduction <add>, %198, %cst_98 [1] : vector<16x128xf32> to vector<16xf32>
      %200 = vector.shape_cast %199 : vector<16xf32> to vector<16x1xf32>
      %cst_99 = arith.constant 1.280000e+02 : f32
      %201 = vector.broadcast %cst_99 : f32 to vector<16x1xf32>
      %202 = arith.divf %200, %201 : vector<16x1xf32>
      %cst_100 = arith.constant 9.99999974E-6 : f32
      %203 = vector.broadcast %cst_100 : f32 to vector<16x1xf32>
      %204 = arith.addf %202, %203 : vector<16x1xf32>
      %205 = math.rsqrt %204 : vector<16x1xf32>
      %206 = vector.broadcast %205 : vector<16x1xf32> to vector<16x128xf32>
      %207 = arith.mulf %197, %206 : vector<16x128xf32>
      %208 = vector.broadcast %183 : vector<1x128xf32> to vector<16x128xf32>
      %209 = arith.mulf %207, %208 : vector<16x128xf32>
      %210 = vector.broadcast %184 : vector<1x128xf32> to vector<16x128xf32>
      %211 = arith.addf %209, %210 : vector<16x128xf32>
      %c0_101 = arith.constant 0 : index
      %c1 = arith.constant 1 : index
      %c0_102 = arith.constant 0 : index
      %212 = vector.load %arg21[%c0_101, %c1, %c0_102] : memref<1x17x128xf32, #tpu.memory_space<vmem>>, vector<1x16x128xf32>
      %213 = vector.shape_cast %212 : vector<1x16x128xf32> to vector<16x128xf32>
      %214 = vector.shape_cast %211 : vector<16x128xf32> to vector<1x16x128xf32>
      tpu.vector_store %arg21[%c0_101, %c1, %c0_102], %214 {strides = array<i32>} : memref<1x17x128xf32, #tpu.memory_space<vmem>>, vector<1x16x128xf32>,
      %c0_103 = arith.constant 0 : index
      %c0_104 = arith.constant 0 : index
      %215 = vector.load %arg4[%c0_103, %c0_104] : memref<1x128xf32, #tpu.memory_space<vmem>>, vector<1x128xf32>
      %c0_105 = arith.constant 0 : index
      %c0_106 = arith.constant 0 : index
      %216 = vector.load %arg5[%c0_105, %c0_106] : memref<1x128xf32, #tpu.memory_space<vmem>>, vector<1x128xf32>
      %217 = arith.addf %215, %216 : vector<1x128xf32>
      %cst_107 = arith.constant dense<0.000000e+00> : vector<1xf32>
      %218 = vector.multi_reduction <add>, %217, %cst_107 [1] : vector<1x128xf32> to vector<1xf32>
      %219 = vector.shape_cast %218 : vector<1xf32> to vector<1x1xf32>
      %cst_108 = arith.constant 1.280000e+02 : f32
      %220 = vector.broadcast %cst_108 : f32 to vector<1x1xf32>
      %221 = arith.divf %219, %220 : vector<1x1xf32>
      %222 = vector.broadcast %221 : vector<1x1xf32> to vector<1x128xf32>
      %223 = arith.subf %217, %222 : vector<1x128xf32>
      %224 = arith.mulf %223, %223 : vector<1x128xf32>
      %cst_109 = arith.constant dense<0.000000e+00> : vector<1xf32>
      %225 = vector.multi_reduction <add>, %224, %cst_109 [1] : vector<1x128xf32> to vector<1xf32>
      %226 = vector.shape_cast %225 : vector<1xf32> to vector<1x1xf32>
      %cst_110 = arith.constant 1.280000e+02 : f32
      %227 = vector.broadcast %cst_110 : f32 to vector<1x1xf32>
      %228 = arith.divf %226, %227 : vector<1x1xf32>
      %cst_111 = arith.constant 9.99999974E-6 : f32
      %229 = vector.broadcast %cst_111 : f32 to vector<1x1xf32>
      %230 = arith.addf %228, %229 : vector<1x1xf32>
      %231 = math.rsqrt %230 : vector<1x1xf32>
      %232 = vector.broadcast %231 : vector<1x1xf32> to vector<1x128xf32>
      %233 = arith.mulf %223, %232 : vector<1x128xf32>
      %234 = arith.mulf %233, %183 : vector<1x128xf32>
      %235 = arith.addf %234, %184 : vector<1x128xf32>
      %c0_112 = arith.constant 0 : index
      %c0_113 = arith.constant 0 : index
      %c0_114 = arith.constant 0 : index
      %236 = vector.load %arg21[%c0_112, %c0_113, %c0_114] : memref<1x17x128xf32, #tpu.memory_space<vmem>>, vector<1x1x128xf32>
      %237 = vector.shape_cast %236 : vector<1x1x128xf32> to vector<1x128xf32>
      %238 = vector.shape_cast %235 : vector<1x128xf32> to vector<1x1x128xf32>
      tpu.vector_store %arg21[%c0_112, %c0_113, %c0_114], %238 {strides = array<i32>} : memref<1x17x128xf32, #tpu.memory_space<vmem>>, vector<1x1x128xf32>,
    } else {
    }
    %c0 = arith.constant 0 : index
    %c0_1 = arith.constant 0 : index
    %c0_2 = arith.constant 0 : index
    %3 = vector.load %arg21[%c0, %c0_1, %c0_2] : memref<1x17x128xf32, #tpu.memory_space<vmem>>, vector<1x17x128xf32>
    %4 = vector.shape_cast %3 : vector<1x17x128xf32> to vector<17x128xf32>
    %c0_3 = arith.constant 0 : index
    %c0_4 = arith.constant 0 : index
    %c0_5 = arith.constant 0 : index
    %5 = vector.load %arg9[%c0_3, %c0_4, %c0_5] : memref<1x1x128xf32, #tpu.memory_space<vmem>>, vector<1x1x128xf32>
    %6 = vector.shape_cast %5 : vector<1x1x128xf32> to vector<1x128xf32>
    %c0_6 = arith.constant 0 : index
    %c0_7 = arith.constant 0 : index
    %c0_8 = arith.constant 0 : index
    %7 = vector.load %arg10[%c0_6, %c0_7, %c0_8] : memref<1x1x128xf32, #tpu.memory_space<vmem>>, vector<1x1x128xf32>
    %8 = vector.shape_cast %7 : vector<1x1x128xf32> to vector<1x128xf32>
    %c0_9 = arith.constant 0 : index
    %c0_10 = arith.constant 0 : index
    %c0_11 = arith.constant 0 : index
    %9 = vector.load %arg11[%c0_9, %c0_10, %c0_11] : memref<1x128x384xbf16, #tpu.memory_space<vmem>>, vector<1x128x384xbf16>
    %10 = vector.shape_cast %9 : vector<1x128x384xbf16> to vector<128x384xbf16>
    %c0_12 = arith.constant 0 : index
    %c0_13 = arith.constant 0 : index
    %c0_14 = arith.constant 0 : index
    %11 = vector.load %arg12[%c0_12, %c0_13, %c0_14] : memref<1x1x384xf32, #tpu.memory_space<vmem>>, vector<1x1x384xf32>
    %12 = vector.shape_cast %11 : vector<1x1x384xf32> to vector<1x384xf32>
    %c0_15 = arith.constant 0 : index
    %c0_16 = arith.constant 0 : index
    %c0_17 = arith.constant 0 : index
    %13 = vector.load %arg13[%c0_15, %c0_16, %c0_17] : memref<1x128x128xbf16, #tpu.memory_space<vmem>>, vector<1x128x128xbf16>
    %14 = vector.shape_cast %13 : vector<1x128x128xbf16> to vector<128x128xbf16>
    %c0_18 = arith.constant 0 : index
    %c0_19 = arith.constant 0 : index
    %c0_20 = arith.constant 0 : index
    %15 = vector.load %arg14[%c0_18, %c0_19, %c0_20] : memref<1x1x128xf32, #tpu.memory_space<vmem>>, vector<1x1x128xf32>
    %16 = vector.shape_cast %15 : vector<1x1x128xf32> to vector<1x128xf32>
    %c0_21 = arith.constant 0 : index
    %c0_22 = arith.constant 0 : index
    %c0_23 = arith.constant 0 : index
    %17 = vector.load %arg15[%c0_21, %c0_22, %c0_23] : memref<1x1x128xf32, #tpu.memory_space<vmem>>, vector<1x1x128xf32>
    %18 = vector.shape_cast %17 : vector<1x1x128xf32> to vector<1x128xf32>
    %c0_24 = arith.constant 0 : index
    %c0_25 = arith.constant 0 : index
    %c0_26 = arith.constant 0 : index
    %19 = vector.load %arg16[%c0_24, %c0_25, %c0_26] : memref<1x1x128xf32, #tpu.memory_space<vmem>>, vector<1x1x128xf32>
    %20 = vector.shape_cast %19 : vector<1x1x128xf32> to vector<1x128xf32>
    %c0_27 = arith.constant 0 : index
    %c0_28 = arith.constant 0 : index
    %c0_29 = arith.constant 0 : index
    %21 = vector.load %arg17[%c0_27, %c0_28, %c0_29] : memref<1x128x512xbf16, #tpu.memory_space<vmem>>, vector<1x128x512xbf16>
    %22 = vector.shape_cast %21 : vector<1x128x512xbf16> to vector<128x512xbf16>
    %c0_30 = arith.constant 0 : index
    %c0_31 = arith.constant 0 : index
    %c0_32 = arith.constant 0 : index
    %23 = vector.load %arg18[%c0_30, %c0_31, %c0_32] : memref<1x1x512xf32, #tpu.memory_space<vmem>>, vector<1x1x512xf32>
    %24 = vector.shape_cast %23 : vector<1x1x512xf32> to vector<1x512xf32>
    %c0_33 = arith.constant 0 : index
    %c0_34 = arith.constant 0 : index
    %c0_35 = arith.constant 0 : index
    %25 = vector.load %arg19[%c0_33, %c0_34, %c0_35] : memref<1x512x128xbf16, #tpu.memory_space<vmem>>, vector<1x512x128xbf16>
    %26 = vector.shape_cast %25 : vector<1x512x128xbf16> to vector<512x128xbf16>
    %c0_36 = arith.constant 0 : index
    %c0_37 = arith.constant 0 : index
    %c0_38 = arith.constant 0 : index
    %27 = vector.load %arg20[%c0_36, %c0_37, %c0_38] : memref<1x1x128xf32, #tpu.memory_space<vmem>>, vector<1x1x128xf32>
    %28 = vector.shape_cast %27 : vector<1x1x128xf32> to vector<1x128xf32>
    %cst = arith.constant dense<0.000000e+00> : vector<17xf32>
    %29 = vector.multi_reduction <add>, %4, %cst [1] : vector<17x128xf32> to vector<17xf32>
    %30 = vector.shape_cast %29 : vector<17xf32> to vector<17x1xf32>
    %cst_39 = arith.constant 1.280000e+02 : f32
    %31 = vector.broadcast %cst_39 : f32 to vector<17x1xf32>
    %32 = arith.divf %30, %31 : vector<17x1xf32>
    %33 = vector.broadcast %32 : vector<17x1xf32> to vector<17x128xf32>
    %34 = arith.subf %4, %33 : vector<17x128xf32>
    %35 = arith.mulf %34, %34 : vector<17x128xf32>
    %cst_40 = arith.constant dense<0.000000e+00> : vector<17xf32>
    %36 = vector.multi_reduction <add>, %35, %cst_40 [1] : vector<17x128xf32> to vector<17xf32>
    %37 = vector.shape_cast %36 : vector<17xf32> to vector<17x1xf32>
    %cst_41 = arith.constant 1.280000e+02 : f32
    %38 = vector.broadcast %cst_41 : f32 to vector<17x1xf32>
    %39 = arith.divf %37, %38 : vector<17x1xf32>
    %cst_42 = arith.constant 9.99999974E-6 : f32
    %40 = vector.broadcast %cst_42 : f32 to vector<17x1xf32>
    %41 = arith.addf %39, %40 : vector<17x1xf32>
    %42 = math.rsqrt %41 : vector<17x1xf32>
    %43 = vector.broadcast %42 : vector<17x1xf32> to vector<17x128xf32>
    %44 = arith.mulf %34, %43 : vector<17x128xf32>
    %45 = vector.broadcast %6 : vector<1x128xf32> to vector<17x128xf32>
    %46 = arith.mulf %44, %45 : vector<17x128xf32>
    %47 = vector.broadcast %8 : vector<1x128xf32> to vector<17x128xf32>
    %48 = arith.addf %46, %47 : vector<17x128xf32>
    %49 = arith.truncf %48 : vector<17x128xf32> to vector<17x128xbf16>
    %cst_43 = arith.constant dense<0.000000e+00> : vector<17x384xf32>
    %50 = tpu.matmul %49, %10, %cst_43 {dimension_numbers = #tpu.dot_dimension_numbers<[1], [0], [0], [1], [0, 0, 1, 1], [], []>} : vector<17x128xbf16>, vector<128x384xbf16>, vector<17x384xf32> -> vector<17x384xf32>
    %51 = vector.broadcast %12 : vector<1x384xf32> to vector<17x384xf32>
    %52 = arith.addf %50, %51 : vector<17x384xf32>
    %53 = vector.extract_strided_slice %52 {offsets = [0, 0], sizes = [17, 32], strides = [1, 1]} : vector<17x384xf32> to vector<17x32xf32>
    %54 = vector.extract_strided_slice %52 {offsets = [0, 128], sizes = [17, 32], strides = [1, 1]} : vector<17x384xf32> to vector<17x32xf32>
    %55 = vector.extract_strided_slice %52 {offsets = [0, 256], sizes = [17, 32], strides = [1, 1]} : vector<17x384xf32> to vector<17x32xf32>
    %56 = arith.truncf %53 : vector<17x32xf32> to vector<17x32xbf16>
    %57 = arith.truncf %54 : vector<17x32xf32> to vector<17x32xbf16>
    %cst_44 = arith.constant dense<0.000000e+00> : vector<17x17xf32>
    %58 = tpu.matmul %56, %57, %cst_44 {dimension_numbers = #tpu.dot_dimension_numbers<[1], [1], [0], [0], [0, 0, 1, 0], [], []>} : vector<17x32xbf16>, vector<17x32xbf16>, vector<17x17xf32> -> vector<17x17xf32>
    %cst_45 = arith.constant 0.176776692 : f32
    %59 = vector.broadcast %cst_45 : f32 to vector<17x17xf32>
    %60 = arith.mulf %58, %59 : vector<17x17xf32>
    %cst_46 = arith.constant dense<0xFF800000> : vector<17xf32>
    %61 = vector.multi_reduction <maximumf>, %60, %cst_46 [1] : vector<17x17xf32> to vector<17xf32>
    %62 = vector.shape_cast %61 : vector<17xf32> to vector<17x1xf32>
    %63 = vector.broadcast %62 : vector<17x1xf32> to vector<17x17xf32>
    %64 = arith.subf %60, %63 : vector<17x17xf32>
    %65 = math.exp %64 : vector<17x17xf32>
    %cst_47 = arith.constant dense<0.000000e+00> : vector<17xf32>
    %66 = vector.multi_reduction <add>, %65, %cst_47 [1] : vector<17x17xf32> to vector<17xf32>
    %67 = vector.shape_cast %66 : vector<17xf32> to vector<17x1xf32>
    %68 = vector.broadcast %67 : vector<17x1xf32> to vector<17x17xf32>
    %69 = arith.divf %65, %68 : vector<17x17xf32>
    %70 = arith.truncf %69 : vector<17x17xf32> to vector<17x17xbf16>
    %71 = arith.truncf %55 : vector<17x32xf32> to vector<17x32xbf16>
    %cst_48 = arith.constant dense<0.000000e+00> : vector<17x32xf32>
    %72 = tpu.matmul %70, %71, %cst_48 {dimension_numbers = #tpu.dot_dimension_numbers<[1], [0], [0], [1], [0, 0, 1, 1], [], []>} : vector<17x17xbf16>, vector<17x32xbf16>, vector<17x32xf32> -> vector<17x32xf32>
    %c0_49 = arith.constant 0 : index
    %c0_50 = arith.constant 0 : index
    %73 = vector.load %arg22[%c0_49, %c0_50] : memref<17x128xf32, #tpu.memory_space<vmem>>, vector<17x32xf32>
    tpu.vector_store %arg22[%c0_49, %c0_50], %72 {strides = array<i32>} : memref<17x128xf32, #tpu.memory_space<vmem>>, vector<17x32xf32>,
    %74 = vector.extract_strided_slice %52 {offsets = [0, 32], sizes = [17, 32], strides = [1, 1]} : vector<17x384xf32> to vector<17x32xf32>
    %75 = vector.extract_strided_slice %52 {offsets = [0, 160], sizes = [17, 32], strides = [1, 1]} : vector<17x384xf32> to vector<17x32xf32>
    %76 = vector.extract_strided_slice %52 {offsets = [0, 288], sizes = [17, 32], strides = [1, 1]} : vector<17x384xf32> to vector<17x32xf32>
    %77 = arith.truncf %74 : vector<17x32xf32> to vector<17x32xbf16>
    %78 = arith.truncf %75 : vector<17x32xf32> to vector<17x32xbf16>
    %cst_51 = arith.constant dense<0.000000e+00> : vector<17x17xf32>
    %79 = tpu.matmul %77, %78, %cst_51 {dimension_numbers = #tpu.dot_dimension_numbers<[1], [1], [0], [0], [0, 0, 1, 0], [], []>} : vector<17x32xbf16>, vector<17x32xbf16>, vector<17x17xf32> -> vector<17x17xf32>
    %cst_52 = arith.constant 0.176776692 : f32
    %80 = vector.broadcast %cst_52 : f32 to vector<17x17xf32>
    %81 = arith.mulf %79, %80 : vector<17x17xf32>
    %cst_53 = arith.constant dense<0xFF800000> : vector<17xf32>
    %82 = vector.multi_reduction <maximumf>, %81, %cst_53 [1] : vector<17x17xf32> to vector<17xf32>
    %83 = vector.shape_cast %82 : vector<17xf32> to vector<17x1xf32>
    %84 = vector.broadcast %83 : vector<17x1xf32> to vector<17x17xf32>
    %85 = arith.subf %81, %84 : vector<17x17xf32>
    %86 = math.exp %85 : vector<17x17xf32>
    %cst_54 = arith.constant dense<0.000000e+00> : vector<17xf32>
    %87 = vector.multi_reduction <add>, %86, %cst_54 [1] : vector<17x17xf32> to vector<17xf32>
    %88 = vector.shape_cast %87 : vector<17xf32> to vector<17x1xf32>
    %89 = vector.broadcast %88 : vector<17x1xf32> to vector<17x17xf32>
    %90 = arith.divf %86, %89 : vector<17x17xf32>
    %91 = arith.truncf %90 : vector<17x17xf32> to vector<17x17xbf16>
    %92 = arith.truncf %76 : vector<17x32xf32> to vector<17x32xbf16>
    %cst_55 = arith.constant dense<0.000000e+00> : vector<17x32xf32>
    %93 = tpu.matmul %91, %92, %cst_55 {dimension_numbers = #tpu.dot_dimension_numbers<[1], [0], [0], [1], [0, 0, 1, 1], [], []>} : vector<17x17xbf16>, vector<17x32xbf16>, vector<17x32xf32> -> vector<17x32xf32>
    %c0_56 = arith.constant 0 : index
    %c32 = arith.constant 32 : index
    %94 = vector.load %arg22[%c0_56, %c32] : memref<17x128xf32, #tpu.memory_space<vmem>>, vector<17x32xf32>
    tpu.vector_store %arg22[%c0_56, %c32], %93 {strides = array<i32>} : memref<17x128xf32, #tpu.memory_space<vmem>>, vector<17x32xf32>,
    %95 = vector.extract_strided_slice %52 {offsets = [0, 64], sizes = [17, 32], strides = [1, 1]} : vector<17x384xf32> to vector<17x32xf32>
    %96 = vector.extract_strided_slice %52 {offsets = [0, 192], sizes = [17, 32], strides = [1, 1]} : vector<17x384xf32> to vector<17x32xf32>
    %97 = vector.extract_strided_slice %52 {offsets = [0, 320], sizes = [17, 32], strides = [1, 1]} : vector<17x384xf32> to vector<17x32xf32>
    %98 = arith.truncf %95 : vector<17x32xf32> to vector<17x32xbf16>
    %99 = arith.truncf %96 : vector<17x32xf32> to vector<17x32xbf16>
    %cst_57 = arith.constant dense<0.000000e+00> : vector<17x17xf32>
    %100 = tpu.matmul %98, %99, %cst_57 {dimension_numbers = #tpu.dot_dimension_numbers<[1], [1], [0], [0], [0, 0, 1, 0], [], []>} : vector<17x32xbf16>, vector<17x32xbf16>, vector<17x17xf32> -> vector<17x17xf32>
    %cst_58 = arith.constant 0.176776692 : f32
    %101 = vector.broadcast %cst_58 : f32 to vector<17x17xf32>
    %102 = arith.mulf %100, %101 : vector<17x17xf32>
    %cst_59 = arith.constant dense<0xFF800000> : vector<17xf32>
    %103 = vector.multi_reduction <maximumf>, %102, %cst_59 [1] : vector<17x17xf32> to vector<17xf32>
    %104 = vector.shape_cast %103 : vector<17xf32> to vector<17x1xf32>
    %105 = vector.broadcast %104 : vector<17x1xf32> to vector<17x17xf32>
    %106 = arith.subf %102, %105 : vector<17x17xf32>
    %107 = math.exp %106 : vector<17x17xf32>
    %cst_60 = arith.constant dense<0.000000e+00> : vector<17xf32>
    %108 = vector.multi_reduction <add>, %107, %cst_60 [1] : vector<17x17xf32> to vector<17xf32>
    %109 = vector.shape_cast %108 : vector<17xf32> to vector<17x1xf32>
    %110 = vector.broadcast %109 : vector<17x1xf32> to vector<17x17xf32>
    %111 = arith.divf %107, %110 : vector<17x17xf32>
    %112 = arith.truncf %111 : vector<17x17xf32> to vector<17x17xbf16>
    %113 = arith.truncf %97 : vector<17x32xf32> to vector<17x32xbf16>
    %cst_61 = arith.constant dense<0.000000e+00> : vector<17x32xf32>
    %114 = tpu.matmul %112, %113, %cst_61 {dimension_numbers = #tpu.dot_dimension_numbers<[1], [0], [0], [1], [0, 0, 1, 1], [], []>} : vector<17x17xbf16>, vector<17x32xbf16>, vector<17x32xf32> -> vector<17x32xf32>
    %c0_62 = arith.constant 0 : index
    %c64 = arith.constant 64 : index
    %115 = vector.load %arg22[%c0_62, %c64] : memref<17x128xf32, #tpu.memory_space<vmem>>, vector<17x32xf32>
    tpu.vector_store %arg22[%c0_62, %c64], %114 {strides = array<i32>} : memref<17x128xf32, #tpu.memory_space<vmem>>, vector<17x32xf32>,
    %116 = vector.extract_strided_slice %52 {offsets = [0, 96], sizes = [17, 32], strides = [1, 1]} : vector<17x384xf32> to vector<17x32xf32>
    %117 = vector.extract_strided_slice %52 {offsets = [0, 224], sizes = [17, 32], strides = [1, 1]} : vector<17x384xf32> to vector<17x32xf32>
    %118 = vector.extract_strided_slice %52 {offsets = [0, 352], sizes = [17, 32], strides = [1, 1]} : vector<17x384xf32> to vector<17x32xf32>
    %119 = arith.truncf %116 : vector<17x32xf32> to vector<17x32xbf16>
    %120 = arith.truncf %117 : vector<17x32xf32> to vector<17x32xbf16>
    %cst_63 = arith.constant dense<0.000000e+00> : vector<17x17xf32>
    %121 = tpu.matmul %119, %120, %cst_63 {dimension_numbers = #tpu.dot_dimension_numbers<[1], [1], [0], [0], [0, 0, 1, 0], [], []>} : vector<17x32xbf16>, vector<17x32xbf16>, vector<17x17xf32> -> vector<17x17xf32>
    %cst_64 = arith.constant 0.176776692 : f32
    %122 = vector.broadcast %cst_64 : f32 to vector<17x17xf32>
    %123 = arith.mulf %121, %122 : vector<17x17xf32>
    %cst_65 = arith.constant dense<0xFF800000> : vector<17xf32>
    %124 = vector.multi_reduction <maximumf>, %123, %cst_65 [1] : vector<17x17xf32> to vector<17xf32>
    %125 = vector.shape_cast %124 : vector<17xf32> to vector<17x1xf32>
    %126 = vector.broadcast %125 : vector<17x1xf32> to vector<17x17xf32>
    %127 = arith.subf %123, %126 : vector<17x17xf32>
    %128 = math.exp %127 : vector<17x17xf32>
    %cst_66 = arith.constant dense<0.000000e+00> : vector<17xf32>
    %129 = vector.multi_reduction <add>, %128, %cst_66 [1] : vector<17x17xf32> to vector<17xf32>
    %130 = vector.shape_cast %129 : vector<17xf32> to vector<17x1xf32>
    %131 = vector.broadcast %130 : vector<17x1xf32> to vector<17x17xf32>
    %132 = arith.divf %128, %131 : vector<17x17xf32>
    %133 = arith.truncf %132 : vector<17x17xf32> to vector<17x17xbf16>
    %134 = arith.truncf %118 : vector<17x32xf32> to vector<17x32xbf16>
    %cst_67 = arith.constant dense<0.000000e+00> : vector<17x32xf32>
    %135 = tpu.matmul %133, %134, %cst_67 {dimension_numbers = #tpu.dot_dimension_numbers<[1], [0], [0], [1], [0, 0, 1, 1], [], []>} : vector<17x17xbf16>, vector<17x32xbf16>, vector<17x32xf32> -> vector<17x32xf32>
    %c0_68 = arith.constant 0 : index
    %c96 = arith.constant 96 : index
    %136 = vector.load %arg22[%c0_68, %c96] : memref<17x128xf32, #tpu.memory_space<vmem>>, vector<17x32xf32>
    tpu.vector_store %arg22[%c0_68, %c96], %135 {strides = array<i32>} : memref<17x128xf32, #tpu.memory_space<vmem>>, vector<17x32xf32>,
    %c0_69 = arith.constant 0 : index
    %c0_70 = arith.constant 0 : index
    %137 = vector.load %arg22[%c0_69, %c0_70] : memref<17x128xf32, #tpu.memory_space<vmem>>, vector<17x128xf32>
    %138 = arith.truncf %137 : vector<17x128xf32> to vector<17x128xbf16>
    %cst_71 = arith.constant dense<0.000000e+00> : vector<17x128xf32>
    %139 = tpu.matmul %138, %14, %cst_71 {dimension_numbers = #tpu.dot_dimension_numbers<[1], [0], [0], [1], [0, 0, 1, 1], [], []>} : vector<17x128xbf16>, vector<128x128xbf16>, vector<17x128xf32> -> vector<17x128xf32>
    %140 = vector.broadcast %16 : vector<1x128xf32> to vector<17x128xf32>
    %141 = arith.addf %139, %140 : vector<17x128xf32>
    %142 = arith.addf %4, %141 : vector<17x128xf32>
    %cst_72 = arith.constant dense<0.000000e+00> : vector<17xf32>
    %143 = vector.multi_reduction <add>, %142, %cst_72 [1] : vector<17x128xf32> to vector<17xf32>
    %144 = vector.shape_cast %143 : vector<17xf32> to vector<17x1xf32>
    %cst_73 = arith.constant 1.280000e+02 : f32
    %145 = vector.broadcast %cst_73 : f32 to vector<17x1xf32>
    %146 = arith.divf %144, %145 : vector<17x1xf32>
    %147 = vector.broadcast %146 : vector<17x1xf32> to vector<17x128xf32>
    %148 = arith.subf %142, %147 : vector<17x128xf32>
    %149 = arith.mulf %148, %148 : vector<17x128xf32>
    %cst_74 = arith.constant dense<0.000000e+00> : vector<17xf32>
    %150 = vector.multi_reduction <add>, %149, %cst_74 [1] : vector<17x128xf32> to vector<17xf32>
    %151 = vector.shape_cast %150 : vector<17xf32> to vector<17x1xf32>
    %cst_75 = arith.constant 1.280000e+02 : f32
    %152 = vector.broadcast %cst_75 : f32 to vector<17x1xf32>
    %153 = arith.divf %151, %152 : vector<17x1xf32>
    %cst_76 = arith.constant 9.99999974E-6 : f32
    %154 = vector.broadcast %cst_76 : f32 to vector<17x1xf32>
    %155 = arith.addf %153, %154 : vector<17x1xf32>
    %156 = math.rsqrt %155 : vector<17x1xf32>
    %157 = vector.broadcast %156 : vector<17x1xf32> to vector<17x128xf32>
    %158 = arith.mulf %148, %157 : vector<17x128xf32>
    %159 = vector.broadcast %18 : vector<1x128xf32> to vector<17x128xf32>
    %160 = arith.mulf %158, %159 : vector<17x128xf32>
    %161 = vector.broadcast %20 : vector<1x128xf32> to vector<17x128xf32>
    %162 = arith.addf %160, %161 : vector<17x128xf32>
    %163 = arith.truncf %162 : vector<17x128xf32> to vector<17x128xbf16>
    %cst_77 = arith.constant dense<0.000000e+00> : vector<17x512xf32>
    %164 = tpu.matmul %163, %22, %cst_77 {dimension_numbers = #tpu.dot_dimension_numbers<[1], [0], [0], [1], [0, 0, 1, 1], [], []>} : vector<17x128xbf16>, vector<128x512xbf16>, vector<17x512xf32> -> vector<17x512xf32>
    %165 = vector.broadcast %24 : vector<1x512xf32> to vector<17x512xf32>
    %166 = arith.addf %164, %165 : vector<17x512xf32>
    %cst_78 = arith.constant 1.702000e+00 : f32
    %167 = vector.broadcast %cst_78 : f32 to vector<17x512xf32>
    %168 = arith.mulf %167, %166 : vector<17x512xf32>
    %169 = arith.negf %168 : vector<17x512xf32>
    %170 = math.exp %169 : vector<17x512xf32>
    %cst_79 = arith.constant 1.000000e+00 : f32
    %171 = vector.broadcast %cst_79 : f32 to vector<17x512xf32>
    %172 = arith.addf %171, %170 : vector<17x512xf32>
    %173 = arith.divf %171, %172 : vector<17x512xf32>
    %174 = arith.mulf %166, %173 : vector<17x512xf32>
    %175 = arith.truncf %174 : vector<17x512xf32> to vector<17x512xbf16>
    %cst_80 = arith.constant dense<0.000000e+00> : vector<17x128xf32>
    %176 = tpu.matmul %175, %26, %cst_80 {dimension_numbers = #tpu.dot_dimension_numbers<[1], [0], [0], [1], [0, 0, 1, 1], [], []>} : vector<17x512xbf16>, vector<512x128xbf16>, vector<17x128xf32> -> vector<17x128xf32>
    %177 = vector.broadcast %28 : vector<1x128xf32> to vector<17x128xf32>
    %178 = arith.addf %176, %177 : vector<17x128xf32>
    %179 = arith.addf %142, %178 : vector<17x128xf32>
    %c0_81 = arith.constant 0 : index
    %c0_82 = arith.constant 0 : index
    %c0_83 = arith.constant 0 : index
    %180 = vector.load %arg21[%c0_81, %c0_82, %c0_83] : memref<1x17x128xf32, #tpu.memory_space<vmem>>, vector<1x17x128xf32>
    %181 = vector.shape_cast %180 : vector<1x17x128xf32> to vector<17x128xf32>
    %182 = vector.shape_cast %179 : vector<17x128xf32> to vector<1x17x128xf32>
    tpu.vector_store %arg21[%c0_81, %c0_82, %c0_83], %182 {strides = array<i32>} : memref<1x17x128xf32, #tpu.memory_space<vmem>>, vector<1x17x128xf32>,
    return
  }
  func.func @transform_0(%arg0: i32, %arg1: i32) -> (i32, i32, i32) {
    %c0_i32 = arith.constant 0 : i32
    %c0_i32_0 = arith.constant 0 : i32
    %c0_i32_1 = arith.constant 0 : i32
    return %arg0, %c0_i32, %c0_i32_0 : i32, i32, i32
  }
  func.func @transform_1(%arg0: i32, %arg1: i32) -> (i32, i32) {
    %c0_i32 = arith.constant 0 : i32
    %c0_i32_0 = arith.constant 0 : i32
    %c0_i32_1 = arith.constant 0 : i32
    return %c0_i32, %c0_i32_0 : i32, i32
  }
  func.func @transform_2(%arg0: i32, %arg1: i32) -> (i32, i32) {
    %c0_i32 = arith.constant 0 : i32
    %c0_i32_0 = arith.constant 0 : i32
    %c0_i32_1 = arith.constant 0 : i32
    return %c0_i32, %c0_i32_0 : i32, i32
  }
  func.func @transform_3(%arg0: i32, %arg1: i32) -> (i32, i32) {
    %c0_i32 = arith.constant 0 : i32
    %c0_i32_0 = arith.constant 0 : i32
    %c0_i32_1 = arith.constant 0 : i32
    return %c0_i32, %c0_i32_0 : i32, i32
  }
  func.func @transform_4(%arg0: i32, %arg1: i32) -> (i32, i32) {
    %c0_i32 = arith.constant 0 : i32
    %c0_i32_0 = arith.constant 0 : i32
    %c0_i32_1 = arith.constant 0 : i32
    return %c0_i32, %c0_i32_0 : i32, i32
  }
  func.func @transform_5(%arg0: i32, %arg1: i32) -> (i32, i32) {
    %c0_i32 = arith.constant 0 : i32
    %c0_i32_0 = arith.constant 0 : i32
    %c0_i32_1 = arith.constant 0 : i32
    return %c0_i32, %c0_i32_0 : i32, i32
  }
  func.func @transform_6(%arg0: i32, %arg1: i32) -> (i32, i32) {
    %c0_i32 = arith.constant 0 : i32
    %c0_i32_0 = arith.constant 0 : i32
    %c0_i32_1 = arith.constant 0 : i32
    return %c0_i32, %c0_i32_0 : i32, i32
  }
  func.func @transform_7(%arg0: i32, %arg1: i32) -> (i32, i32, i32) {
    %c0_i32 = arith.constant 0 : i32
    %c0_i32_0 = arith.constant 0 : i32
    %c0_i32_1 = arith.constant 0 : i32
    return %arg1, %c0_i32, %c0_i32_0 : i32, i32, i32
  }
  func.func @transform_8(%arg0: i32, %arg1: i32) -> (i32, i32, i32) {
    %c0_i32 = arith.constant 0 : i32
    %c0_i32_0 = arith.constant 0 : i32
    %c0_i32_1 = arith.constant 0 : i32
    return %arg1, %c0_i32, %c0_i32_0 : i32, i32, i32
  }
  func.func @transform_9(%arg0: i32, %arg1: i32) -> (i32, i32, i32) {
    %c0_i32 = arith.constant 0 : i32
    %c0_i32_0 = arith.constant 0 : i32
    %c0_i32_1 = arith.constant 0 : i32
    return %arg1, %c0_i32, %c0_i32_0 : i32, i32, i32
  }
  func.func @transform_10(%arg0: i32, %arg1: i32) -> (i32, i32, i32) {
    %c0_i32 = arith.constant 0 : i32
    %c0_i32_0 = arith.constant 0 : i32
    %c0_i32_1 = arith.constant 0 : i32
    return %arg1, %c0_i32, %c0_i32_0 : i32, i32, i32
  }
  func.func @transform_11(%arg0: i32, %arg1: i32) -> (i32, i32, i32) {
    %c0_i32 = arith.constant 0 : i32
    %c0_i32_0 = arith.constant 0 : i32
    %c0_i32_1 = arith.constant 0 : i32
    return %arg1, %c0_i32, %c0_i32_0 : i32, i32, i32
  }
  func.func @transform_12(%arg0: i32, %arg1: i32) -> (i32, i32, i32) {
    %c0_i32 = arith.constant 0 : i32
    %c0_i32_0 = arith.constant 0 : i32
    %c0_i32_1 = arith.constant 0 : i32
    return %arg1, %c0_i32, %c0_i32_0 : i32, i32, i32
  }
  func.func @transform_13(%arg0: i32, %arg1: i32) -> (i32, i32, i32) {
    %c0_i32 = arith.constant 0 : i32
    %c0_i32_0 = arith.constant 0 : i32
    %c0_i32_1 = arith.constant 0 : i32
    return %arg1, %c0_i32, %c0_i32_0 : i32, i32, i32
  }
  func.func @transform_14(%arg0: i32, %arg1: i32) -> (i32, i32, i32) {
    %c0_i32 = arith.constant 0 : i32
    %c0_i32_0 = arith.constant 0 : i32
    %c0_i32_1 = arith.constant 0 : i32
    return %arg1, %c0_i32, %c0_i32_0 : i32, i32, i32
  }
  func.func @transform_15(%arg0: i32, %arg1: i32) -> (i32, i32, i32) {
    %c0_i32 = arith.constant 0 : i32
    %c0_i32_0 = arith.constant 0 : i32
    %c0_i32_1 = arith.constant 0 : i32
    return %arg1, %c0_i32, %c0_i32_0 : i32, i32, i32
  }
  func.func @transform_16(%arg0: i32, %arg1: i32) -> (i32, i32, i32) {
    %c0_i32 = arith.constant 0 : i32
    %c0_i32_0 = arith.constant 0 : i32
    %c0_i32_1 = arith.constant 0 : i32
    return %arg1, %c0_i32, %c0_i32_0 : i32, i32, i32
  }
  func.func @transform_17(%arg0: i32, %arg1: i32) -> (i32, i32, i32) {
    %c0_i32 = arith.constant 0 : i32
    %c0_i32_0 = arith.constant 0 : i32
    %c0_i32_1 = arith.constant 0 : i32
    return %arg1, %c0_i32, %c0_i32_0 : i32, i32, i32
  }
  func.func @transform_18(%arg0: i32, %arg1: i32) -> (i32, i32, i32) {
    %c0_i32 = arith.constant 0 : i32
    %c0_i32_0 = arith.constant 0 : i32
    %c0_i32_1 = arith.constant 0 : i32
    return %arg1, %c0_i32, %c0_i32_0 : i32, i32, i32
  }
  func.func @transform_19(%arg0: i32, %arg1: i32) -> (i32, i32, i32) {
    %c0_i32 = arith.constant 0 : i32
    %c0_i32_0 = arith.constant 0 : i32
    %c0_i32_1 = arith.constant 0 : i32
    return %arg0, %c0_i32, %c0_i32_0 : i32, i32, i32
  }
}

module attributes {stable_mosaic.version = 11 : i64} {
  func.func @_encoder_stack_kernel(%arg0: i32, %arg1: i32, %arg2: memref<1x3xf32, #tpu.memory_space<smem>>, %arg3: memref<3x128xf32, #tpu.memory_space<vmem>>, %arg4: memref<1x128xf32, #tpu.memory_space<vmem>>, %arg5: memref<4x2xf32, #tpu.memory_space<smem>>, %arg6: memref<2x128xf32, #tpu.memory_space<vmem>>, %arg7: memref<1x128xf32, #tpu.memory_space<vmem>>, %arg8: memref<1x128xf32, #tpu.memory_space<vmem>>, %arg9: memref<1x128xf32, #tpu.memory_space<vmem>>, %arg10: memref<1x128xf32, #tpu.memory_space<vmem>>, %arg11: memref<2x128xf32, #tpu.memory_space<vmem>>, %arg12: memref<1x1x128xf32, #tpu.memory_space<vmem>>, %arg13: memref<1x1x128xf32, #tpu.memory_space<vmem>>, %arg14: memref<1x128x384xbf16, #tpu.memory_space<vmem>>, %arg15: memref<1x1x384xf32, #tpu.memory_space<vmem>>, %arg16: memref<1x128x128xbf16, #tpu.memory_space<vmem>>, %arg17: memref<1x1x128xf32, #tpu.memory_space<vmem>>, %arg18: memref<1x1x128xf32, #tpu.memory_space<vmem>>, %arg19: memref<1x1x128xf32, #tpu.memory_space<vmem>>, %arg20: memref<1x128x256xbf16, #tpu.memory_space<vmem>>, %arg21: memref<1x1x256xf32, #tpu.memory_space<vmem>>, %arg22: memref<1x256x128xbf16, #tpu.memory_space<vmem>>, %arg23: memref<1x1x128xf32, #tpu.memory_space<vmem>>, %arg24: memref<1x10x128xf32, #tpu.memory_space<vmem>>, %arg25: memref<10x128xf32, #tpu.memory_space<vmem>>) attributes {dimension_semantics = [#tpu.dimension_semantics<parallel>, #tpu.dimension_semantics<arbitrary>], iteration_bounds = array<i64: 1, 2>, scalar_prefetch = 0 : i64, scratch_operands = 1 : i64, tpu.core_type = #tpu.core_type<tc>, window_params = [{transform_indices = @transform_0, window_bounds = array<i64: 1, 3>}, {pipeline_mode = #tpu.pipeline_mode<synchronous>, transform_indices = @transform_1, window_bounds = array<i64: 3, 128>}, {pipeline_mode = #tpu.pipeline_mode<synchronous>, transform_indices = @transform_2, window_bounds = array<i64: 1, 128>}, {transform_indices = @transform_3, window_bounds = array<i64: 4, 2>}, {pipeline_mode = #tpu.pipeline_mode<synchronous>, transform_indices = @transform_4, window_bounds = array<i64: 2, 128>}, {pipeline_mode = #tpu.pipeline_mode<synchronous>, transform_indices = @transform_5, window_bounds = array<i64: 1, 128>}, {pipeline_mode = #tpu.pipeline_mode<synchronous>, transform_indices = @transform_6, window_bounds = array<i64: 1, 128>}, {pipeline_mode = #tpu.pipeline_mode<synchronous>, transform_indices = @transform_7, window_bounds = array<i64: 1, 128>}, {pipeline_mode = #tpu.pipeline_mode<synchronous>, transform_indices = @transform_8, window_bounds = array<i64: 1, 128>}, {pipeline_mode = #tpu.pipeline_mode<synchronous>, transform_indices = @transform_9, window_bounds = array<i64: 2, 128>}, {transform_indices = @transform_10, window_bounds = array<i64: 1, 1, 128>}, {transform_indices = @transform_11, window_bounds = array<i64: 1, 1, 128>}, {transform_indices = @transform_12, window_bounds = array<i64: 1, 128, 384>}, {transform_indices = @transform_13, window_bounds = array<i64: 1, 1, 384>}, {transform_indices = @transform_14, window_bounds = array<i64: 1, 128, 128>}, {transform_indices = @transform_15, window_bounds = array<i64: 1, 1, 128>}, {transform_indices = @transform_16, window_bounds = array<i64: 1, 1, 128>}, {transform_indices = @transform_17, window_bounds = array<i64: 1, 1, 128>}, {transform_indices = @transform_18, window_bounds = array<i64: 1, 128, 256>}, {transform_indices = @transform_19, window_bounds = array<i64: 1, 1, 256>}, {transform_indices = @transform_20, window_bounds = array<i64: 1, 256, 128>}, {transform_indices = @transform_21, window_bounds = array<i64: 1, 1, 128>}, {pipeline_mode = #tpu.pipeline_mode<synchronous>, transform_indices = @transform_22, window_bounds = array<i64: 1, 10, 128>}]} {
    %c0_i32 = arith.constant 0 : i32
    %0 = arith.cmpi eq, %arg1, %c0_i32 : i32
    %1 = arith.extui %0 : i1 to i32
    %c0_i32_0 = arith.constant 0 : i32
    %2 = arith.cmpi ne, %1, %c0_i32_0 : i32
    scf.if %2 {
      %c0_83 = arith.constant 0 : index
      %c0_84 = arith.constant 0 : index
      %177 = vector.load %arg3[%c0_83, %c0_84] : memref<3x128xf32, #tpu.memory_space<vmem>>, vector<3x128xf32>
      %c0_85 = arith.constant 0 : index
      %c0_86 = arith.constant 0 : index
      %178 = vector.load %arg4[%c0_85, %c0_86] : memref<1x128xf32, #tpu.memory_space<vmem>>, vector<1x128xf32>
      %c0_87 = arith.constant 0 : index
      %c0_88 = arith.constant 0 : index
      %179 = memref.load %arg2[%c0_87, %c0_88] : memref<1x3xf32, #tpu.memory_space<smem>>
      %180 = vector.extract_strided_slice %177 {offsets = [0, 0], sizes = [1, 128], strides = [1, 1]} : vector<3x128xf32> to vector<1x128xf32>
      %181 = vector.broadcast %179 : f32 to vector<1x128xf32>
      %182 = arith.mulf %181, %180 : vector<1x128xf32>
      %183 = arith.addf %178, %182 : vector<1x128xf32>
      %c0_89 = arith.constant 0 : index
      %c1 = arith.constant 1 : index
      %184 = memref.load %arg2[%c0_89, %c1] : memref<1x3xf32, #tpu.memory_space<smem>>
      %185 = vector.extract_strided_slice %177 {offsets = [1, 0], sizes = [1, 128], strides = [1, 1]} : vector<3x128xf32> to vector<1x128xf32>
      %186 = vector.broadcast %184 : f32 to vector<1x128xf32>
      %187 = arith.mulf %186, %185 : vector<1x128xf32>
      %188 = arith.addf %183, %187 : vector<1x128xf32>
      %c0_90 = arith.constant 0 : index
      %c2 = arith.constant 2 : index
      %189 = memref.load %arg2[%c0_90, %c2] : memref<1x3xf32, #tpu.memory_space<smem>>
      %190 = vector.extract_strided_slice %177 {offsets = [2, 0], sizes = [1, 128], strides = [1, 1]} : vector<3x128xf32> to vector<1x128xf32>
      %191 = vector.broadcast %189 : f32 to vector<1x128xf32>
      %192 = arith.mulf %191, %190 : vector<1x128xf32>
      %193 = arith.addf %188, %192 : vector<1x128xf32>
      %194 = math.tanh %193 : vector<1x128xf32>
      %c0_91 = arith.constant 0 : index
      %c0_92 = arith.constant 0 : index
      %195 = vector.load %arg6[%c0_91, %c0_92] : memref<2x128xf32, #tpu.memory_space<vmem>>, vector<2x128xf32>
      %c0_93 = arith.constant 0 : index
      %c0_94 = arith.constant 0 : index
      %196 = vector.load %arg7[%c0_93, %c0_94] : memref<1x128xf32, #tpu.memory_space<vmem>>, vector<1x128xf32>
      %c0_95 = arith.constant 0 : index
      %c0_96 = arith.constant 0 : index
      %197 = memref.load %arg5[%c0_95, %c0_96] : memref<4x2xf32, #tpu.memory_space<smem>>
      %198 = vector.extract_strided_slice %195 {offsets = [0, 0], sizes = [1, 128], strides = [1, 1]} : vector<2x128xf32> to vector<1x128xf32>
      %199 = vector.broadcast %197 : f32 to vector<1x128xf32>
      %200 = arith.mulf %199, %198 : vector<1x128xf32>
      %201 = arith.addf %196, %200 : vector<1x128xf32>
      %c0_97 = arith.constant 0 : index
      %c1_98 = arith.constant 1 : index
      %202 = memref.load %arg5[%c0_97, %c1_98] : memref<4x2xf32, #tpu.memory_space<smem>>
      %203 = vector.extract_strided_slice %195 {offsets = [1, 0], sizes = [1, 128], strides = [1, 1]} : vector<2x128xf32> to vector<1x128xf32>
      %204 = vector.broadcast %202 : f32 to vector<1x128xf32>
      %205 = arith.mulf %204, %203 : vector<1x128xf32>
      %206 = arith.addf %201, %205 : vector<1x128xf32>
      %207 = math.tanh %206 : vector<1x128xf32>
      %c1_99 = arith.constant 1 : index
      %c0_100 = arith.constant 0 : index
      %208 = memref.load %arg5[%c1_99, %c0_100] : memref<4x2xf32, #tpu.memory_space<smem>>
      %209 = vector.extract_strided_slice %195 {offsets = [0, 0], sizes = [1, 128], strides = [1, 1]} : vector<2x128xf32> to vector<1x128xf32>
      %210 = vector.broadcast %208 : f32 to vector<1x128xf32>
      %211 = arith.mulf %210, %209 : vector<1x128xf32>
      %212 = arith.addf %196, %211 : vector<1x128xf32>
      %c1_101 = arith.constant 1 : index
      %c1_102 = arith.constant 1 : index
      %213 = memref.load %arg5[%c1_101, %c1_102] : memref<4x2xf32, #tpu.memory_space<smem>>
      %214 = vector.extract_strided_slice %195 {offsets = [1, 0], sizes = [1, 128], strides = [1, 1]} : vector<2x128xf32> to vector<1x128xf32>
      %215 = vector.broadcast %213 : f32 to vector<1x128xf32>
      %216 = arith.mulf %215, %214 : vector<1x128xf32>
      %217 = arith.addf %212, %216 : vector<1x128xf32>
      %218 = math.tanh %217 : vector<1x128xf32>
      %c2_103 = arith.constant 2 : index
      %c0_104 = arith.constant 0 : index
      %219 = memref.load %arg5[%c2_103, %c0_104] : memref<4x2xf32, #tpu.memory_space<smem>>
      %220 = vector.extract_strided_slice %195 {offsets = [0, 0], sizes = [1, 128], strides = [1, 1]} : vector<2x128xf32> to vector<1x128xf32>
      %221 = vector.broadcast %219 : f32 to vector<1x128xf32>
      %222 = arith.mulf %221, %220 : vector<1x128xf32>
      %223 = arith.addf %196, %222 : vector<1x128xf32>
      %c2_105 = arith.constant 2 : index
      %c1_106 = arith.constant 1 : index
      %224 = memref.load %arg5[%c2_105, %c1_106] : memref<4x2xf32, #tpu.memory_space<smem>>
      %225 = vector.extract_strided_slice %195 {offsets = [1, 0], sizes = [1, 128], strides = [1, 1]} : vector<2x128xf32> to vector<1x128xf32>
      %226 = vector.broadcast %224 : f32 to vector<1x128xf32>
      %227 = arith.mulf %226, %225 : vector<1x128xf32>
      %228 = arith.addf %223, %227 : vector<1x128xf32>
      %229 = math.tanh %228 : vector<1x128xf32>
      %c3 = arith.constant 3 : index
      %c0_107 = arith.constant 0 : index
      %230 = memref.load %arg5[%c3, %c0_107] : memref<4x2xf32, #tpu.memory_space<smem>>
      %231 = vector.extract_strided_slice %195 {offsets = [0, 0], sizes = [1, 128], strides = [1, 1]} : vector<2x128xf32> to vector<1x128xf32>
      %232 = vector.broadcast %230 : f32 to vector<1x128xf32>
      %233 = arith.mulf %232, %231 : vector<1x128xf32>
      %234 = arith.addf %196, %233 : vector<1x128xf32>
      %c3_108 = arith.constant 3 : index
      %c1_109 = arith.constant 1 : index
      %235 = memref.load %arg5[%c3_108, %c1_109] : memref<4x2xf32, #tpu.memory_space<smem>>
      %236 = vector.extract_strided_slice %195 {offsets = [1, 0], sizes = [1, 128], strides = [1, 1]} : vector<2x128xf32> to vector<1x128xf32>
      %237 = vector.broadcast %235 : f32 to vector<1x128xf32>
      %238 = arith.mulf %237, %236 : vector<1x128xf32>
      %239 = arith.addf %234, %238 : vector<1x128xf32>
      %240 = math.tanh %239 : vector<1x128xf32>
      %c0_110 = arith.constant 0 : index
      %c0_111 = arith.constant 0 : index
      %241 = vector.load %arg8[%c0_110, %c0_111] : memref<1x128xf32, #tpu.memory_space<vmem>>, vector<1x128xf32>
      %c0_112 = arith.constant 0 : index
      %c0_113 = arith.constant 0 : index
      %c0_114 = arith.constant 0 : index
      %242 = vector.load %arg24[%c0_112, %c0_113, %c0_114] : memref<1x10x128xf32, #tpu.memory_space<vmem>>, vector<1x1x128xf32>
      %243 = vector.shape_cast %242 : vector<1x1x128xf32> to vector<1x128xf32>
      %244 = vector.shape_cast %241 : vector<1x128xf32> to vector<1x1x128xf32>
      tpu.vector_store %arg24[%c0_112, %c0_113, %c0_114], %244 {strides = array<i32>} : memref<1x10x128xf32, #tpu.memory_space<vmem>>, vector<1x1x128xf32>,
      %c0_115 = arith.constant 0 : index
      %c1_116 = arith.constant 1 : index
      %c0_117 = arith.constant 0 : index
      %245 = vector.load %arg24[%c0_115, %c1_116, %c0_117] : memref<1x10x128xf32, #tpu.memory_space<vmem>>, vector<1x1x128xf32>
      %246 = vector.shape_cast %245 : vector<1x1x128xf32> to vector<1x128xf32>
      %247 = vector.shape_cast %194 : vector<1x128xf32> to vector<1x1x128xf32>
      tpu.vector_store %arg24[%c0_115, %c1_116, %c0_117], %247 {strides = array<i32>} : memref<1x10x128xf32, #tpu.memory_space<vmem>>, vector<1x1x128xf32>,
      %c0_118 = arith.constant 0 : index
      %c0_119 = arith.constant 0 : index
      %248 = vector.load %arg9[%c0_118, %c0_119] : memref<1x128xf32, #tpu.memory_space<vmem>>, vector<1x128xf32>
      %c0_120 = arith.constant 0 : index
      %c2_121 = arith.constant 2 : index
      %c0_122 = arith.constant 0 : index
      %249 = vector.load %arg24[%c0_120, %c2_121, %c0_122] : memref<1x10x128xf32, #tpu.memory_space<vmem>>, vector<1x1x128xf32>
      %250 = vector.shape_cast %249 : vector<1x1x128xf32> to vector<1x128xf32>
      %251 = vector.shape_cast %248 : vector<1x128xf32> to vector<1x1x128xf32>
      tpu.vector_store %arg24[%c0_120, %c2_121, %c0_122], %251 {strides = array<i32>} : memref<1x10x128xf32, #tpu.memory_space<vmem>>, vector<1x1x128xf32>,
      %c0_123 = arith.constant 0 : index
      %c3_124 = arith.constant 3 : index
      %c0_125 = arith.constant 0 : index
      %252 = vector.load %arg24[%c0_123, %c3_124, %c0_125] : memref<1x10x128xf32, #tpu.memory_space<vmem>>, vector<1x1x128xf32>
      %253 = vector.shape_cast %252 : vector<1x1x128xf32> to vector<1x128xf32>
      %254 = vector.shape_cast %207 : vector<1x128xf32> to vector<1x1x128xf32>
      tpu.vector_store %arg24[%c0_123, %c3_124, %c0_125], %254 {strides = array<i32>} : memref<1x10x128xf32, #tpu.memory_space<vmem>>, vector<1x1x128xf32>,
      %c0_126 = arith.constant 0 : index
      %c4 = arith.constant 4 : index
      %c0_127 = arith.constant 0 : index
      %255 = vector.load %arg24[%c0_126, %c4, %c0_127] : memref<1x10x128xf32, #tpu.memory_space<vmem>>, vector<1x1x128xf32>
      %256 = vector.shape_cast %255 : vector<1x1x128xf32> to vector<1x128xf32>
      %257 = vector.shape_cast %218 : vector<1x128xf32> to vector<1x1x128xf32>
      tpu.vector_store %arg24[%c0_126, %c4, %c0_127], %257 {strides = array<i32>} : memref<1x10x128xf32, #tpu.memory_space<vmem>>, vector<1x1x128xf32>,
      %c0_128 = arith.constant 0 : index
      %c5 = arith.constant 5 : index
      %c0_129 = arith.constant 0 : index
      %258 = vector.load %arg24[%c0_128, %c5, %c0_129] : memref<1x10x128xf32, #tpu.memory_space<vmem>>, vector<1x1x128xf32>
      %259 = vector.shape_cast %258 : vector<1x1x128xf32> to vector<1x128xf32>
      %260 = vector.shape_cast %229 : vector<1x128xf32> to vector<1x1x128xf32>
      tpu.vector_store %arg24[%c0_128, %c5, %c0_129], %260 {strides = array<i32>} : memref<1x10x128xf32, #tpu.memory_space<vmem>>, vector<1x1x128xf32>,
      %c0_130 = arith.constant 0 : index
      %c6 = arith.constant 6 : index
      %c0_131 = arith.constant 0 : index
      %261 = vector.load %arg24[%c0_130, %c6, %c0_131] : memref<1x10x128xf32, #tpu.memory_space<vmem>>, vector<1x1x128xf32>
      %262 = vector.shape_cast %261 : vector<1x1x128xf32> to vector<1x128xf32>
      %263 = vector.shape_cast %240 : vector<1x128xf32> to vector<1x1x128xf32>
      tpu.vector_store %arg24[%c0_130, %c6, %c0_131], %263 {strides = array<i32>} : memref<1x10x128xf32, #tpu.memory_space<vmem>>, vector<1x1x128xf32>,
      %c0_132 = arith.constant 0 : index
      %c0_133 = arith.constant 0 : index
      %264 = vector.load %arg10[%c0_132, %c0_133] : memref<1x128xf32, #tpu.memory_space<vmem>>, vector<1x128xf32>
      %c0_134 = arith.constant 0 : index
      %c7 = arith.constant 7 : index
      %c0_135 = arith.constant 0 : index
      %265 = vector.load %arg24[%c0_134, %c7, %c0_135] : memref<1x10x128xf32, #tpu.memory_space<vmem>>, vector<1x1x128xf32>
      %266 = vector.shape_cast %265 : vector<1x1x128xf32> to vector<1x128xf32>
      %267 = vector.shape_cast %264 : vector<1x128xf32> to vector<1x1x128xf32>
      tpu.vector_store %arg24[%c0_134, %c7, %c0_135], %267 {strides = array<i32>} : memref<1x10x128xf32, #tpu.memory_space<vmem>>, vector<1x1x128xf32>,
      %c0_136 = arith.constant 0 : index
      %c0_137 = arith.constant 0 : index
      %268 = vector.load %arg11[%c0_136, %c0_137] : memref<2x128xf32, #tpu.memory_space<vmem>>, vector<2x128xf32>
      %c0_138 = arith.constant 0 : index
      %c8 = arith.constant 8 : index
      %c0_139 = arith.constant 0 : index
      %269 = vector.load %arg24[%c0_138, %c8, %c0_139] : memref<1x10x128xf32, #tpu.memory_space<vmem>>, vector<1x2x128xf32>
      %270 = vector.shape_cast %269 : vector<1x2x128xf32> to vector<2x128xf32>
      %271 = vector.shape_cast %268 : vector<2x128xf32> to vector<1x2x128xf32>
      tpu.vector_store %arg24[%c0_138, %c8, %c0_139], %271 {strides = array<i32>} : memref<1x10x128xf32, #tpu.memory_space<vmem>>, vector<1x2x128xf32>,
    } else {
    }
    %c0 = arith.constant 0 : index
    %c0_1 = arith.constant 0 : index
    %c0_2 = arith.constant 0 : index
    %3 = vector.load %arg24[%c0, %c0_1, %c0_2] : memref<1x10x128xf32, #tpu.memory_space<vmem>>, vector<1x10x128xf32>
    %4 = vector.shape_cast %3 : vector<1x10x128xf32> to vector<10x128xf32>
    %c0_3 = arith.constant 0 : index
    %c0_4 = arith.constant 0 : index
    %c0_5 = arith.constant 0 : index
    %5 = vector.load %arg12[%c0_3, %c0_4, %c0_5] : memref<1x1x128xf32, #tpu.memory_space<vmem>>, vector<1x1x128xf32>
    %6 = vector.shape_cast %5 : vector<1x1x128xf32> to vector<1x128xf32>
    %c0_6 = arith.constant 0 : index
    %c0_7 = arith.constant 0 : index
    %c0_8 = arith.constant 0 : index
    %7 = vector.load %arg13[%c0_6, %c0_7, %c0_8] : memref<1x1x128xf32, #tpu.memory_space<vmem>>, vector<1x1x128xf32>
    %8 = vector.shape_cast %7 : vector<1x1x128xf32> to vector<1x128xf32>
    %c0_9 = arith.constant 0 : index
    %c0_10 = arith.constant 0 : index
    %c0_11 = arith.constant 0 : index
    %9 = vector.load %arg14[%c0_9, %c0_10, %c0_11] : memref<1x128x384xbf16, #tpu.memory_space<vmem>>, vector<1x128x384xbf16>
    %10 = vector.shape_cast %9 : vector<1x128x384xbf16> to vector<128x384xbf16>
    %c0_12 = arith.constant 0 : index
    %c0_13 = arith.constant 0 : index
    %c0_14 = arith.constant 0 : index
    %11 = vector.load %arg15[%c0_12, %c0_13, %c0_14] : memref<1x1x384xf32, #tpu.memory_space<vmem>>, vector<1x1x384xf32>
    %12 = vector.shape_cast %11 : vector<1x1x384xf32> to vector<1x384xf32>
    %c0_15 = arith.constant 0 : index
    %c0_16 = arith.constant 0 : index
    %c0_17 = arith.constant 0 : index
    %13 = vector.load %arg16[%c0_15, %c0_16, %c0_17] : memref<1x128x128xbf16, #tpu.memory_space<vmem>>, vector<1x128x128xbf16>
    %14 = vector.shape_cast %13 : vector<1x128x128xbf16> to vector<128x128xbf16>
    %c0_18 = arith.constant 0 : index
    %c0_19 = arith.constant 0 : index
    %c0_20 = arith.constant 0 : index
    %15 = vector.load %arg17[%c0_18, %c0_19, %c0_20] : memref<1x1x128xf32, #tpu.memory_space<vmem>>, vector<1x1x128xf32>
    %16 = vector.shape_cast %15 : vector<1x1x128xf32> to vector<1x128xf32>
    %c0_21 = arith.constant 0 : index
    %c0_22 = arith.constant 0 : index
    %c0_23 = arith.constant 0 : index
    %17 = vector.load %arg18[%c0_21, %c0_22, %c0_23] : memref<1x1x128xf32, #tpu.memory_space<vmem>>, vector<1x1x128xf32>
    %18 = vector.shape_cast %17 : vector<1x1x128xf32> to vector<1x128xf32>
    %c0_24 = arith.constant 0 : index
    %c0_25 = arith.constant 0 : index
    %c0_26 = arith.constant 0 : index
    %19 = vector.load %arg19[%c0_24, %c0_25, %c0_26] : memref<1x1x128xf32, #tpu.memory_space<vmem>>, vector<1x1x128xf32>
    %20 = vector.shape_cast %19 : vector<1x1x128xf32> to vector<1x128xf32>
    %c0_27 = arith.constant 0 : index
    %c0_28 = arith.constant 0 : index
    %c0_29 = arith.constant 0 : index
    %21 = vector.load %arg20[%c0_27, %c0_28, %c0_29] : memref<1x128x256xbf16, #tpu.memory_space<vmem>>, vector<1x128x256xbf16>
    %22 = vector.shape_cast %21 : vector<1x128x256xbf16> to vector<128x256xbf16>
    %c0_30 = arith.constant 0 : index
    %c0_31 = arith.constant 0 : index
    %c0_32 = arith.constant 0 : index
    %23 = vector.load %arg21[%c0_30, %c0_31, %c0_32] : memref<1x1x256xf32, #tpu.memory_space<vmem>>, vector<1x1x256xf32>
    %24 = vector.shape_cast %23 : vector<1x1x256xf32> to vector<1x256xf32>
    %c0_33 = arith.constant 0 : index
    %c0_34 = arith.constant 0 : index
    %c0_35 = arith.constant 0 : index
    %25 = vector.load %arg22[%c0_33, %c0_34, %c0_35] : memref<1x256x128xbf16, #tpu.memory_space<vmem>>, vector<1x256x128xbf16>
    %26 = vector.shape_cast %25 : vector<1x256x128xbf16> to vector<256x128xbf16>
    %c0_36 = arith.constant 0 : index
    %c0_37 = arith.constant 0 : index
    %c0_38 = arith.constant 0 : index
    %27 = vector.load %arg23[%c0_36, %c0_37, %c0_38] : memref<1x1x128xf32, #tpu.memory_space<vmem>>, vector<1x1x128xf32>
    %28 = vector.shape_cast %27 : vector<1x1x128xf32> to vector<1x128xf32>
    %29 = arith.truncf %4 : vector<10x128xf32> to vector<10x128xbf16>
    %cst = arith.constant dense<0.000000e+00> : vector<10x384xf32>
    %30 = tpu.matmul %29, %10, %cst {dimension_numbers = #tpu.dot_dimension_numbers<[1], [0], [0], [1], [0, 0, 1, 1], [], []>} : vector<10x128xbf16>, vector<128x384xbf16>, vector<10x384xf32> -> vector<10x384xf32>
    %31 = vector.broadcast %12 : vector<1x384xf32> to vector<10x384xf32>
    %32 = arith.addf %30, %31 : vector<10x384xf32>
    %33 = vector.extract_strided_slice %32 {offsets = [0, 0], sizes = [10, 32], strides = [1, 1]} : vector<10x384xf32> to vector<10x32xf32>
    %34 = vector.extract_strided_slice %32 {offsets = [0, 128], sizes = [10, 32], strides = [1, 1]} : vector<10x384xf32> to vector<10x32xf32>
    %35 = vector.extract_strided_slice %32 {offsets = [0, 256], sizes = [10, 32], strides = [1, 1]} : vector<10x384xf32> to vector<10x32xf32>
    %36 = arith.truncf %33 : vector<10x32xf32> to vector<10x32xbf16>
    %37 = arith.truncf %34 : vector<10x32xf32> to vector<10x32xbf16>
    %cst_39 = arith.constant dense<0.000000e+00> : vector<10x10xf32>
    %38 = tpu.matmul %36, %37, %cst_39 {dimension_numbers = #tpu.dot_dimension_numbers<[1], [1], [0], [0], [0, 0, 1, 0], [], []>} : vector<10x32xbf16>, vector<10x32xbf16>, vector<10x10xf32> -> vector<10x10xf32>
    %cst_40 = arith.constant 0.176776692 : f32
    %39 = vector.broadcast %cst_40 : f32 to vector<10x10xf32>
    %40 = arith.mulf %38, %39 : vector<10x10xf32>
    %cst_41 = arith.constant dense<0xFF800000> : vector<10xf32>
    %41 = vector.multi_reduction <maximumf>, %40, %cst_41 [1] : vector<10x10xf32> to vector<10xf32>
    %42 = vector.shape_cast %41 : vector<10xf32> to vector<10x1xf32>
    %43 = vector.broadcast %42 : vector<10x1xf32> to vector<10x10xf32>
    %44 = arith.subf %40, %43 : vector<10x10xf32>
    %45 = math.exp %44 : vector<10x10xf32>
    %cst_42 = arith.constant dense<0.000000e+00> : vector<10xf32>
    %46 = vector.multi_reduction <add>, %45, %cst_42 [1] : vector<10x10xf32> to vector<10xf32>
    %47 = vector.shape_cast %46 : vector<10xf32> to vector<10x1xf32>
    %48 = vector.broadcast %47 : vector<10x1xf32> to vector<10x10xf32>
    %49 = arith.divf %45, %48 : vector<10x10xf32>
    %50 = arith.truncf %49 : vector<10x10xf32> to vector<10x10xbf16>
    %51 = arith.truncf %35 : vector<10x32xf32> to vector<10x32xbf16>
    %cst_43 = arith.constant dense<0.000000e+00> : vector<10x32xf32>
    %52 = tpu.matmul %50, %51, %cst_43 {dimension_numbers = #tpu.dot_dimension_numbers<[1], [0], [0], [1], [0, 0, 1, 1], [], []>} : vector<10x10xbf16>, vector<10x32xbf16>, vector<10x32xf32> -> vector<10x32xf32>
    %c0_44 = arith.constant 0 : index
    %c0_45 = arith.constant 0 : index
    %53 = vector.load %arg25[%c0_44, %c0_45] : memref<10x128xf32, #tpu.memory_space<vmem>>, vector<10x32xf32>
    tpu.vector_store %arg25[%c0_44, %c0_45], %52 {strides = array<i32>} : memref<10x128xf32, #tpu.memory_space<vmem>>, vector<10x32xf32>,
    %54 = vector.extract_strided_slice %32 {offsets = [0, 32], sizes = [10, 32], strides = [1, 1]} : vector<10x384xf32> to vector<10x32xf32>
    %55 = vector.extract_strided_slice %32 {offsets = [0, 160], sizes = [10, 32], strides = [1, 1]} : vector<10x384xf32> to vector<10x32xf32>
    %56 = vector.extract_strided_slice %32 {offsets = [0, 288], sizes = [10, 32], strides = [1, 1]} : vector<10x384xf32> to vector<10x32xf32>
    %57 = arith.truncf %54 : vector<10x32xf32> to vector<10x32xbf16>
    %58 = arith.truncf %55 : vector<10x32xf32> to vector<10x32xbf16>
    %cst_46 = arith.constant dense<0.000000e+00> : vector<10x10xf32>
    %59 = tpu.matmul %57, %58, %cst_46 {dimension_numbers = #tpu.dot_dimension_numbers<[1], [1], [0], [0], [0, 0, 1, 0], [], []>} : vector<10x32xbf16>, vector<10x32xbf16>, vector<10x10xf32> -> vector<10x10xf32>
    %cst_47 = arith.constant 0.176776692 : f32
    %60 = vector.broadcast %cst_47 : f32 to vector<10x10xf32>
    %61 = arith.mulf %59, %60 : vector<10x10xf32>
    %cst_48 = arith.constant dense<0xFF800000> : vector<10xf32>
    %62 = vector.multi_reduction <maximumf>, %61, %cst_48 [1] : vector<10x10xf32> to vector<10xf32>
    %63 = vector.shape_cast %62 : vector<10xf32> to vector<10x1xf32>
    %64 = vector.broadcast %63 : vector<10x1xf32> to vector<10x10xf32>
    %65 = arith.subf %61, %64 : vector<10x10xf32>
    %66 = math.exp %65 : vector<10x10xf32>
    %cst_49 = arith.constant dense<0.000000e+00> : vector<10xf32>
    %67 = vector.multi_reduction <add>, %66, %cst_49 [1] : vector<10x10xf32> to vector<10xf32>
    %68 = vector.shape_cast %67 : vector<10xf32> to vector<10x1xf32>
    %69 = vector.broadcast %68 : vector<10x1xf32> to vector<10x10xf32>
    %70 = arith.divf %66, %69 : vector<10x10xf32>
    %71 = arith.truncf %70 : vector<10x10xf32> to vector<10x10xbf16>
    %72 = arith.truncf %56 : vector<10x32xf32> to vector<10x32xbf16>
    %cst_50 = arith.constant dense<0.000000e+00> : vector<10x32xf32>
    %73 = tpu.matmul %71, %72, %cst_50 {dimension_numbers = #tpu.dot_dimension_numbers<[1], [0], [0], [1], [0, 0, 1, 1], [], []>} : vector<10x10xbf16>, vector<10x32xbf16>, vector<10x32xf32> -> vector<10x32xf32>
    %c0_51 = arith.constant 0 : index
    %c32 = arith.constant 32 : index
    %74 = vector.load %arg25[%c0_51, %c32] : memref<10x128xf32, #tpu.memory_space<vmem>>, vector<10x32xf32>
    tpu.vector_store %arg25[%c0_51, %c32], %73 {strides = array<i32>} : memref<10x128xf32, #tpu.memory_space<vmem>>, vector<10x32xf32>,
    %75 = vector.extract_strided_slice %32 {offsets = [0, 64], sizes = [10, 32], strides = [1, 1]} : vector<10x384xf32> to vector<10x32xf32>
    %76 = vector.extract_strided_slice %32 {offsets = [0, 192], sizes = [10, 32], strides = [1, 1]} : vector<10x384xf32> to vector<10x32xf32>
    %77 = vector.extract_strided_slice %32 {offsets = [0, 320], sizes = [10, 32], strides = [1, 1]} : vector<10x384xf32> to vector<10x32xf32>
    %78 = arith.truncf %75 : vector<10x32xf32> to vector<10x32xbf16>
    %79 = arith.truncf %76 : vector<10x32xf32> to vector<10x32xbf16>
    %cst_52 = arith.constant dense<0.000000e+00> : vector<10x10xf32>
    %80 = tpu.matmul %78, %79, %cst_52 {dimension_numbers = #tpu.dot_dimension_numbers<[1], [1], [0], [0], [0, 0, 1, 0], [], []>} : vector<10x32xbf16>, vector<10x32xbf16>, vector<10x10xf32> -> vector<10x10xf32>
    %cst_53 = arith.constant 0.176776692 : f32
    %81 = vector.broadcast %cst_53 : f32 to vector<10x10xf32>
    %82 = arith.mulf %80, %81 : vector<10x10xf32>
    %cst_54 = arith.constant dense<0xFF800000> : vector<10xf32>
    %83 = vector.multi_reduction <maximumf>, %82, %cst_54 [1] : vector<10x10xf32> to vector<10xf32>
    %84 = vector.shape_cast %83 : vector<10xf32> to vector<10x1xf32>
    %85 = vector.broadcast %84 : vector<10x1xf32> to vector<10x10xf32>
    %86 = arith.subf %82, %85 : vector<10x10xf32>
    %87 = math.exp %86 : vector<10x10xf32>
    %cst_55 = arith.constant dense<0.000000e+00> : vector<10xf32>
    %88 = vector.multi_reduction <add>, %87, %cst_55 [1] : vector<10x10xf32> to vector<10xf32>
    %89 = vector.shape_cast %88 : vector<10xf32> to vector<10x1xf32>
    %90 = vector.broadcast %89 : vector<10x1xf32> to vector<10x10xf32>
    %91 = arith.divf %87, %90 : vector<10x10xf32>
    %92 = arith.truncf %91 : vector<10x10xf32> to vector<10x10xbf16>
    %93 = arith.truncf %77 : vector<10x32xf32> to vector<10x32xbf16>
    %cst_56 = arith.constant dense<0.000000e+00> : vector<10x32xf32>
    %94 = tpu.matmul %92, %93, %cst_56 {dimension_numbers = #tpu.dot_dimension_numbers<[1], [0], [0], [1], [0, 0, 1, 1], [], []>} : vector<10x10xbf16>, vector<10x32xbf16>, vector<10x32xf32> -> vector<10x32xf32>
    %c0_57 = arith.constant 0 : index
    %c64 = arith.constant 64 : index
    %95 = vector.load %arg25[%c0_57, %c64] : memref<10x128xf32, #tpu.memory_space<vmem>>, vector<10x32xf32>
    tpu.vector_store %arg25[%c0_57, %c64], %94 {strides = array<i32>} : memref<10x128xf32, #tpu.memory_space<vmem>>, vector<10x32xf32>,
    %96 = vector.extract_strided_slice %32 {offsets = [0, 96], sizes = [10, 32], strides = [1, 1]} : vector<10x384xf32> to vector<10x32xf32>
    %97 = vector.extract_strided_slice %32 {offsets = [0, 224], sizes = [10, 32], strides = [1, 1]} : vector<10x384xf32> to vector<10x32xf32>
    %98 = vector.extract_strided_slice %32 {offsets = [0, 352], sizes = [10, 32], strides = [1, 1]} : vector<10x384xf32> to vector<10x32xf32>
    %99 = arith.truncf %96 : vector<10x32xf32> to vector<10x32xbf16>
    %100 = arith.truncf %97 : vector<10x32xf32> to vector<10x32xbf16>
    %cst_58 = arith.constant dense<0.000000e+00> : vector<10x10xf32>
    %101 = tpu.matmul %99, %100, %cst_58 {dimension_numbers = #tpu.dot_dimension_numbers<[1], [1], [0], [0], [0, 0, 1, 0], [], []>} : vector<10x32xbf16>, vector<10x32xbf16>, vector<10x10xf32> -> vector<10x10xf32>
    %cst_59 = arith.constant 0.176776692 : f32
    %102 = vector.broadcast %cst_59 : f32 to vector<10x10xf32>
    %103 = arith.mulf %101, %102 : vector<10x10xf32>
    %cst_60 = arith.constant dense<0xFF800000> : vector<10xf32>
    %104 = vector.multi_reduction <maximumf>, %103, %cst_60 [1] : vector<10x10xf32> to vector<10xf32>
    %105 = vector.shape_cast %104 : vector<10xf32> to vector<10x1xf32>
    %106 = vector.broadcast %105 : vector<10x1xf32> to vector<10x10xf32>
    %107 = arith.subf %103, %106 : vector<10x10xf32>
    %108 = math.exp %107 : vector<10x10xf32>
    %cst_61 = arith.constant dense<0.000000e+00> : vector<10xf32>
    %109 = vector.multi_reduction <add>, %108, %cst_61 [1] : vector<10x10xf32> to vector<10xf32>
    %110 = vector.shape_cast %109 : vector<10xf32> to vector<10x1xf32>
    %111 = vector.broadcast %110 : vector<10x1xf32> to vector<10x10xf32>
    %112 = arith.divf %108, %111 : vector<10x10xf32>
    %113 = arith.truncf %112 : vector<10x10xf32> to vector<10x10xbf16>
    %114 = arith.truncf %98 : vector<10x32xf32> to vector<10x32xbf16>
    %cst_62 = arith.constant dense<0.000000e+00> : vector<10x32xf32>
    %115 = tpu.matmul %113, %114, %cst_62 {dimension_numbers = #tpu.dot_dimension_numbers<[1], [0], [0], [1], [0, 0, 1, 1], [], []>} : vector<10x10xbf16>, vector<10x32xbf16>, vector<10x32xf32> -> vector<10x32xf32>
    %c0_63 = arith.constant 0 : index
    %c96 = arith.constant 96 : index
    %116 = vector.load %arg25[%c0_63, %c96] : memref<10x128xf32, #tpu.memory_space<vmem>>, vector<10x32xf32>
    tpu.vector_store %arg25[%c0_63, %c96], %115 {strides = array<i32>} : memref<10x128xf32, #tpu.memory_space<vmem>>, vector<10x32xf32>,
    %c0_64 = arith.constant 0 : index
    %c0_65 = arith.constant 0 : index
    %117 = vector.load %arg25[%c0_64, %c0_65] : memref<10x128xf32, #tpu.memory_space<vmem>>, vector<10x128xf32>
    %118 = arith.truncf %117 : vector<10x128xf32> to vector<10x128xbf16>
    %cst_66 = arith.constant dense<0.000000e+00> : vector<10x128xf32>
    %119 = tpu.matmul %118, %14, %cst_66 {dimension_numbers = #tpu.dot_dimension_numbers<[1], [0], [0], [1], [0, 0, 1, 1], [], []>} : vector<10x128xbf16>, vector<128x128xbf16>, vector<10x128xf32> -> vector<10x128xf32>
    %120 = vector.broadcast %16 : vector<1x128xf32> to vector<10x128xf32>
    %121 = arith.addf %119, %120 : vector<10x128xf32>
    %122 = arith.addf %4, %121 : vector<10x128xf32>
    %cst_67 = arith.constant dense<0.000000e+00> : vector<10xf32>
    %123 = vector.multi_reduction <add>, %122, %cst_67 [1] : vector<10x128xf32> to vector<10xf32>
    %124 = vector.shape_cast %123 : vector<10xf32> to vector<10x1xf32>
    %cst_68 = arith.constant 1.280000e+02 : f32
    %125 = vector.broadcast %cst_68 : f32 to vector<10x1xf32>
    %126 = arith.divf %124, %125 : vector<10x1xf32>
    %127 = vector.broadcast %126 : vector<10x1xf32> to vector<10x128xf32>
    %128 = arith.subf %122, %127 : vector<10x128xf32>
    %129 = arith.mulf %128, %128 : vector<10x128xf32>
    %cst_69 = arith.constant dense<0.000000e+00> : vector<10xf32>
    %130 = vector.multi_reduction <add>, %129, %cst_69 [1] : vector<10x128xf32> to vector<10xf32>
    %131 = vector.shape_cast %130 : vector<10xf32> to vector<10x1xf32>
    %cst_70 = arith.constant 1.280000e+02 : f32
    %132 = vector.broadcast %cst_70 : f32 to vector<10x1xf32>
    %133 = arith.divf %131, %132 : vector<10x1xf32>
    %cst_71 = arith.constant 9.99999974E-6 : f32
    %134 = vector.broadcast %cst_71 : f32 to vector<10x1xf32>
    %135 = arith.addf %133, %134 : vector<10x1xf32>
    %136 = math.rsqrt %135 : vector<10x1xf32>
    %137 = vector.broadcast %136 : vector<10x1xf32> to vector<10x128xf32>
    %138 = arith.mulf %128, %137 : vector<10x128xf32>
    %139 = vector.broadcast %6 : vector<1x128xf32> to vector<10x128xf32>
    %140 = arith.mulf %138, %139 : vector<10x128xf32>
    %141 = vector.broadcast %8 : vector<1x128xf32> to vector<10x128xf32>
    %142 = arith.addf %140, %141 : vector<10x128xf32>
    %143 = arith.truncf %142 : vector<10x128xf32> to vector<10x128xbf16>
    %cst_72 = arith.constant dense<0.000000e+00> : vector<10x256xf32>
    %144 = tpu.matmul %143, %22, %cst_72 {dimension_numbers = #tpu.dot_dimension_numbers<[1], [0], [0], [1], [0, 0, 1, 1], [], []>} : vector<10x128xbf16>, vector<128x256xbf16>, vector<10x256xf32> -> vector<10x256xf32>
    %145 = vector.broadcast %24 : vector<1x256xf32> to vector<10x256xf32>
    %146 = arith.addf %144, %145 : vector<10x256xf32>
    %cst_73 = arith.constant 0.000000e+00 : f32
    %147 = vector.broadcast %cst_73 : f32 to vector<10x256xf32>
    %148 = arith.maximumf %146, %147 : vector<10x256xf32>
    %149 = arith.truncf %148 : vector<10x256xf32> to vector<10x256xbf16>
    %cst_74 = arith.constant dense<0.000000e+00> : vector<10x128xf32>
    %150 = tpu.matmul %149, %26, %cst_74 {dimension_numbers = #tpu.dot_dimension_numbers<[1], [0], [0], [1], [0, 0, 1, 1], [], []>} : vector<10x256xbf16>, vector<256x128xbf16>, vector<10x128xf32> -> vector<10x128xf32>
    %151 = vector.broadcast %28 : vector<1x128xf32> to vector<10x128xf32>
    %152 = arith.addf %150, %151 : vector<10x128xf32>
    %153 = arith.addf %142, %152 : vector<10x128xf32>
    %cst_75 = arith.constant dense<0.000000e+00> : vector<10xf32>
    %154 = vector.multi_reduction <add>, %153, %cst_75 [1] : vector<10x128xf32> to vector<10xf32>
    %155 = vector.shape_cast %154 : vector<10xf32> to vector<10x1xf32>
    %cst_76 = arith.constant 1.280000e+02 : f32
    %156 = vector.broadcast %cst_76 : f32 to vector<10x1xf32>
    %157 = arith.divf %155, %156 : vector<10x1xf32>
    %158 = vector.broadcast %157 : vector<10x1xf32> to vector<10x128xf32>
    %159 = arith.subf %153, %158 : vector<10x128xf32>
    %160 = arith.mulf %159, %159 : vector<10x128xf32>
    %cst_77 = arith.constant dense<0.000000e+00> : vector<10xf32>
    %161 = vector.multi_reduction <add>, %160, %cst_77 [1] : vector<10x128xf32> to vector<10xf32>
    %162 = vector.shape_cast %161 : vector<10xf32> to vector<10x1xf32>
    %cst_78 = arith.constant 1.280000e+02 : f32
    %163 = vector.broadcast %cst_78 : f32 to vector<10x1xf32>
    %164 = arith.divf %162, %163 : vector<10x1xf32>
    %cst_79 = arith.constant 9.99999974E-6 : f32
    %165 = vector.broadcast %cst_79 : f32 to vector<10x1xf32>
    %166 = arith.addf %164, %165 : vector<10x1xf32>
    %167 = math.rsqrt %166 : vector<10x1xf32>
    %168 = vector.broadcast %167 : vector<10x1xf32> to vector<10x128xf32>
    %169 = arith.mulf %159, %168 : vector<10x128xf32>
    %170 = vector.broadcast %18 : vector<1x128xf32> to vector<10x128xf32>
    %171 = arith.mulf %169, %170 : vector<10x128xf32>
    %172 = vector.broadcast %20 : vector<1x128xf32> to vector<10x128xf32>
    %173 = arith.addf %171, %172 : vector<10x128xf32>
    %c0_80 = arith.constant 0 : index
    %c0_81 = arith.constant 0 : index
    %c0_82 = arith.constant 0 : index
    %174 = vector.load %arg24[%c0_80, %c0_81, %c0_82] : memref<1x10x128xf32, #tpu.memory_space<vmem>>, vector<1x10x128xf32>
    %175 = vector.shape_cast %174 : vector<1x10x128xf32> to vector<10x128xf32>
    %176 = vector.shape_cast %173 : vector<10x128xf32> to vector<1x10x128xf32>
    tpu.vector_store %arg24[%c0_80, %c0_81, %c0_82], %176 {strides = array<i32>} : memref<1x10x128xf32, #tpu.memory_space<vmem>>, vector<1x10x128xf32>,
    return
  }
  func.func @transform_0(%arg0: i32, %arg1: i32) -> (i32, i32) {
    %c0_i32 = arith.constant 0 : i32
    %c0_i32_0 = arith.constant 0 : i32
    %c0_i32_1 = arith.constant 0 : i32
    return %c0_i32, %c0_i32_0 : i32, i32
  }
  func.func @transform_1(%arg0: i32, %arg1: i32) -> (i32, i32) {
    %c0_i32 = arith.constant 0 : i32
    %c0_i32_0 = arith.constant 0 : i32
    %c0_i32_1 = arith.constant 0 : i32
    return %c0_i32, %c0_i32_0 : i32, i32
  }
  func.func @transform_2(%arg0: i32, %arg1: i32) -> (i32, i32) {
    %c0_i32 = arith.constant 0 : i32
    %c0_i32_0 = arith.constant 0 : i32
    %c0_i32_1 = arith.constant 0 : i32
    return %c0_i32, %c0_i32_0 : i32, i32
  }
  func.func @transform_3(%arg0: i32, %arg1: i32) -> (i32, i32) {
    %c0_i32 = arith.constant 0 : i32
    %c0_i32_0 = arith.constant 0 : i32
    %c0_i32_1 = arith.constant 0 : i32
    return %c0_i32, %c0_i32_0 : i32, i32
  }
  func.func @transform_4(%arg0: i32, %arg1: i32) -> (i32, i32) {
    %c0_i32 = arith.constant 0 : i32
    %c0_i32_0 = arith.constant 0 : i32
    %c0_i32_1 = arith.constant 0 : i32
    return %c0_i32, %c0_i32_0 : i32, i32
  }
  func.func @transform_5(%arg0: i32, %arg1: i32) -> (i32, i32) {
    %c0_i32 = arith.constant 0 : i32
    %c0_i32_0 = arith.constant 0 : i32
    %c0_i32_1 = arith.constant 0 : i32
    return %c0_i32, %c0_i32_0 : i32, i32
  }
  func.func @transform_6(%arg0: i32, %arg1: i32) -> (i32, i32) {
    %c0_i32 = arith.constant 0 : i32
    %c0_i32_0 = arith.constant 0 : i32
    %c0_i32_1 = arith.constant 0 : i32
    return %c0_i32, %c0_i32_0 : i32, i32
  }
  func.func @transform_7(%arg0: i32, %arg1: i32) -> (i32, i32) {
    %c0_i32 = arith.constant 0 : i32
    %c0_i32_0 = arith.constant 0 : i32
    %c0_i32_1 = arith.constant 0 : i32
    return %c0_i32, %c0_i32_0 : i32, i32
  }
  func.func @transform_8(%arg0: i32, %arg1: i32) -> (i32, i32) {
    %c0_i32 = arith.constant 0 : i32
    %c0_i32_0 = arith.constant 0 : i32
    %c0_i32_1 = arith.constant 0 : i32
    return %c0_i32, %c0_i32_0 : i32, i32
  }
  func.func @transform_9(%arg0: i32, %arg1: i32) -> (i32, i32) {
    %c0_i32 = arith.constant 0 : i32
    %c0_i32_0 = arith.constant 0 : i32
    %c0_i32_1 = arith.constant 0 : i32
    return %c0_i32, %c0_i32_0 : i32, i32
  }
  func.func @transform_10(%arg0: i32, %arg1: i32) -> (i32, i32, i32) {
    %c0_i32 = arith.constant 0 : i32
    %c0_i32_0 = arith.constant 0 : i32
    %c0_i32_1 = arith.constant 0 : i32
    return %arg1, %c0_i32, %c0_i32_0 : i32, i32, i32
  }
  func.func @transform_11(%arg0: i32, %arg1: i32) -> (i32, i32, i32) {
    %c0_i32 = arith.constant 0 : i32
    %c0_i32_0 = arith.constant 0 : i32
    %c0_i32_1 = arith.constant 0 : i32
    return %arg1, %c0_i32, %c0_i32_0 : i32, i32, i32
  }
  func.func @transform_12(%arg0: i32, %arg1: i32) -> (i32, i32, i32) {
    %c0_i32 = arith.constant 0 : i32
    %c0_i32_0 = arith.constant 0 : i32
    %c0_i32_1 = arith.constant 0 : i32
    return %arg1, %c0_i32, %c0_i32_0 : i32, i32, i32
  }
  func.func @transform_13(%arg0: i32, %arg1: i32) -> (i32, i32, i32) {
    %c0_i32 = arith.constant 0 : i32
    %c0_i32_0 = arith.constant 0 : i32
    %c0_i32_1 = arith.constant 0 : i32
    return %arg1, %c0_i32, %c0_i32_0 : i32, i32, i32
  }
  func.func @transform_14(%arg0: i32, %arg1: i32) -> (i32, i32, i32) {
    %c0_i32 = arith.constant 0 : i32
    %c0_i32_0 = arith.constant 0 : i32
    %c0_i32_1 = arith.constant 0 : i32
    return %arg1, %c0_i32, %c0_i32_0 : i32, i32, i32
  }
  func.func @transform_15(%arg0: i32, %arg1: i32) -> (i32, i32, i32) {
    %c0_i32 = arith.constant 0 : i32
    %c0_i32_0 = arith.constant 0 : i32
    %c0_i32_1 = arith.constant 0 : i32
    return %arg1, %c0_i32, %c0_i32_0 : i32, i32, i32
  }
  func.func @transform_16(%arg0: i32, %arg1: i32) -> (i32, i32, i32) {
    %c0_i32 = arith.constant 0 : i32
    %c0_i32_0 = arith.constant 0 : i32
    %c0_i32_1 = arith.constant 0 : i32
    return %arg1, %c0_i32, %c0_i32_0 : i32, i32, i32
  }
  func.func @transform_17(%arg0: i32, %arg1: i32) -> (i32, i32, i32) {
    %c0_i32 = arith.constant 0 : i32
    %c0_i32_0 = arith.constant 0 : i32
    %c0_i32_1 = arith.constant 0 : i32
    return %arg1, %c0_i32, %c0_i32_0 : i32, i32, i32
  }
  func.func @transform_18(%arg0: i32, %arg1: i32) -> (i32, i32, i32) {
    %c0_i32 = arith.constant 0 : i32
    %c0_i32_0 = arith.constant 0 : i32
    %c0_i32_1 = arith.constant 0 : i32
    return %arg1, %c0_i32, %c0_i32_0 : i32, i32, i32
  }
  func.func @transform_19(%arg0: i32, %arg1: i32) -> (i32, i32, i32) {
    %c0_i32 = arith.constant 0 : i32
    %c0_i32_0 = arith.constant 0 : i32
    %c0_i32_1 = arith.constant 0 : i32
    return %arg1, %c0_i32, %c0_i32_0 : i32, i32, i32
  }
  func.func @transform_20(%arg0: i32, %arg1: i32) -> (i32, i32, i32) {
    %c0_i32 = arith.constant 0 : i32
    %c0_i32_0 = arith.constant 0 : i32
    %c0_i32_1 = arith.constant 0 : i32
    return %arg1, %c0_i32, %c0_i32_0 : i32, i32, i32
  }
  func.func @transform_21(%arg0: i32, %arg1: i32) -> (i32, i32, i32) {
    %c0_i32 = arith.constant 0 : i32
    %c0_i32_0 = arith.constant 0 : i32
    %c0_i32_1 = arith.constant 0 : i32
    return %arg1, %c0_i32, %c0_i32_0 : i32, i32, i32
  }
  func.func @transform_22(%arg0: i32, %arg1: i32) -> (i32, i32, i32) {
    %c0_i32 = arith.constant 0 : i32
    %c0_i32_0 = arith.constant 0 : i32
    %c0_i32_1 = arith.constant 0 : i32
    %c0_i32_2 = arith.constant 0 : i32
    return %c0_i32, %c0_i32_0, %c0_i32_1 : i32, i32, i32
  }
}

</mosaic_0001>

<bundles_post_ra>
// kernel: clip_encoder_forward.2
= control target key start
LH: loop header
LB: loop body
LE: loop exit
PB: predicated region body
PF: predicated region fallthrough
CT: control target
= control target key end

     0   :  { %s4090_s30 = smov 0   ;;  %s4092_s20 = smov 0   ;;  %s4671_s0 = inlined_call_operand.vmem [shape: f32[2,16,192], index: 0, kind: input, shape index: {}]   ;;  %s4672_s1 = inlined_call_operand.vmem [shape: bf16[192,128], index: 1, kind: input, shape index: {}]   ;;  %s4673_s2 = inlined_call_operand.vmem [shape: f32[1,128], index: 2, kind: input, shape index: {}]   ;;  %s4674_s3 = inlined_call_operand.vmem [shape: f32[1,128], index: 3, kind: input, shape index: {}]   ;;  %s4675_s4 = inlined_call_operand.vmem [shape: f32[16,128], index: 4, kind: input, shape index: {}]   ;;  %s4676_s5 = inlined_call_operand.vmem [shape: f32[1,128], index: 5, kind: input, shape index: {}]   ;;  %s4677_s6 = inlined_call_operand.vmem [shape: f32[1,128], index: 6, kind: input, shape index: {}]   ;;  %s4678_s7 = inlined_call_operand.vmem [shape: f32[2,1,128], index: 7, kind: input, shape index: {}]   ;;  %s4679_s8 = inlined_call_operand.vmem [shape: f32[2,1,128], index: 8, kind: input, shape index: {}]   ;;  %s4680_s9 = inlined_call_operand.vmem [shape: bf16[2,128,384], index: 9, kind: input, shape index: {}]   ;;  %s4681_s10 = inlined_call_operand.vmem [shape: f32[2,1,384], index: 10, kind: input, shape index: {}]   ;;  %s4682_s11 = inlined_call_operand.vmem [shape: bf16[2,128,128], index: 11, kind: input, shape index: {}]   ;;  %s4683_s12 = inlined_call_operand.vmem [shape: f32[2,1,128], index: 12, kind: input, shape index: {}]   ;;  %s4684_s13 = inlined_call_operand.vmem [shape: f32[2,1,128], index: 13, kind: input, shape index: {}]   ;;  %s4685_s14 = inlined_call_operand.vmem [shape: f32[2,1,128], index: 14, kind: input, shape index: {}]   ;;  %s4686_s15 = inlined_call_operand.vmem [shape: bf16[2,128,512], index: 15, kind: input, shape index: {}]   ;;  %s4687_s16 = inlined_call_operand.vmem [shape: f32[2,1,512], index: 16, kind: input, shape index: {}]   ;;  %s4688_s17 = inlined_call_operand.vmem [shape: bf16[2,512,128], index: 17, kind: input, shape index: {}]   ;;  %s4689_s18 = inlined_call_operand.vmem [shape: f32[2,1,128], index: 18, kind: input, shape index: {}]   ;;  %s4690_s19 = inlined_call_operand.vmem [shape: f32[2,17,128], index: 19, kind: output, shape index: {}]  }
   0x1   :  { %4697 = sst [smem:[#allocation9_spill]] %s4671_s0  ;;  %s4088_s0 = smov 0  }
   0x2   :  { %4698 = sst [smem:[#allocation10_spill]] %s4672_s1  ;;  %s4094_s21 = smov 0  }
   0x3   :  { %4699 = sst [smem:[#allocation11_spill]] %s4673_s2  ;;  %s4096_s1 = smov 0  }
   0x4   :  { %4700 = sst [smem:[#allocation12_spill]] %s4674_s3 }
   0x5   :  { %4701 = sst [smem:[#allocation13_spill]] %s4675_s4 }
   0x6   :  { %4702 = sst [smem:[#allocation14_spill]] %s4676_s5 }
   0x7   :  { %4703 = sst [smem:[#allocation15_spill]] %s4677_s6 }
   0x8   :  { %4704 = sst [smem:[#allocation16_spill]] %s4679_s8 }
   0x9   :  { %4705 = sst [smem:[#allocation17_spill]] %s4680_s9 }
   0xa   :  { %4706 = sst [smem:[#allocation18_spill]] %s4681_s10 }
   0xb   :  { %4707 = sst [smem:[#allocation19_spill]] %s4682_s11 }
   0xc   :  { %4708 = sst [smem:[#allocation20_spill]] %s4690_s19 }
   0xd LB: > { %4709 = sst [smem:[#allocation3_spill]] %s3965_s0  ;;  %s38_s22 = sadd.s32 1, %s3973_s20  ;;  %s3981_s1 = sphi %s4096_s1, %s29_s1   ;;  %s3977_s21 = sphi %s4094_s21, %s4739_s21   ;;  %s3973_s20 = sphi %s4092_s20, %s4738_s20   ;;  %s3969_s30 = sphi %s4090_s30, %s4737_s30   ;;  %s3965_s0 = sphi %s4088_s0, %s4736_s0  }
   0xe   : > { %4710 = sst [smem:[#allocation4_spill]] %s3973_s20  ;;  %s41_s2 = sadd.s32 1, %s3977_s21 }
   0xf   : > { %4711 = sst [smem:[#allocation5_spill]] %s3977_s21  ;;  %p39_p0 = scmp.ge.s32.totalorder %s38_s22, 2 }
  0x10   : > { %4712 = sst [smem:[#allocation6_spill]] %s3981_s1  ;;  %p3264_p1 = scmp.ge.s32.totalorder %s3981_s1, 1 }
  0x11   : > { %p655_p2 = scmp.lt.s32.totalorder %s3981_s1, 5  ;;  %s4741_s22 = smov (%p39_p0, %s38_s22), 0 }
  0x12   : > { %4713 = sst [smem:[#allocation7_spill]] %s4741_s22  ;;  %s4743_s2 = smov (!%p39_p0, %s41_s2), %s3977_s21 }
  0x13   : > { %p656_p3 = pnand %p3264_p1, %p655_p2  ;;  %p43_p4 = scmp.ge.s32.totalorder %s4743_s2, 2 }
  0x14   : > { %p757_p5 = scmp.lt.s32.totalorder (!%p656_p3), %s3969_s30, 1  ;;  %p762_p6 = scmp.lt.s32.totalorder (!%p656_p3), %s3965_s0, 1 }
  0x15   : > { %s4745_s2 = smov (%p43_p4, %s4743_s2), 0  ;;  %659 = sbr.rel (%p656_p3) target bundleno = 4210 (0x1072), region = 96 }
  0x16   : > { %4714 = sst [smem:[#allocation8_spill]] %s4745_s2  ;;  %s4715_s27 = sld [smem:[#allocation9_spill]] (!%p656_p3) }
  0x17   : > { %s4717_s9 = sld [smem:[#allocation17_spill]] (!%p656_p3)  ;;  %s4718_s11 = sld [smem:[#allocation19_spill]] (!%p656_p3) }
  0x18   : > { %s4719_s10 = sld [smem:[#allocation18_spill]] (!%p656_p3) }
  0x1c   : > { %s4747_s30 = smov (!%p757_p5, %s3969_s30), 1 }
  0x1d   : > { %s4122_s23 = scalar_select %p762_p6, %s3965_s0, 1 }
  0x1e   : > { %s3422_s24 = sshll.u32 %s4747_s30, 5  ;;  %s3648_s25 = smul.u32 24, %s4747_s30 }
  0x1f   : > { %s4127_s28 = scalar_lea.vmem %s4715_s27, %s3422_s24  ;;  %s3646_s6 = smul.u32 192, %s4122_s23 }
  0x20   : > { %s3647_s5 = smul.u32 3, %s4122_s23  ;;  %s3423_s4 = sshll.u32 %s4122_s23, 6 }
  0x21   : > { %s4143_s30 = scalar_lea.vmem %s4717_s9, %s3646_s6  ;;  %s4148_s26 = scalar_lea.vmem %s4718_s11, %s3423_s4 }
  0x22   : > { %s4153_s29 = scalar_lea.vmem %s4719_s10, %s3647_s5  ;;  %s3424_s3 = sshll.u32 %s4122_s23, 8 }
  0x23   : > { %s3272_s4 = sshll.u32 %s4122_s23, 2  ;;  %s4172_s2 = scalar_lea.vmem %s4686_s15, %s3424_s3 }
  0x24   : > { %s4177_s20 = scalar_lea.vmem %s4687_s16, %s3272_s4  ;;  %s4182_s8 = scalar_lea.vmem %s4688_s17, %s3424_s3 }
  0x25   : > { %s807_s0 = scalar_lea.vmem %s4689_s18, %s4122_s23  ;;  %s4720_s10 = sld [smem:[#allocation20_spill]] }
  0x26   : > { %s4721_s24 = sld [smem:[#allocation3_spill]] }
  0x2b   : > { %s4191_s11 = scalar_lea.vmem %s4720_s10, %s3648_s25 }
  0x2c   : > { %p3276_p7 = scmp.ne.s32.totalorder %s4721_s24, 0 }
  0x2d   : > { %s4722_s27 = sld [smem:[#allocation10_spill]] (!%p3276_p7)  ;;  %v3983_v1 = vmov (!%p3276_p7), 0   ;;  %v821_v5 = vld [vmem:[%s4127_s28 + $0x8] sm:$0xff] (!%p3276_p7)  ;;  %v823_v6 = vld [vmem:[%s4127_s28 + $0x18] sm:$0xff] (!%p3276_p7)  ;;  %vm924_vm0 = vcmask (!%p3276_p7), 523264   ;;  %s4723_s6 = sld [smem:[#allocation11_spill]] (!%p3276_p7)  ;;  %v993_v46 = vlaneseq (!%p3276_p7) }
  0x2e   : > { %817 = sbr.rel (%p3276_p7) target bundleno = 629 (0x275), region = 100  ;;  %928 = vmatprep.subr.bf16.mxu0 (!%p3276_p7), %v3983_v1  ;;  %v825_v7 = vpack.c.bf16 (!%p3276_p7), %v823_v6, %v821_v5  ;;  %s4724_s4 = sld [smem:[#allocation12_spill]] (!%p3276_p7)  ;;  %vm1013_vm1 = vcmask (!%p3276_p7), 1040384   ;;  %v820_v20 = vld [vmem:[%s4127_s28] sm:$0xff] (!%p3276_p7)  ;;  %v822_v21 = vld [vmem:[%s4127_s28 + $0x10] sm:$0xff] (!%p3276_p7) }
  0x2f   : > { %v824_v22 = vpack.c.bf16 (!%p3276_p7), %v822_v21, %v820_v20  ;;  %s4725_s21 = sld [smem:[#allocation13_spill]] (!%p3276_p7)  ;;  %v994_v53 = vshrl.u32 (!%p3276_p7), %v993_v46, 7  ;;  %s4728_s9 = sld [smem:[#allocation15_spill]] (!%p3276_p7) }
  0x30   : > { %3289 = vmatprep.mubr.msk.bf16.mxu0 (!%p3276_p7), %vm924_vm0, %v825_v7 }
  0x31   : > { %v995_v55 = vsub.s32 (!%p3276_p7), 0, %v994_v53 }
  0x33   : > { %v3694_v0 = vld [vmem:[%s4722_s27] sm:$0xff] (!%p3276_p7)   ;;  %v3695_v2 = vld [vmem:[%s4722_s27 + $0x8] sm:$0xff] (!%p3276_p7)   ;;  %v3696_v3 = vld [vmem:[%s4722_s27 + $0x10] sm:$0xff] (!%p3276_p7)  }
  0x34   : > { %929 = vmatpush1.bf16.msra.mxu0 (!%p3276_p7), %v3694_v0  ;;  %v3697_v4 = vld [vmem:[%s4722_s27 + $0x18] sm:$0xff] (!%p3276_p7)   ;;  %v1010_v8 = vld [vmem:[%s4723_s6] sm:$0x1] (!%p3276_p7)  ;;  %v3699_v13 = vld [vmem:[%s4722_s27 + $0x28] sm:$0xff] (!%p3276_p7)  }
  0x35   : > { %930 = vmatprep.subr.bf16.mxu0 %v3983_v1  ;;  %v1011_v9 = vld [vmem:[%s4724_s4] sm:$0x1]  ;;  %v3700_v14 = vld [vmem:[%s4722_s27 + $0x30] sm:$0xff]   ;;  %v3701_v15 = vld [vmem:[%s4722_s27 + $0x38] sm:$0xff]   ;;  %s4726_s22 = smov %s4725_s21  ;;  %s4727_s4 = sld [smem:[#allocation14_spill]] }
  0x36   : > { %v3698_v10 = vld [vmem:[%s4722_s27 + $0x20] sm:$0xff]   ;;  %v1012_v11 = vadd.f32 %v1011_v9, %v1010_v8  ;;  %v3703_v17 = vld [vmem:[%s4722_s27 + $0x48] sm:$0xff]   ;;  %v3704_v18 = vld [vmem:[%s4722_s27 + $0x50] sm:$0xff]  }
  0x37   : > { %v3702_v16 = vld [vmem:[%s4722_s27 + $0x40] sm:$0xff]   ;;  %v3705_v19 = vld [vmem:[%s4722_s27 + $0x58] sm:$0xff]   ;;  %v851_v25 = vld [vmem:[%s4726_s22 + $0x8] sm:$0xff] }
  0x38   : > { %931 = vmatpush1.bf16.msra.mxu0 %v3695_v2  ;;  %v1014_v12 = vsel %vm1013_vm1, %v1012_v11, 0.0  ;;  %v850_v23 = vld [vmem:[%s4725_s21] sm:$0xff] }
  0x39   : > { %932 = vmatprep.subr.bf16.mxu0 %v3983_v1  ;;  %1015 = vadd.xlane.f32.xlu0 %v1014_v12  ;;  %v819_v57 = vld [vmem:[%s4728_s9] sm:$0x1] }
  0x3a   : > { %v1004_v61 = vrot.slane %v819_v57, %v995_v55 }
  0x3b   : > { %v818_v56 = vld [vmem:[%s4727_s4] sm:$0x1] }
  0x3c   : > { %933 = vmatpush1.bf16.msra.mxu0 %v3696_v3  ;;  %v996_v58 = vrot.slane %v818_v56, %v995_v55 }
  0x3d   : > { %934 = vmatprep.subr.bf16.mxu0 %v3983_v1 }
  0x40   : > { %935 = vmatpush1.bf16.msra.mxu0 %v3697_v4 }
  0x41   : > { %936 = vmatprep.subr.bf16.mxu0 %v3983_v1 }
  0x44   : > { %937 = vmatpush1.bf16.msra.mxu0 %v3698_v10 }
  0x45   : > { %938 = vmatprep.subr.bf16.mxu0 %v3983_v1 }
  0x48   : > { %939 = vmatpush1.bf16.msra.mxu0 %v3699_v13 }
  0x49   : > { %940 = vmatprep.subr.bf16.mxu0 %v3983_v1 }
  0x4c   : > { %941 = vmatpush1.bf16.msra.mxu0 %v3700_v14 }
  0x4d   : > { %942 = vmatprep.subr.bf16.mxu0 %v3983_v1 }
  0x50   : > { %943 = vmatpush1.bf16.msra.mxu0 %v3701_v15 }
  0x51   : > { %944 = vmatprep.subr.bf16.mxu0 %v3983_v1 }
  0x54   : > { %945 = vmatpush1.bf16.msra.mxu0 %v3702_v16 }
  0x55   : > { %946 = vmatprep.subr.bf16.mxu0 %v3983_v1 }
  0x58   : > { %947 = vmatpush1.bf16.msra.mxu0 %v3703_v17 }
  0x59   : > { %948 = vmatprep.subr.bf16.mxu0 %v3983_v1 }
  0x5c   : > { %949 = vmatpush1.bf16.msra.mxu0 %v3704_v18 }
  0x5d   : > { %950 = vmatprep.subr.bf16.mxu0 %v3983_v1 }
  0x60   : > { %951 = vmatpush1.bf16.msra.mxu0 %v3705_v19 }
  0x63   : > { %961 = vmatmul.mubr.bf16.vlgmr.msra.gmra.mrb[0].mxu0 %v824_v22 }
  0xc6   : > { %v1016_v31 = vpop.xlane.xlu0 %1015 }
  0xc7   : > { %v1017_v32 = vmul.f32 0.0078125, %v1016_v31 }
  0xc9   : > { %v1018_v35 = vsub.f32 %v1012_v11, %v1017_v32 }
  0xcb   : > { %v1019_v41 = vmul.f32 %v1018_v35, %v1018_v35 }
  0xcd   : > { %v1020_v43 = vsel %vm1013_vm1, %v1019_v41, 0.0 }
 0x136   : > { %v962_v24 = vpop.f32.mrb[0].mxu0 }
 0x137   : > { %v963_v26 = vadd.f32 %v962_v24, %v850_v23  ;;  %v964_v27 = vpop.f32.mrb[1].mxu0 }
 0x138   : > { %v965_v28 = vpop.f32.mrb[2].mxu0 }
 0x139   : > { %v966_v29 = vadd.f32 %v965_v28, %v851_v25  ;;  %v967_v30 = vpop.f32.mrb[3].mxu0  ;;  %969 = vadd.xlane.f32.xlu0 %v963_v26 }
 0x13b   : > { %971 = vadd.xlane.f32.xlu1 %v966_v29 }
 0x1c6   : > { %v970_v33 = vpop.xlane.xlu0 %969 }
 0x1c7   : > { %v974_v34 = vmul.f32 0.0078125, %v970_v33 }
 0x1c8   : > { %v972_v36 = vpop.xlane.xlu1 %971 }
 0x1c9   : > { %v976_v37 = vsub.f32 %v963_v26, %v974_v34  ;;  %v975_v38 = vmul.f32 0.0078125, %v972_v36 }
 0x1cb   : > { %v977_v39 = vsub.f32 %v966_v29, %v975_v38  ;;  %v978_v40 = vmul.f32 %v976_v37, %v976_v37 }
 0x1cd   : > { %980 = vadd.xlane.f32.xlu1 %v978_v40  ;;  %v979_v42 = vmul.f32 %v977_v39, %v977_v39 }
 0x1cf   : > { %982 = vadd.xlane.f32.xlu0 %v979_v42 }
 0x1d1   : > { %1021 = vadd.xlane.f32.xlu1 %v1020_v43 }
 0x25a   : > { %v981_v44 = vpop.xlane.xlu1 %980 }
 0x25b   : > { %v984_v45 = vmul.f32 0.0078125, %v981_v44 }
 0x25c   : > { %v983_v47 = vpop.xlane.xlu0 %982 }
 0x25d   : > { %v986_v48 = vadd.f32 1e-05, %v984_v45  ;;  %v985_v49 = vmul.f32 0.0078125, %v983_v47 }
 0x25e   : > { %v1022_v50 = vpop.xlane.xlu1 %1021 }
 0x25f   : > { %3706 = vrsqrt.f32 %v986_v48  ;;  %v987_v51 = vadd.f32 1e-05, %v985_v49  ;;  %v1023_v52 = vmul.f32 0.0078125, %v1022_v50 }
 0x261   : > { %3708 = vrsqrt.f32 %v987_v51  ;;  %v1024_v54 = vadd.f32 1e-05, %v1023_v52 }
 0x263   : > { %3710 = vrsqrt.f32 %v1024_v54 }
 0x269   : > { %v3707_v59 = vpop.eup %3706 }
 0x26a   : > { %v990_v60 = vmul.f32 %v3707_v59, %v976_v37 }
 0x26b   : > { %v3709_v62 = vpop.eup %3708 }
 0x26c   : > { %v998_v63 = vmul.f32 %v996_v58, %v990_v60  ;;  %v991_v0 = vmul.f32 %v3709_v62, %v977_v39 }
 0x26d   : > { %v3711_v1 = vpop.eup %3710 }
 0x26e   : > { %v1006_v2 = vadd.f32 %v1004_v61, %v998_v63  ;;  %v999_v3 = vmul.f32 %v996_v58, %v991_v0  ;;  %v1026_v4 = vmul.f32 %v3711_v1, %v1018_v35 }
 0x270   : > { %1008 = vst [vmem:[%s4191_s11 + $0x1] sm:$0xff] %v1006_v2  ;;  %v1007_v5 = vadd.f32 %v1004_v61, %v999_v3  ;;  %v1027_v6 = vmul.f32 %v1026_v4, %v818_v56 }
 0x272   : > { %1009 = vst [vmem:[%s4191_s11 + $0x9] sm:$0xff] %v1007_v5  ;;  %v1028_v7 = vadd.f32 %v1027_v6, %v819_v57 }
 0x274   : > { %1029 = vst [vmem:[%s4191_s11] sm:$0x1] %v1028_v7 }
 0x275 PF: > { %vm1189_vm2 = vcmask 1040384   ;;  %v3712_v12 = vld [vmem:[%s4143_s30 + $0x4] ss:$12 sps:$4 sm:$0xff]   ;;  %v3714_v13 = vld [vmem:[%s4143_s30] ss:$12 sps:$4 sm:$0xff]   ;;  %v3984_v45 = vmov 0   ;;  %s4729_s25 = scalar_lea.vmem %s4678_s7, %s4122_s23  ;;  %s4732_s1 = scalar_lea.vmem %s4683_s12, %s4122_s23 }
 0x276   : > { %v3715_v14 = vld [vmem:[%s4143_s30 + $0x8] ss:$12 sps:$4 sm:$0xff]   ;;  %1386 = vmatprep.subr.bf16.mxu0 %v3712_v12  ;;  %v3718_v29 = vld [vmem:[%s4143_s30 + $0x18] ss:$12 sps:$4 sm:$0xff]   ;;  %v3719_v30 = vld [vmem:[%s4143_s30 + $0x20] ss:$12 sps:$4 sm:$0xff]   ;;  %1418 = vmatprep.mubr.bf16.mxu0 %v3984_v45  ;;  %s4733_s9 = scalar_lea.vmem %s4684_s13, %s4122_s23 }
 0x277   : > { %v3716_v15 = vld [vmem:[%s4143_s30 + $0x1c] ss:$12 sps:$4 sm:$0xff]   ;;  %3534 = vmatprep.subr.bf16.mxu1 %v3715_v14  ;;  %1387 = vmatpush1.bf16.msra.mxu0 %v3714_v13  ;;  %v3720_v31 = vld [vmem:[%s4143_s30 + $0x34] ss:$12 sps:$4 sm:$0xff]   ;;  %v3723_v33 = vld [vmem:[%s4143_s30 + $0x38] ss:$12 sps:$4 sm:$0xff]  }
 0x278   : > { %3535 = vmatpush3.bf16.msra.mxu1 %v3715_v14  ;;  %1388 = vmatprep.subr.bf16.mxu0 %v3716_v15  ;;  %v3722_v32 = vld [vmem:[%s4143_s30 + $0x30] ss:$12 sps:$4 sm:$0xff]   ;;  %v3724_v34 = vld [vmem:[%s4143_s30 + $0x4c] ss:$12 sps:$4 sm:$0xff]   ;;  %v3726_v35 = vld [vmem:[%s4143_s30 + $0x48] ss:$12 sps:$4 sm:$0xff]  }
 0x279   : > { %v1032_v9 = vld [vmem:[%s4191_s11 + $0x10] sm:$0x1]  ;;  %v1031_v10 = vld [vmem:[%s4191_s11 + $0x8] sm:$0xff]  ;;  %3536 = vmatprep.subr.bf16.mxu1 %v3719_v30  ;;  %v3734_v42 = vld [vmem:[%s4143_s30 + $0x78] ss:$12 sps:$4 sm:$0xff]   ;;  %s4730_s6 = sld [smem:[#allocation16_spill]] }
 0x27a   : > { %v1190_v11 = vsel %vm1189_vm2, %v1032_v9, 0.0  ;;  %v3727_v36 = vld [vmem:[%s4143_s30 + $0x50] ss:$12 sps:$4 sm:$0xff]   ;;  %v3730_v38 = vld [vmem:[%s4143_s30 + $0x60] ss:$12 sps:$4 sm:$0xff]   ;;  %vm1489_vm3 = vcmask 261120  }
 0x27b   : > { %v1030_v8 = vld [vmem:[%s4191_s11] sm:$0xff]  ;;  %1191 = vadd.xlane.f32.xlu1 %v1190_v11  ;;  %1389 = vmatpush1.bf16.msra.mxu0 %v3718_v29  ;;  %v3731_v39 = vld [vmem:[%s4143_s30 + $0x68] ss:$12 sps:$4 sm:$0xff]   ;;  %v3738_v46 = vld [vmem:[%s4143_s30 + $0x90] ss:$12 sps:$4 sm:$0xff]   ;;  %v1243_v11 = vlaneseq  ;;  %vm1553_vm4 = vcmask 138240  }
 0x27c   : > { %1185 = vadd.xlane.f32.xlu0 %v1030_v8  ;;  %3537 = vmatpush3.bf16.msra.mxu1 %v3719_v30  ;;  %v3728_v37 = vld [vmem:[%s4143_s30 + $0x64] ss:$12 sps:$4 sm:$0xff]   ;;  %v3732_v40 = vld [vmem:[%s4143_s30 + $0x7c] ss:$12 sps:$4 sm:$0xff]   ;;  %v3735_v41 = vld [vmem:[%s4143_s30 + $0x80] ss:$12 sps:$4 sm:$0xff]  }
 0x27d   : > { %1390 = vmatprep.subr.bf16.mxu0 %v3720_v31  ;;  %3538 = vmatprep.subr.bf16.mxu1 %v3723_v33  ;;  %v3736_v43 = vld [vmem:[%s4143_s30 + $0x94] ss:$12 sps:$4 sm:$0xff]   ;;  %v3739_v44 = vld [vmem:[%s4143_s30 + $0x98] ss:$12 sps:$4 sm:$0xff]   ;;  %v3743_v48 = vld [vmem:[%s4143_s30 + $0xb0] ss:$12 sps:$4 sm:$0xff]  }
 0x27e   : > { %v3740_v47 = vld [vmem:[%s4143_s30 + $0xac] ss:$12 sps:$4 sm:$0xff]   ;;  %v3742_v49 = vld [vmem:[%s4143_s30 + $0xa8] ss:$12 sps:$4 sm:$0xff]   ;;  %v3290_v61 = vld [vmem:[%s4729_s25] ss:$0 sm:$0xff]  ;;  %s4734_s25 = scalar_lea.vmem %s4685_s14, %s4122_s23 }
 0x27f   : > { %1391 = vmatpush1.bf16.msra.mxu0 %v3722_v32  ;;  %s4731_s24 = scalar_lea.vmem %s4730_s6, %s4122_s23  ;;  %v4313_v12 = vshrl.u32 %v1243_v11, 7  ;;  %v1067_v14 = vld [vmem:[%s4153_s29] sm:$0x7]  ;;  %vm1560_vm5 = vcmask 131072   ;;  %s3985_s29 = smov 96   ;;  %vm1653_vm6 = vcmask 253952  }
 0x280   : > { %1187 = vadd.xlane.f32.xlu0 %v1031_v10  ;;  %3539 = vmatpush3.bf16.msra.mxu1 %v3723_v33  ;;  %v3291_v3 = vld [vmem:[%s4731_s24] ss:$0 sm:$0xff]  ;;  %s3986_s28 = smov 64   ;;  %s3987_s5 = smov 32   ;;  %vm1841_vm7 = vcmask 523520   ;;  %vm1844_vm8 = vcmask 516352  }
 0x281   : > { %1392 = vmatprep.subr.bf16.mxu0 %v3724_v34  ;;  %3540 = vmatprep.subr.bf16.mxu1 %v3727_v36  ;;  %v1253_v13 = vsub.s32 2, %v4313_v12  ;;  %v1245_v15 = vsub.s32 0, %v4313_v12  ;;  %vm2026_vm9 = vcmask 785920   ;;  %vm2029_vm10 = vcmask 778752  }
 0x282   : > { %vm2211_vm11 = vcmask 1048320   ;;  %vm2214_vm12 = vcmask 1041152  }
 0x283   : > { %1393 = vmatpush1.bf16.msra.mxu0 %v3726_v35 }
 0x284   : > { %3541 = vmatpush3.bf16.msra.mxu1 %v3727_v36  ;;  %1394 = vmatprep.subr.bf16.mxu0 %v3728_v37 }
 0x285   : > { %3542 = vmatprep.subr.bf16.mxu1 %v3731_v39 }
 0x287   : > { %1395 = vmatpush1.bf16.msra.mxu0 %v3730_v38  ;;  %v4333_v38 = vsel %vm1189_vm2, 65535, %v3984_v45 }
 0x288   : > { %3543 = vmatpush3.bf16.msra.mxu1 %v3731_v39  ;;  %1396 = vmatprep.subr.bf16.mxu0 %v3732_v40 }
 0x289   : > { %3544 = vmatprep.subr.bf16.mxu1 %v3735_v41 }
 0x28b   : > { %1397 = vmatpush1.bf16.msra.mxu0 %v3734_v42 }
 0x28c   : > { %3545 = vmatpush3.bf16.msra.mxu1 %v3735_v41  ;;  %1398 = vmatprep.subr.bf16.mxu0 %v3736_v43 }
 0x28d   : > { %3546 = vmatprep.subr.bf16.mxu1 %v3739_v44 }
 0x28f   : > { %1399 = vmatpush1.bf16.msra.mxu0 %v3738_v46 }
 0x290   : > { %3547 = vmatpush3.bf16.msra.mxu1 %v3739_v44  ;;  %1400 = vmatprep.subr.bf16.mxu0 %v3740_v47 }
 0x291   : > { %3548 = vmatprep.subr.bf16.mxu1 %v3743_v48 }
 0x293   : > { %1401 = vmatpush1.bf16.msra.mxu0 %v3742_v49 }
 0x294   : > { %3549 = vmatpush3.bf16.msra.mxu1 %v3743_v48 }
 0x308   : > { %v1192_v18 = vpop.xlane.xlu1 %1191 }
 0x309   : > { %v1186_v16 = vpop.xlane.xlu0 %1185  ;;  %v1196_v19 = vmul.f32 0.0078125, %v1192_v18  ;;  %v1246_v18 = vrot.slane %v1067_v14, %v1245_v15 }
 0x30a   : > { %v1194_v17 = vmul.f32 0.0078125, %v1186_v16  ;;  %v1249_v16 = vsub.s32 1, %v4313_v12 }
 0x30b   : > { %v4267_v21 = vsub.f32 %v1032_v9, %v1196_v19 }
 0x30c   : > { %v4265_v20 = vsub.f32 %v1030_v8, %v1194_v17  ;;  %v1254_v17 = vrot.slane %v1067_v14, %v1253_v13 }
 0x30d   : > { %v1188_v22 = vpop.xlane.xlu0 %1187  ;;  %v1202_v25 = vmul.f32 %v4267_v21, %v4267_v21 }
 0x30e   : > { %v1195_v23 = vmul.f32 0.0078125, %v1188_v22  ;;  %v1200_v24 = vmul.f32 %v4265_v20, %v4265_v20 }
 0x30f   : > { %v1207_v27 = vsel %vm1189_vm2, %v1202_v25, 0.0 }
 0x310   : > { %v4273_v26 = vsub.f32 %v1031_v10, %v1195_v23  ;;  %1203 = vadd.xlane.f32.xlu1 %v1200_v24 }
 0x312   : > { %v1201_v28 = vmul.f32 %v4273_v26, %v4273_v26 }
 0x314   : > { %1208 = vadd.xlane.f32.xlu1 %v1207_v27  ;;  %1205 = vadd.xlane.f32.xlu0 %v1201_v28 }
 0x39d   : > { %v1204_v50 = vpop.xlane.xlu1 %1203 }
 0x39e   : > { %v1210_v51 = vmul.f32 0.0078125, %v1204_v50 }
 0x3a0   : > { %v1213_v52 = vadd.f32 1e-05, %v1210_v51 }
 0x3a1   : > { %v1209_v53 = vpop.xlane.xlu1 %1208  ;;  %v1206_v54 = vpop.xlane.xlu0 %1205 }
 0x3a2   : > { %3832 = vrsqrt.f32 %v1213_v52  ;;  %v1212_v55 = vmul.f32 0.0078125, %v1209_v53  ;;  %v1211_v56 = vmul.f32 0.0078125, %v1206_v54 }
 0x3a4   : > { %v1215_v57 = vadd.f32 1e-05, %v1212_v55  ;;  %v1214_v58 = vadd.f32 1e-05, %v1211_v56 }
 0x3a6   : > { %3834 = vrsqrt.f32 %v1215_v57 }
 0x3a7   : > { %3836 = vrsqrt.f32 %v1214_v58 }
 0x3ac   : > { %v3833_v59 = vpop.eup %3832 }
 0x3ad   : > { %v1219_v60 = vmul.f32 %v3833_v59, %v4265_v20  ;;  %v1250_v20 = vrot.slane %v1067_v14, %v1249_v16 }
 0x3af   : > { %v1228_v2 = vmul.f32 %v3290_v61, %v1219_v60 }
 0x3b0   : > { %v3835_v62 = vpop.eup %3834 }
 0x3b1   : > { %v3837_v63 = vpop.eup %3836  ;;  %v1221_v0 = vmul.f32 %v3835_v62, %v4267_v21  ;;  %v1237_v7 = vadd.f32 %v3291_v3, %v1228_v2 }
 0x3b2   : > { %v1220_v1 = vmul.f32 %v3837_v63, %v4273_v26 }
 0x3b3   : > { %v1230_v4 = vmul.f32 %v3290_v61, %v1221_v0 }
 0x3b4   : > { %v1229_v5 = vmul.f32 %v3290_v61, %v1220_v1 }
 0x3b5   : > { %v1239_v6 = vadd.f32 %v3291_v3, %v1230_v4 }
 0x3b6   : > { %v1238_v8 = vadd.f32 %v3291_v3, %v1229_v5 }
 0x3b7   : > { %v1241_v9 = vpack.c.bf16 %v1239_v6, %v1239_v6 }
 0x3b8   : > { %v1240_v10 = vpack.c.bf16 %v1238_v8, %v1237_v7 }
 0x3ba   : > { %1419 = vmatmul.mubr.bf16.vlgmr.msra.gmra.mrb[0].mxu0 %v1240_v10  ;;  %3550 = vmatprep.mubr.bf16.mxu1 %v1240_v10 }
 0x3bb   : > { %3551 = vmatmul.mubr.bf16.vlgmr.msra.gmra.mrb[0].mxu1 %v1241_v9  ;;  %1428 = vmatprep.mubr.bf16.mxu0 %v3984_v45 }
 0x3c2   : > { %1429 = vmatmul.mubr.bf16.gmra.mrb[4].mxu0 %v1241_v9 }
 0x48d   : > { %v1420_v19 = vpop.f32.mrb[0].mxu0 }
 0x48e   : > { %v1422_v21 = vpop.f32.mrb[1].mxu0  ;;  %v3552_v22 = vpop.f32.mrb[0].mxu1  ;;  %v1421_v26 = vadd.f32 %v1420_v19, %v1246_v18 }
 0x48f   : > { %v1480_v23 = vadd.f32 %v3552_v22, %v1254_v17  ;;  %v1424_v24 = vpop.f32.mrb[2].mxu0  ;;  %v1471_v25 = vpop.f32.mrb[1].mxu1  ;;  %v1423_v30 = vadd.f32 %v1422_v21, %v1250_v20 }
 0x490   : > { %v1425_v27 = vadd.f32 %v1424_v24, %v1246_v18  ;;  %v1426_v28 = vpop.f32.mrb[3].mxu0  ;;  %v3553_v29 = vpop.f32.mrb[2].mxu1  ;;  %v1472_v35 = vadd.f32 %v1471_v25, %v1254_v17 }
 0x491   : > { %v1427_v31 = vadd.f32 %v1426_v28, %v1250_v20  ;;  %v1474_v32 = vpop.f32.mrb[3].mxu1  ;;  %v4325_v33 = vpack.c.bf16 %v1480_v23, %v1480_v23 }
 0x492   : > { %v4327_v34 = vpack.c.bf16 %v1425_v27, %v1421_v26  ;;  %v1475_v36 = vadd.f32 %v1474_v32, %v1254_v17 }
 0x493   : > { %v4329_v37 = vpack.c.bf16 %v1427_v31, %v1423_v30  ;;  %v1601_v43 = vand.u32 %v4333_v38, %v4325_v33 }
 0x494   : > { %v4335_v39 = vpack.c.bf16 %v1475_v36, %v1472_v35  ;;  %3558 = vmatprep.mubr.msk.bf16.mxu0 %vm1489_vm3, %v4327_v34 }
 0x495   : > { %v1430_v40 = vpop.f32.mrb[4].mxu0  ;;  %3638 = vmatprep.subr.msk.bf16.mxu0 %vm1489_vm3, %v4329_v37  ;;  %v1497_v41 = vsel %vm1489_vm3, %v4329_v37, 0 }
 0x496   : > { %v1432_v42 = vpop.f32.mrb[5].mxu0  ;;  %3555 = vmatpush3.bf16.xpose.msra.mxu0 %v1497_v41  ;;  %3562 = vmatprep.subr.bf16.mxu1 %v4335_v39  ;;  %v1431_v50 = vadd.f32 %v1430_v40, %v1246_v18 }
 0x497   : > { %v1433_v44 = vadd.f32 %v1432_v42, %v1250_v20  ;;  %v1434_v46 = vpop.f32.mrb[6].mxu0  ;;  %3563 = vmatpush3.bf16.msra.mxu1 %v4335_v39 }
 0x498   : > { %v1435_v47 = vpop.f32.mrb[7].mxu0  ;;  %3564 = vmatprep.subr.bf16.mxu1 %v1601_v43  ;;  %v4353_v51 = vpack.c.bf16 %v1431_v50, %v1431_v50 }
 0x499   : > { %v4347_v48 = vpack.c.bf16 %v1433_v44, %v1433_v44 }
 0x49b   : > { %3639 = vmatprep.subr.msk.bf16.mxu0 %vm1489_vm3, %v4347_v48  ;;  %3565 = vmatpush3.bf16.msra.mxu1 %v1601_v43  ;;  %v1500_v49 = vsel %vm1489_vm3, %v4347_v48, 0 }
 0x49e   : > { %3557 = vmatpush3.bf16.xpose.msra.mxu0 %v1500_v49 }
 0x4a5   : > { %3559 = vmatmul.mubr.msk.bf16.vlgmr.msra.gmra.mrb[8].mxu0 %vm1489_vm3, %v4353_v51 }
 0x578   : > { %v3560_v52 = vpop.f32.mrb[8].mxu0 }
 0x579   : > { %v1536_v53 = vpop.f32.mrb[9].mxu0  ;;  %v1552_v57 = vmul.f32 0.17677669, %v3560_v52 }
 0x57a   : > { %v1550_v54 = vmul.f32 0.17677669, %v1536_v53  ;;  %v3561_v55 = vpop.f32.mrb[10].mxu0 }
 0x57b   : > { %v1539_v56 = vpop.f32.mrb[11].mxu0  ;;  %v1561_v61 = vsel %vm1560_vm5, %v1552_v57, -inf }
 0x57c   : > { %v1551_v58 = vmul.f32 0.17677669, %v1539_v56  ;;  %v1554_v59 = vsel %vm1553_vm4, %v1550_v54, -inf }
 0x57d   : > { %1555 = vmax.xlane.f32.xlu0 %v1554_v59 }
 0x57e   : > { %v1557_v60 = vsel %vm1553_vm4, %v1551_v58, -inf }
 0x57f   : > { %1558 = vmax.xlane.f32.xlu1 %v1557_v60 }
 0x581   : > { %1562 = vmax.xlane.f32.xlu0 %v1561_v61 }
 0x60a   : > { %v1556_v62 = vpop.xlane.xlu0 %1555 }
 0x60b   : > { %v1564_v63 = vsub.f32 %v1550_v54, %v1556_v62 }
 0x60c   : > { %v1559_v0 = vpop.xlane.xlu1 %1558 }
 0x60d   : > { %v1567_v1 = vmul.f32 1.442695, %v1564_v63  ;;  %v1565_v2 = vsub.f32 %v1551_v58, %v1559_v0 }
 0x60e   : > { %v1563_v3 = vpop.xlane.xlu0 %1562 }
 0x60f   : > { %3838 = vpow2.f32 %v1567_v1  ;;  %v1569_v4 = vmul.f32 1.442695, %v1565_v2  ;;  %v1566_v5 = vsub.f32 %v1552_v57, %v1563_v3 }
 0x611   : > { %3840 = vpow2.f32 %v1569_v4  ;;  %v1571_v6 = vmul.f32 1.442695, %v1566_v5 }
 0x613   : > { %3842 = vpow2.f32 %v1571_v6 }
 0x619   : > { %v3839_v7 = vpop.eup %3838 }
 0x61a   : > { %v1573_v8 = vsel %vm1553_vm4, %v3839_v7, 0.0 }
 0x61b   : > { %v3841_v9 = vpop.eup %3840  ;;  %1574 = vadd.xlane.f32.xlu1 %v1573_v8 }
 0x61c   : > { %v1576_v10 = vsel %vm1553_vm4, %v3841_v9, 0.0 }
 0x61d   : > { %v3843_v11 = vpop.eup %3842  ;;  %1577 = vadd.xlane.f32.xlu0 %v1576_v10 }
 0x61e   : > { %v1579_v14 = vsel %vm1560_vm5, %v3843_v11, 0.0 }
 0x61f   : > { %1580 = vadd.xlane.f32.xlu1 %v1579_v14 }
 0x630   : > { %1665 = vrot.lane.b32.xlu1 %v4347_v48, %s3985_s29 }
 0x633   : > { %1663 = vrot.lane.b32.xlu0 %v4329_v37, %s3985_s29 }
 0x634   : > { %1657 = vrot.lane.b32.xlu1 %v4327_v34, %s3985_s29 }
 0x637   : > { %1659 = vrot.lane.b32.xlu0 %v4353_v51, %s3985_s29 }
 0x638   : > { %1850 = vrot.lane.b32.xlu1 %v4329_v37, %s3986_s28 }
 0x63b   : > { %1846 = vrot.lane.b32.xlu0 %v4327_v34, %s3986_s28 }
 0x63c   : > { %1852 = vrot.lane.b32.xlu1 %v4347_v48, %s3986_s28 }
 0x640   : > { %1848 = vrot.lane.b32.xlu1 %v4353_v51, %s3986_s28 }
 0x6a8   : > { %v1575_v17 = vpop.xlane.xlu1 %1574 }
 0x6a9   : > { %3844 = vrcp.f32 %v1575_v17 }
 0x6aa   : > { %v1578_v18 = vpop.xlane.xlu0 %1577 }
 0x6ab   : > { %3846 = vrcp.f32 %v1578_v18 }
 0x6ac   : > { %v1581_v19 = vpop.xlane.xlu1 %1580 }
 0x6ad   : > { %3848 = vrcp.f32 %v1581_v19 }
 0x6ae   : > { %v1664_v20 = vpop.permute.xlu0 %1663 }
 0x6af   : > { %3640 = vmatprep.subr.msk.bf16.mxu1 %vm1489_vm3, %v1664_v20  ;;  %v1674_v30 = vsel %vm1489_vm3, %v1664_v20, 0 }
 0x6b0   : > { %v1666_v23 = vpop.permute.xlu1 %1665 }
 0x6b1   : > { %v1677_v32 = vsel %vm1489_vm3, %v1666_v23, 0 }
 0x6b2   : > { %v1660_v36 = vpop.permute.xlu0 %1659 }
 0x6b3   : > { %v3845_v21 = vpop.eup %3844 }
 0x6b4   : > { %v1583_v24 = vmul.f32 %v3845_v21, %v3839_v7  ;;  %v1658_v31 = vpop.permute.xlu1 %1657 }
 0x6b5   : > { %v3847_v22 = vpop.eup %3846 }
 0x6b6   : > { %v1585_v25 = vmul.f32 %v3847_v22, %v3841_v9  ;;  %v1847_v40 = vpop.permute.xlu0 %1846 }
 0x6b7   : > { %v3849_v26 = vpop.eup %3848 }
 0x6b8   : > { %v1587_v27 = vmul.f32 %v3849_v26, %v3843_v11  ;;  %v1588_v28 = vpack.c.bf16 %v1585_v25, %v1583_v24  ;;  %v1851_v35 = vpop.permute.xlu1 %1850 }
 0x6b9   : > { %v1861_v41 = vsel %vm1489_vm3, %v1851_v35, 0 }
 0x6ba   : > { %3566 = vmatprep.mubr.msk.bf16.mxu1 %vm1553_vm4, %v1588_v28  ;;  %v1589_v29 = vpack.c.bf16 %v1587_v27, %v1587_v27 }
 0x6bc   : > { %3567 = vmatmul.mubr.msk.bf16.vlgmr.msra.gmra.mrb[4].mxu1 %vm1553_vm4, %v1589_v29  ;;  %v1853_v42 = vpop.permute.xlu1 %1852 }
 0x6bd   : > { %3571 = vmatpush3.bf16.xpose.msra.mxu1 %v1674_v30  ;;  %3574 = vmatprep.mubr.msk.bf16.mxu1 %vm1489_vm3, %v1658_v31  ;;  %v1864_v43 = vsel %vm1489_vm3, %v1853_v42, 0 }
 0x6be   : > { %3641 = vmatprep.subr.msk.bf16.mxu1 %vm1489_vm3, %v1666_v23 }
 0x6c0   : > { %v1849_v44 = vpop.permute.xlu1 %1848 }
 0x6c5   : > { %3573 = vmatpush3.bf16.xpose.msra.mxu1 %v1677_v32 }
 0x6c6   : > { %3642 = vmatprep.subr.msk.bf16.mxu1 %vm1489_vm3, %v1851_v35 }
 0x6cc   : > { %3575 = vmatmul.mubr.msk.bf16.vlgmr.msra.gmra.mrb[8].mxu1 %vm1489_vm3, %v1660_v36 }
 0x6cd   : > { %3587 = vmatpush3.bf16.xpose.msra.mxu1 %v1861_v41  ;;  %3590 = vmatprep.mubr.msk.bf16.mxu1 %vm1489_vm3, %v1847_v40 }
 0x6ce   : > { %3643 = vmatprep.subr.msk.bf16.mxu1 %vm1489_vm3, %v1853_v42 }
 0x6d5   : > { %3589 = vmatpush3.bf16.xpose.msra.mxu1 %v1864_v43 }
 0x6dc   : > { %3591 = vmatmul.mubr.msk.bf16.vlgmr.msra.gmra.mrb[12].mxu1 %vm1489_vm3, %v1849_v44 }
 0x78f   : > { %v3568_v46 = vpop.f32.mrb[4].mxu1 }
 0x790   : > { %1654 = vst.msk [vmem:[#allocation2 + $0x10] sm:$0x1] %vm1653_vm6, %v3568_v46  ;;  %v1637_v47 = vpop.f32.mrb[5].mxu1 }
 0x791   : > { %1651 = vst.msk [vmem:[#allocation2] sm:$0xff] %vm1489_vm3, %v1637_v47  ;;  %v3569_v49 = vpop.f32.mrb[6].mxu1 }
 0x792   : > { %v1640_v50 = vpop.f32.mrb[7].mxu1 }
 0x793   : > { %1652 = vst.msk [vmem:[#allocation2 + $0x8] sm:$0xff] %vm1489_vm3, %v1640_v50 }
 0x79f   : > { %v3576_v52 = vpop.f32.mrb[8].mxu1 }
 0x7a0   : > { %v1713_v53 = vpop.f32.mrb[9].mxu1  ;;  %v1729_v22 = vmul.f32 0.17677669, %v3576_v52 }
 0x7a1   : > { %v3577_v54 = vpop.f32.mrb[10].mxu1  ;;  %v1727_v21 = vmul.f32 0.17677669, %v1713_v53 }
 0x7a2   : > { %v1716_v55 = vpop.f32.mrb[11].mxu1 }
 0x7a3   : > { %v1730_v23 = vsel %vm1553_vm4, %v1727_v21, -inf  ;;  %v1728_v24 = vmul.f32 0.17677669, %v1716_v55 }
 0x7a5   : > { %v1733_v25 = vsel %vm1553_vm4, %v1728_v24, -inf }
 0x7af   : > { %v3592_v56 = vpop.f32.mrb[12].mxu1 }
 0x7b0   : > { %v1900_v57 = vpop.f32.mrb[13].mxu1  ;;  %v1916_v61 = vmul.f32 0.17677669, %v3592_v56 }
 0x7b1   : > { %v1914_v58 = vmul.f32 0.17677669, %v1900_v57  ;;  %v3593_v59 = vpop.f32.mrb[14].mxu1 }
 0x7b2   : > { %v1903_v60 = vpop.f32.mrb[15].mxu1  ;;  %v1923_v1 = vsel %vm1560_vm5, %v1916_v61, -inf }
 0x7b3   : > { %v1915_v62 = vmul.f32 0.17677669, %v1903_v60  ;;  %v1917_v63 = vsel %vm1553_vm4, %v1914_v58, -inf }
 0x7b4   : > { %1918 = vmax.xlane.f32.xlu0 %v1917_v63 }
 0x7b5   : > { %v1920_v0 = vsel %vm1553_vm4, %v1915_v62, -inf }
 0x7b6   : > { %1921 = vmax.xlane.f32.xlu1 %v1920_v0 }
 0x7b8   : > { %1924 = vmax.xlane.f32.xlu0 %v1923_v1 }
 0x841   : > { %v1919_v2 = vpop.xlane.xlu0 %1918 }
 0x842   : > { %v1926_v3 = vsub.f32 %v1914_v58, %v1919_v2 }
 0x843   : > { %v1922_v4 = vpop.xlane.xlu1 %1921 }
 0x844   : > { %v1929_v5 = vmul.f32 1.442695, %v1926_v3  ;;  %v1927_v6 = vsub.f32 %v1915_v62, %v1922_v4 }
 0x845   : > { %v1925_v7 = vpop.xlane.xlu0 %1924 }
 0x846   : > { %3850 = vpow2.f32 %v1929_v5  ;;  %v1931_v8 = vmul.f32 1.442695, %v1927_v6  ;;  %v1928_v9 = vsub.f32 %v1916_v61, %v1925_v7 }
 0x848   : > { %3852 = vpow2.f32 %v1931_v8  ;;  %v1933_v10 = vmul.f32 1.442695, %v1928_v9 }
 0x84a   : > { %3854 = vpow2.f32 %v1933_v10 }
 0x850   : > { %v3851_v11 = vpop.eup %3850 }
 0x851   : > { %v1935_v14 = vsel %vm1553_vm4, %v3851_v11, 0.0 }
 0x852   : > { %v3853_v17 = vpop.eup %3852  ;;  %1936 = vadd.xlane.f32.xlu0 %v1935_v14 }
 0x853   : > { %v1938_v20 = vsel %vm1553_vm4, %v3853_v17, 0.0 }
 0x854   : > { %v3855_v18 = vpop.eup %3854 }
 0x855   : > { %v1941_v19 = vsel %vm1560_vm5, %v3855_v18, 0.0 }
 0x856   : > { %1942 = vadd.xlane.f32.xlu1 %v1941_v19  ;;  %1939 = vadd.xlane.f32.xlu0 %v1938_v20 }
 0x867   : > { %1954 = vrot.lane.b32.xlu1 %v4325_v33, %s3986_s28 }
 0x86b   : > { %2035 = vrot.lane.b32.xlu1 %v4329_v37, %s3987_s5  ;;  %v1736_v37 = vsel %vm1560_vm5, %v1729_v22, -inf }
 0x86c   : > { %1952 = vrot.lane.b32.xlu0 %v4335_v39, %s3986_s28 }
 0x86f   : > { %2037 = vrot.lane.b32.xlu1 %v4347_v48, %s3987_s5 }
 0x870   : > { %2031 = vrot.lane.b32.xlu0 %v4327_v34, %s3987_s5 }
 0x873   : > { %2033 = vrot.lane.b32.xlu1 %v4353_v51, %s3987_s5 }
 0x88f   : > { %1731 = vmax.xlane.f32.xlu0 %v1730_v23 }
 0x893   : > { %1737 = vmax.xlane.f32.xlu0 %v1736_v37 }
 0x897   : > { %1734 = vmax.xlane.f32.xlu1 %v1733_v25 }
 0x8df   : > { %v1937_v26 = vpop.xlane.xlu0 %1936 }
 0x8e0   : > { %3856 = vrcp.f32 %v1937_v26 }
 0x8e3   : > { %v1940_v48 = vpop.xlane.xlu0 %1939  ;;  %v1943_v27 = vpop.xlane.xlu1 %1942 }
 0x8e4   : > { %3858 = vrcp.f32 %v1940_v48 }
 0x8e5   : > { %3860 = vrcp.f32 %v1943_v27 }
 0x8e7   : > { %v1953_v34 = vpop.permute.xlu0 %1952  ;;  %v1955_v51 = vpop.permute.xlu1 %1954 }
 0x8e8   : > { %v1964_v28 = vand.u32 %v1955_v51, %v4333_v38  ;;  %3594 = vmatprep.subr.bf16.mxu1 %v1953_v34 }
 0x8e9   : > { %3595 = vmatpush3.bf16.msra.mxu1 %v1953_v34 }
 0x8ea   : > { %3596 = vmatprep.subr.bf16.mxu1 %v1964_v28  ;;  %v3857_v29 = vpop.eup %3856 }
 0x8eb   : > { %v2036_v30 = vpop.permute.xlu1 %2035  ;;  %v1945_v35 = vmul.f32 %v3857_v29, %v3851_v11  ;;  %v2032_v43 = vpop.permute.xlu0 %2031 }
 0x8ec   : > { %v2046_v44 = vsel %vm1489_vm3, %v2036_v30, 0 }
 0x8ed   : > { %3597 = vmatpush3.bf16.msra.mxu1 %v1964_v28 }
 0x8ee   : > { %v3859_v31 = vpop.eup %3858  ;;  %3644 = vmatprep.subr.msk.bf16.mxu1 %vm1489_vm3, %v2036_v30 }
 0x8ef   : > { %v3861_v32 = vpop.eup %3860  ;;  %v1947_v36 = vmul.f32 %v3859_v31, %v3853_v17  ;;  %v2038_v46 = vpop.permute.xlu1 %2037 }
 0x8f0   : > { %v1949_v40 = vmul.f32 %v3861_v32, %v3855_v18  ;;  %v2049_v47 = vsel %vm1489_vm3, %v2038_v46, 0 }
 0x8f1   : > { %v1950_v41 = vpack.c.bf16 %v1947_v36, %v1945_v35 }
 0x8f2   : > { %v1951_v42 = vpack.c.bf16 %v1949_v40, %v1949_v40 }
 0x8f3   : > { %3598 = vmatprep.mubr.msk.bf16.mxu1 %vm1553_vm4, %v1950_v41  ;;  %v2034_v49 = vpop.permute.xlu1 %2033 }
 0x8f4   : > { %3599 = vmatmul.mubr.msk.bf16.vlgmr.msra.gmra.mrb[16].mxu1 %vm1553_vm4, %v1951_v42 }
 0x8f5   : > { %3606 = vmatprep.mubr.msk.bf16.mxu1 %vm1489_vm3, %v2032_v43 }
 0x8f6   : > { %3603 = vmatpush3.bf16.xpose.msra.mxu1 %v2046_v44 }
 0x8f7   : > { %3645 = vmatprep.subr.msk.bf16.mxu1 %vm1489_vm3, %v2038_v46 }
 0x8fe   : > { %3605 = vmatpush3.bf16.xpose.msra.mxu1 %v2049_v47 }
 0x905   : > { %3607 = vmatmul.mubr.msk.bf16.vlgmr.msra.gmra.mrb[20].mxu1 %vm1489_vm3, %v2034_v49 }
 0x906   : > { %2594 = vmatprep.mubr.bf16.mxu1 %v3984_v45 }
 0x91c   : > { %v1732_v55 = vpop.xlane.xlu0 %1731 }
 0x91d   : > { %v1739_v59 = vsub.f32 %v1727_v21, %v1732_v55 }
 0x91f   : > { %v1742_v61 = vmul.f32 1.442695, %v1739_v59 }
 0x920   : > { %v1738_v60 = vpop.xlane.xlu0 %1737 }
 0x921   : > { %v1741_v62 = vsub.f32 %v1729_v22, %v1738_v60 }
 0x923   : > { %v1746_v63 = vmul.f32 1.442695, %v1741_v62 }
 0x924   : > { %v1735_v50 = vpop.xlane.xlu1 %1734 }
 0x925   : > { %v1740_v56 = vsub.f32 %v1728_v24, %v1735_v50 }
 0x927   : > { %v1744_v58 = vmul.f32 1.442695, %v1740_v56 }
 0x929   : > { %3862 = vpow2.f32 %v1744_v58 }
 0x92a   : > { %3864 = vpow2.f32 %v1742_v61 }
 0x92b   : > { %3866 = vpow2.f32 %v1746_v63 }
 0x933   : > { %v3863_v7 = vpop.eup %3862 }
 0x934   : > { %v1751_v10 = vsel %vm1553_vm4, %v3863_v7, 0.0  ;;  %v3865_v14 = vpop.eup %3864 }
 0x935   : > { %v1748_v17 = vsel %vm1553_vm4, %v3865_v14, 0.0  ;;  %v3867_v18 = vpop.eup %3866 }
 0x936   : > { %v1754_v19 = vsel %vm1560_vm5, %v3867_v18, 0.0 }
 0x9c7   : > { %v4426_v52 = vpop.f32.mrb[16].mxu1 }
 0x9c8   : > { %v4428_v53 = vpop.f32.mrb[17].mxu1 }
 0x9c9   : > { %v3601_v54 = vpop.f32.mrb[18].mxu1 }
 0x9ca   : > { %v4430_v57 = vpop.f32.mrb[19].mxu1 }
 0x9d8   : > { %v3608_v0 = vpop.f32.mrb[20].mxu1 }
 0x9d9   : > { %v2101_v1 = vmul.f32 0.17677669, %v3608_v0  ;;  %v2085_v2 = vpop.f32.mrb[21].mxu1 }
 0x9da   : > { %v2099_v3 = vmul.f32 0.17677669, %v2085_v2  ;;  %v3609_v4 = vpop.f32.mrb[22].mxu1 }
 0x9db   : > { %v2088_v5 = vpop.f32.mrb[23].mxu1  ;;  %v2108_v6 = vsel %vm1560_vm5, %v2101_v1, -inf  ;;  %v3744_v4 = vld [vmem:[%s4148_s26] sm:$0xff]  }
 0x9dc   : > { %v2100_v8 = vmul.f32 0.17677669, %v2088_v5  ;;  %2109 = vmax.xlane.f32.xlu1 %v2108_v6  ;;  %v2102_v9 = vsel %vm1553_vm4, %v2099_v3, -inf  ;;  %v3745_v5 = vld [vmem:[%s4148_s26 + $0x8] sm:$0xff]   ;;  %v3747_v6 = vld [vmem:[%s4148_s26 + $0x18] sm:$0xff]  }
 0x9dd   : > { %2103 = vmax.xlane.f32.xlu0 %v2102_v9 }
 0x9de   : > { %v2105_v11 = vsel %vm1553_vm4, %v2100_v8, -inf }
 0x9e0   : > { %1752 = vadd.xlane.f32.xlu1 %v1751_v10 }
 0x9e1   : > { %2106 = vmax.xlane.f32.xlu0 %v2105_v11 }
 0x9e5   : > { %1749 = vadd.xlane.f32.xlu0 %v1748_v17  ;;  %v3750_v17 = vld [vmem:[%s4148_s26 + $0x30] sm:$0xff]  }
 0x9e9   : > { %1755 = vadd.xlane.f32.xlu0 %v1754_v19 }
 0xa69   : > { %v2110_v20 = vpop.xlane.xlu1 %2109 }
 0xa6a   : > { %v2113_v21 = vsub.f32 %v2101_v1, %v2110_v20  ;;  %v2104_v22 = vpop.xlane.xlu0 %2103 }
 0xa6b   : > { %v2111_v23 = vsub.f32 %v2099_v3, %v2104_v22 }
 0xa6c   : > { %v2118_v24 = vmul.f32 1.442695, %v2113_v21 }
 0xa6d   : > { %v2114_v37 = vmul.f32 1.442695, %v2111_v23  ;;  %v1753_v26 = vpop.xlane.xlu1 %1752 }
 0xa6e   : > { %3868 = vpow2.f32 %v2118_v24  ;;  %v2107_v25 = vpop.xlane.xlu0 %2106 }
 0xa6f   : > { %v2112_v48 = vsub.f32 %v2100_v8, %v2107_v25  ;;  %3870 = vpow2.f32 %v2114_v37 }
 0xa70   : > { %3872 = vrcp.f32 %v1753_v26 }
 0xa71   : > { %v2116_v27 = vmul.f32 1.442695, %v2112_v48 }
 0xa72   : > { %v1750_v34 = vpop.xlane.xlu0 %1749 }
 0xa73   : > { %3874 = vpow2.f32 %v2116_v27 }
 0xa74   : > { %3876 = vrcp.f32 %v1750_v34 }
 0xa76   : > { %v1756_v43 = vpop.xlane.xlu0 %1755 }
 0xa77   : > { %3878 = vrcp.f32 %v1756_v43 }
 0xa78   : > { %v3869_v51 = vpop.eup %3868 }
 0xa79   : > { %v2126_v28 = vsel %vm1560_vm5, %v3869_v51, 0.0  ;;  %v3871_v29 = vpop.eup %3870 }
 0xa7a   : > { %2127 = vadd.xlane.f32.xlu1 %v2126_v28  ;;  %v3873_v30 = vpop.eup %3872  ;;  %v2120_v32 = vsel %vm1553_vm4, %v3871_v29, 0.0 }
 0xa7b   : > { %v1760_v41 = vmul.f32 %v3873_v30, %v3863_v7  ;;  %v3748_v7 = vld [vmem:[%s4148_s26 + $0x20] sm:$0xff]  }
 0xa7c   : > { %v3332_v30 = vld [vmem:[%s4732_s1] ss:$0 sm:$0xff] }
 0xa7d   : > { %v3875_v31 = vpop.eup %3874 }
 0xa7e   : > { %v3877_v35 = vpop.eup %3876  ;;  %2121 = vadd.xlane.f32.xlu1 %v2120_v32  ;;  %v2123_v36 = vsel %vm1553_vm4, %v3875_v31, 0.0 }
 0xa7f   : > { %2124 = vadd.xlane.f32.xlu0 %v2123_v36  ;;  %v1758_v40 = vmul.f32 %v3877_v35, %v3865_v14  ;;  %v3749_v14 = vld [vmem:[%s4148_s26 + $0x28] sm:$0xff]  }
 0xa81   : > { %v1763_v42 = vpack.c.bf16 %v1760_v41, %v1758_v40  ;;  %v3879_v50 = vpop.eup %3878 }
 0xa82   : > { %v1762_v56 = vmul.f32 %v3879_v50, %v3867_v18  ;;  %v3751_v18 = vld [vmem:[%s4148_s26 + $0x38] sm:$0xff]  }
 0xa83   : > { %3582 = vmatprep.mubr.msk.bf16.mxu0 %vm1553_vm4, %v1763_v42  ;;  %v3940_v42 = vld [vmem:[%s4191_s11] sm:$0xff] }
 0xa84   : > { %v1764_v60 = vpack.c.bf16 %v1762_v56, %v1762_v56  ;;  %v3754_v56 = vld [vmem:[%s4172_s2 + $0x4] ss:$16 sps:$4 sm:$0xff]  }
 0xa85   : > { %2562 = vmatprep.subr.bf16.mxu1 %v3754_v56 }
 0xa8f   : > { %1769 = vrot.lane.b32.xlu1 %v4325_v33, %s3985_s29 }
 0xa93   : > { %2137 = vrot.lane.b32.xlu1 %v4335_v39, %s3987_s5 }
 0xa95   : > { %1767 = vrot.lane.b32.xlu0 %v4335_v39, %s3985_s29 }
 0xa97   : > { %2139 = vrot.lane.b32.xlu1 %v4325_v33, %s3987_s5 }
 0xb07   : > { %v2128_v44 = vpop.xlane.xlu1 %2127 }
 0xb0b   : > { %v2122_v46 = vpop.xlane.xlu1 %2121 }
 0xb0c   : > { %3880 = vrcp.f32 %v2122_v46  ;;  %v2125_v47 = vpop.xlane.xlu0 %2124  ;;  %v3941_v46 = vld [vmem:[%s4191_s11 + $0x8] sm:$0xff] }
 0xb0d   : > { %3882 = vrcp.f32 %v2125_v47 }
 0xb0e   : > { %3884 = vrcp.f32 %v2128_v44 }
 0xb0f   : > { %v1770_v49 = vpop.permute.xlu1 %1769 }
 0xb10   : > { %v1779_v54 = vand.u32 %v1770_v49, %v4333_v38  ;;  %v1768_v55 = vpop.permute.xlu0 %1767  ;;  %v3942_v49 = vld [vmem:[%s4191_s11 + $0x10] sm:$0x1] }
 0xb11   : > { %3578 = vmatprep.subr.bf16.mxu0 %v1768_v55 }
 0xb12   : > { %3579 = vmatpush3.bf16.msra.mxu0 %v1768_v55  ;;  %v3752_v55 = vld [vmem:[%s4172_s2] ss:$16 sps:$4 sm:$0xff]  }
 0xb13   : > { %3580 = vmatprep.subr.bf16.mxu0 %v1779_v54  ;;  %v2138_v39 = vpop.permute.xlu1 %2137  ;;  %2563 = vmatpush1.bf16.msra.mxu1 %v3752_v55 }
 0xb16   : > { %v3881_v58 = vpop.eup %3880  ;;  %3581 = vmatpush3.bf16.msra.mxu0 %v1779_v54 }
 0xb17   : > { %v3883_v33 = vpop.eup %3882  ;;  %3610 = vmatprep.subr.bf16.mxu0 %v2138_v39  ;;  %v2140_v59 = vpop.permute.xlu1 %2139  ;;  %v2130_v61 = vmul.f32 %v3881_v58, %v3871_v29  ;;  %v3757_v58 = vld [vmem:[%s4172_s2 + $0xc] ss:$16 sps:$4 sm:$0xff]  }
 0xb18   : > { %v3885_v62 = vpop.eup %3884  ;;  %v2149_v63 = vand.u32 %v2140_v59, %v4333_v38  ;;  %v2132_v0 = vmul.f32 %v3883_v33, %v3875_v31  ;;  %v3746_v38 = vld [vmem:[%s4148_s26 + $0x10] sm:$0xff]   ;;  %v3763_v59 = vld [vmem:[%s4172_s2 + $0x2c] ss:$16 sps:$4 sm:$0xff]  }
 0xb19   : > { %3583 = vmatmul.mubr.msk.bf16.vlgmr.msra.gmra.mrb[12].mxu0 %vm1553_vm4, %v1764_v60  ;;  %v2134_v2 = vmul.f32 %v3885_v62, %v3869_v51  ;;  %v3760_v33 = vld [vmem:[%s4172_s2 + $0x24] ss:$16 sps:$4 sm:$0xff]   ;;  %v3758_v60 = vld [vmem:[%s4172_s2 + $0x20] ss:$16 sps:$4 sm:$0xff]  }
 0xb1a   : > { %3611 = vmatpush3.bf16.msra.mxu0 %v2138_v39  ;;  %v2135_v1 = vpack.c.bf16 %v2132_v0, %v2130_v61  ;;  %v3755_v39 = vld [vmem:[%s4172_s2 + $0x8] ss:$16 sps:$4 sm:$0xff]   ;;  %2564 = vmatprep.subr.bf16.mxu1 %v3760_v33  ;;  %v3342_v33 = vld [vmem:[%s4734_s25] ss:$0 sm:$0xff] }
 0xb1b   : > { %3612 = vmatprep.subr.bf16.mxu0 %v2149_v63  ;;  %v2136_v3 = vpack.c.bf16 %v2134_v2, %v2134_v2  ;;  %v3761_v61 = vld [vmem:[%s4172_s2 + $0x28] ss:$16 sps:$4 sm:$0xff]   ;;  %2565 = vmatpush1.bf16.msra.mxu1 %v3758_v60 }
 0xb1c   : > { %3614 = vmatprep.mubr.msk.bf16.mxu0 %vm1553_vm4, %v2135_v1 }
 0xb1e   : > { %3613 = vmatpush3.bf16.msra.mxu0 %v2149_v63 }
 0xb1f   : > { %3618 = vmatprep.subr.bf16.mxu0 %v3744_v4 }
 0xb21   : > { %3615 = vmatmul.mubr.msk.bf16.vlgmr.msra.gmra.mrb[16].mxu0 %vm1553_vm4, %v2136_v3 }
 0xb22   : > { %3619 = vmatpush3.bf16.msra.mxu0 %v3744_v4 }
 0xb23   : > { %3620 = vmatprep.subr.bf16.mxu0 %v3745_v5 }
 0xb26   : > { %3621 = vmatpush3.bf16.msra.mxu0 %v3745_v5 }
 0xb27   : > { %3622 = vmatprep.subr.bf16.mxu0 %v3746_v38 }
 0xb2a   : > { %3623 = vmatpush3.bf16.msra.mxu0 %v3746_v38 }
 0xb2b   : > { %3624 = vmatprep.subr.bf16.mxu0 %v3747_v6 }
 0xb2e   : > { %3625 = vmatpush3.bf16.msra.mxu0 %v3747_v6 }
 0xb2f   : > { %3626 = vmatprep.subr.bf16.mxu0 %v3748_v7 }
 0xb32   : > { %3627 = vmatpush3.bf16.msra.mxu0 %v3748_v7 }
 0xb33   : > { %3628 = vmatprep.subr.bf16.mxu0 %v3749_v14 }
 0xb36   : > { %3629 = vmatpush3.bf16.msra.mxu0 %v3749_v14  ;;  %v3764_v14 = vld [vmem:[%s4172_s2 + $0x40] ss:$16 sps:$4 sm:$0xff]  }
 0xb37   : > { %3630 = vmatprep.subr.bf16.mxu0 %v3750_v17 }
 0xb3a   : > { %3631 = vmatpush3.bf16.msra.mxu0 %v3750_v17  ;;  %v3767_v17 = vld [vmem:[%s4172_s2 + $0x48] ss:$16 sps:$4 sm:$0xff]  }
 0xb3b   : > { %3632 = vmatprep.subr.bf16.mxu0 %v3751_v18 }
 0xb3e   : > { %3633 = vmatpush3.bf16.msra.mxu0 %v3751_v18  ;;  %v3772_v18 = vld [vmem:[%s4172_s2 + $0x64] ss:$16 sps:$4 sm:$0xff]  }
 0xb3f   : > { %2613 = vmatprep.subr.bf16.mxu0 %v3757_v58 }
 0xbec   : > { %v3584_v8 = vpop.f32.mrb[12].mxu0 }
 0xbed   : > { %v1815_v9 = vpop.f32.mrb[13].mxu0 }
 0xbee   : > { %1832 = vrot.lane.b32.xlu0 %v1815_v9, %s3987_s5  ;;  %v3585_v10 = vpop.f32.mrb[14].mxu0 }
 0xbef   : > { %v1818_v11 = vpop.f32.mrb[15].mxu0  ;;  %v3766_v10 = vld [vmem:[%s4172_s2 + $0x44] ss:$16 sps:$4 sm:$0xff]  }
 0xbf0   : > { %1834 = vrot.lane.b32.xlu1 %v1818_v11, %s3987_s5  ;;  %v3769_v11 = vld [vmem:[%s4172_s2 + $0x4c] ss:$16 sps:$4 sm:$0xff]   ;;  %2566 = vmatprep.subr.bf16.mxu1 %v3766_v10  ;;  %v3808_v10 = vld [vmem:[%s4182_s8 + $0x50] sm:$0xff]  }
 0xbf1   : > { %2567 = vmatpush1.bf16.msra.mxu1 %v3764_v14  ;;  %v3810_v14 = vld [vmem:[%s4182_s8 + $0x10] sm:$0xff]  }
 0xbf2   : > { %1836 = vrot.lane.b32.xlu0 %v3584_v8, %s3987_s5  ;;  %2568 = vmatprep.subr.bf16.mxu1 %v3772_v18  ;;  %v3812_v18 = vld [vmem:[%s4182_s8 + $0x58] sm:$0xff]  }
 0xbf4   : > { %2017 = vrot.lane.b32.xlu1 %v4428_v53, %s3986_s28  ;;  %v3616_v19 = vpop.f32.mrb[16].mxu0 }
 0xbf5   : > { %v2185_v20 = vpop.f32.mrb[17].mxu0 }
 0xbf6   : > { %2019 = vrot.lane.b32.xlu0 %v4430_v57, %s3986_s28  ;;  %v3617_v21 = vpop.f32.mrb[18].mxu0 }
 0xbf7   : > { %v2188_v22 = vpop.f32.mrb[19].mxu0  ;;  %v3773_v21 = vld [vmem:[%s4172_s2 + $0x68] ss:$16 sps:$4 sm:$0xff]  }
 0xbf8   : > { %2021 = vrot.lane.b32.xlu1 %v4426_v52, %s3986_s28 }
 0xbfa   : > { %2202 = vrot.lane.b32.xlu0 %v2185_v20, %s3985_s29  ;;  %v3770_v20 = vld [vmem:[%s4172_s2 + $0x60] ss:$16 sps:$4 sm:$0xff]  }
 0xbfb   : > { %2569 = vmatpush1.bf16.msra.mxu1 %v3770_v20  ;;  %v3814_v20 = vld [vmem:[%s4182_s8 + $0x18] sm:$0xff]  }
 0xbfc   : > { %2204 = vrot.lane.b32.xlu1 %v2188_v22, %s3985_s29  ;;  %v3778_v22 = vld [vmem:[%s4172_s2 + $0x84] ss:$16 sps:$4 sm:$0xff]  }
 0xbfd   : > { %2570 = vmatprep.subr.bf16.mxu1 %v3778_v22  ;;  %v3816_v22 = vld [vmem:[%s4182_s8 + $0x60] sm:$0xff]  }
 0xbfe   : > { %2206 = vrot.lane.b32.xlu0 %v3616_v19, %s3985_s29  ;;  %v3775_v19 = vld [vmem:[%s4172_s2 + $0x6c] ss:$16 sps:$4 sm:$0xff]  }
 0xc60   : > { %v1833_v53 = vpop.permute.xlu0 %1832 }
 0xc61   : > { %1842 = vst.msk [vmem:[#allocation2] sm:$0xff] %vm1841_vm7, %v1833_v53  ;;  %v3781_v53 = vld [vmem:[%s4172_s2 + $0x8c] ss:$16 sps:$4 sm:$0xff]  }
 0xc62   : > { %v1835_v23 = vpop.permute.xlu1 %1834 }
 0xc63   : > { %1843 = vst.msk [vmem:[#allocation2 + $0x8] sm:$0xff] %vm1841_vm7, %v1835_v23  ;;  %v3776_v23 = vld [vmem:[%s4172_s2 + $0x80] ss:$16 sps:$4 sm:$0xff]  }
 0xc64   : > { %v1837_v57 = vpop.permute.xlu0 %1836  ;;  %2571 = vmatpush1.bf16.msra.mxu1 %v3776_v23  ;;  %v3818_v23 = vld [vmem:[%s4182_s8 + $0x20] sm:$0xff]  }
 0xc65   : > { %1845 = vst.msk [vmem:[#allocation2 + $0x10] sm:$0x1] %vm1844_vm8, %v1837_v57  ;;  %v3779_v57 = vld [vmem:[%s4172_s2 + $0x88] ss:$16 sps:$4 sm:$0xff]  }
 0xc66   : > { %v2018_v24 = vpop.permute.xlu1 %2017 }
 0xc67   : > { %2027 = vst.msk [vmem:[#allocation2] sm:$0xff] %vm2026_vm9, %v2018_v24  ;;  %v3784_v24 = vld [vmem:[%s4172_s2 + $0xa4] ss:$16 sps:$4 sm:$0xff]  }
 0xc68   : > { %v2020_v37 = vpop.permute.xlu0 %2019  ;;  %2572 = vmatprep.subr.bf16.mxu1 %v3784_v24  ;;  %v3820_v24 = vld [vmem:[%s4182_s8 + $0x68] sm:$0xff]  }
 0xc69   : > { %2028 = vst.msk [vmem:[#allocation2 + $0x8] sm:$0xff] %vm2026_vm9, %v2020_v37  ;;  %v3787_v37 = vld [vmem:[%s4172_s2 + $0xac] ss:$16 sps:$4 sm:$0xff]  }
 0xc6a   : > { %v2022_v52 = vpop.permute.xlu1 %2021 }
 0xc6b   : > { %2030 = vst.msk [vmem:[#allocation2 + $0x10] sm:$0x1] %vm2029_vm10, %v2022_v52  ;;  %v3782_v52 = vld [vmem:[%s4172_s2 + $0xa0] ss:$16 sps:$4 sm:$0xff]  }
 0xc6c   : > { %v2203_v25 = vpop.permute.xlu0 %2202  ;;  %2573 = vmatpush1.bf16.msra.mxu1 %v3782_v52  ;;  %v3822_v52 = vld [vmem:[%s4182_s8 + $0x28] sm:$0xff]  }
 0xc6d   : > { %2212 = vst.msk [vmem:[#allocation2] sm:$0xff] %vm2211_vm11, %v2203_v25  ;;  %v3785_v25 = vld [vmem:[%s4172_s2 + $0xa8] ss:$16 sps:$4 sm:$0xff]  }
 0xc6e   : > { %v2205_v26 = vpop.permute.xlu1 %2204 }
 0xc6f   : > { %2213 = vst.msk [vmem:[#allocation2 + $0x8] sm:$0xff] %vm2211_vm11, %v2205_v26  ;;  %v3788_v26 = vld [vmem:[%s4172_s2 + $0xc0] ss:$16 sps:$4 sm:$0xff]  }
 0xc70   : > { %v2207_v48 = vpop.permute.xlu0 %2206 }
 0xc71   : > { %2215 = vst.msk [vmem:[#allocation2 + $0x10] sm:$0x1] %vm2214_vm12, %v2207_v48  ;;  %v3790_v48 = vld [vmem:[%s4172_s2 + $0xc4] ss:$16 sps:$4 sm:$0xff]  }
 0xc72   : > { %2574 = vmatprep.subr.bf16.mxu1 %v3790_v48  ;;  %v3825_v48 = vld [vmem:[%s4182_s8 + $0xf0] sm:$0xff]  }
 0xc73   : > { %2575 = vmatpush1.bf16.msra.mxu1 %v3788_v26  ;;  %v3824_v26 = vld [vmem:[%s4182_s8 + $0x70] sm:$0xff]  }
 0xc74   : > { %v2216_v27 = vld [vmem:[#allocation2] sm:$0xff] }
 0xc76   : > { %v2217_v34 = vld [vmem:[#allocation2 + $0x8] sm:$0xff] }
 0xc77   : > { %v2219_v51 = vpack.c.bf16 %v2217_v34, %v2216_v27  ;;  %v3791_v27 = vld [vmem:[%s4172_s2 + $0xc8] ss:$16 sps:$4 sm:$0xff]   ;;  %v3793_v34 = vld [vmem:[%s4172_s2 + $0xcc] ss:$16 sps:$4 sm:$0xff]  }
 0xc78   : > { %v2218_v28 = vld [vmem:[#allocation2 + $0x10] sm:$0x1] }
 0xc79   : > { %3634 = vmatprep.mubr.bf16.mxu0 %v2219_v51  ;;  %v2220_v29 = vpack.c.bf16 %v2218_v28, %v2218_v28  ;;  %v3796_v51 = vld [vmem:[%s4172_s2 + $0xe4] ss:$16 sps:$4 sm:$0xff]   ;;  %v3799_v28 = vld [vmem:[%s4172_s2 + $0xec] ss:$16 sps:$4 sm:$0xff]  }
 0xc7a   : > { %2576 = vmatprep.subr.bf16.mxu1 %v3796_v51  ;;  %v3828_v51 = vld [vmem:[%s4182_s8 + $0x78] sm:$0xff]  }
 0xc7b   : > { %3635 = vmatmul.mubr.bf16.vlgmr.msra.gmra.mrb[20].mxu0 %v2220_v29  ;;  %v3794_v29 = vld [vmem:[%s4172_s2 + $0xe0] ss:$16 sps:$4 sm:$0xff]  }
 0xc7c   : > { %2645 = vmatprep.mubr.bf16.mxu0 %v3984_v45  ;;  %2614 = vmatpush1.bf16.msra.mxu0 %v3755_v39 }
 0xc7d   : > { %2615 = vmatprep.subr.bf16.mxu0 %v3763_v59  ;;  %2577 = vmatpush1.bf16.msra.mxu1 %v3794_v29  ;;  %v3830_v29 = vld [vmem:[%s4182_s8 + $0x38] sm:$0xff]  }
 0xc80   : > { %2616 = vmatpush1.bf16.msra.mxu0 %v3761_v61 }
 0xc81   : > { %2617 = vmatprep.subr.bf16.mxu0 %v3769_v11  ;;  %v3809_v11 = vld [vmem:[%s4182_s8 + $0xd0] sm:$0xff]  }
 0xc84   : > { %2618 = vmatpush1.bf16.msra.mxu0 %v3767_v17  ;;  %v3811_v17 = vld [vmem:[%s4182_s8 + $0x90] sm:$0xff]  }
 0xc85   : > { %2619 = vmatprep.subr.bf16.mxu0 %v3775_v19  ;;  %v3813_v19 = vld [vmem:[%s4182_s8 + $0xd8] sm:$0xff]  }
 0xc88   : > { %2620 = vmatpush1.bf16.msra.mxu0 %v3773_v21  ;;  %v3815_v21 = vld [vmem:[%s4182_s8 + $0x98] sm:$0xff]  }
 0xc89   : > { %2621 = vmatprep.subr.bf16.mxu0 %v3781_v53  ;;  %v3817_v53 = vld [vmem:[%s4182_s8 + $0xe0] sm:$0xff]  }
 0xc8c   : > { %2622 = vmatpush1.bf16.msra.mxu0 %v3779_v57  ;;  %v3819_v57 = vld [vmem:[%s4182_s8 + $0xa0] sm:$0xff]  }
 0xc8d   : > { %2623 = vmatprep.subr.bf16.mxu0 %v3787_v37  ;;  %v3821_v37 = vld [vmem:[%s4182_s8 + $0xe8] sm:$0xff]  }
 0xc90   : > { %2624 = vmatpush1.bf16.msra.mxu0 %v3785_v25  ;;  %v3823_v25 = vld [vmem:[%s4182_s8 + $0xa8] sm:$0xff]  }
 0xc91   : > { %2625 = vmatprep.subr.bf16.mxu0 %v3793_v34  ;;  %v3827_v34 = vld [vmem:[%s4182_s8 + $0xb0] sm:$0xff]  }
 0xc94   : > { %2626 = vmatpush1.bf16.msra.mxu0 %v3791_v27  ;;  %v3826_v27 = vld [vmem:[%s4182_s8 + $0x30] sm:$0xff]  }
 0xc95   : > { %2627 = vmatprep.subr.bf16.mxu0 %v3799_v28  ;;  %v3829_v28 = vld [vmem:[%s4182_s8 + $0xf8] sm:$0xff]  }
 0xd4e   : > { %v3636_v31 = vpop.f32.mrb[20].mxu0 }
 0xd4f   : > { %v2309_v32 = vpop.f32.mrb[21].mxu0  ;;  %v2318_v40 = vadd.f32 %v3636_v31, %v3332_v30 }
 0xd50   : > { %v2310_v35 = vadd.f32 %v3332_v30, %v2309_v32  ;;  %v3637_v36 = vpop.f32.mrb[22].mxu0 }
 0xd51   : > { %v2312_v41 = vpop.f32.mrb[23].mxu0  ;;  %v4489_v50 = vadd.f32 %v3942_v49, %v2318_v40 }
 0xd52   : > { %v4482_v43 = vadd.f32 %v3940_v42, %v2310_v35  ;;  %v2313_v44 = vadd.f32 %v3332_v30, %v2312_v41  ;;  %v3797_v30 = vld [vmem:[%s4172_s2 + $0xe8] ss:$16 sps:$4 sm:$0xff]  }
 0xd53   : > { %v2330_v54 = vsel %vm1189_vm2, %v4489_v50, 0.0  ;;  %2628 = vmatpush1.bf16.msra.mxu0 %v3797_v30  ;;  %v3831_v30 = vld [vmem:[%s4182_s8 + $0xb8] sm:$0xff]  }
 0xd54   : > { %v4485_v47 = vadd.f32 %v3941_v46, %v2313_v44  ;;  %2326 = vadd.xlane.f32.xlu1 %v4482_v43 }
 0xd56   : > { %2328 = vadd.xlane.f32.xlu0 %v4485_v47 }
 0xd5a   : > { %2331 = vadd.xlane.f32.xlu0 %v2330_v54  ;;  %v3341_v54 = vld [vmem:[%s4733_s9] ss:$0 sm:$0xff] }
 0xde1   : > { %v2327_v62 = vpop.xlane.xlu1 %2326 }
 0xde2   : > { %v2333_v63 = vmul.f32 0.0078125, %v2327_v62 }
 0xde3   : > { %v2329_v0 = vpop.xlane.xlu0 %2328 }
 0xde4   : > { %v4503_v1 = vsub.f32 %v4482_v43, %v2333_v63  ;;  %v2334_v2 = vmul.f32 0.0078125, %v2329_v0 }
 0xde6   : > { %v4506_v3 = vsub.f32 %v4485_v47, %v2334_v2  ;;  %v2339_v4 = vmul.f32 %v4503_v1, %v4503_v1 }
 0xde7   : > { %v2332_v5 = vpop.xlane.xlu0 %2331 }
 0xde8   : > { %v2335_v38 = vmul.f32 0.0078125, %v2332_v5  ;;  %2342 = vadd.xlane.f32.xlu0 %v2339_v4  ;;  %v2340_v6 = vmul.f32 %v4506_v3, %v4506_v3  ;;  %v3800_v4 = vld [vmem:[%s4182_s8 + $0x40] sm:$0xff]  }
 0xde9   : > { %v3801_v5 = vld [vmem:[%s4182_s8 + $0xc0] sm:$0xff]   ;;  %3478 = vmatprep.subr.bf16.mxu1 %v3800_v4 }
 0xdea   : > { %v4513_v7 = vsub.f32 %v4489_v50, %v2335_v38  ;;  %2344 = vadd.xlane.f32.xlu1 %v2340_v6  ;;  %v3802_v38 = vld [vmem:[%s4182_s8] sm:$0xff]   ;;  %3506 = vmatprep.subr.bf16.mxu0 %v3801_v5 }
 0xdeb   : > { %v3803_v6 = vld [vmem:[%s4182_s8 + $0x80] sm:$0xff]  }
 0xdec   : > { %v2341_v8 = vmul.f32 %v4513_v7, %v4513_v7 }
 0xdee   : > { %v2346_v9 = vsel %vm1189_vm2, %v2341_v8, 0.0  ;;  %v3806_v8 = vld [vmem:[%s4182_s8 + $0x8] sm:$0xff]  }
 0xdef   : > { %2347 = vadd.xlane.f32.xlu0 %v2346_v9  ;;  %v3807_v9 = vld [vmem:[%s4182_s8 + $0x88] sm:$0xff]  }
 0xe75   : > { %v2343_v31 = vpop.xlane.xlu0 %2342 }
 0xe76   : > { %v2349_v32 = vmul.f32 0.0078125, %v2343_v31  ;;  %v1119_v31 = vld [vmem:[%s4177_s20] sm:$0xf] }
 0xe77   : > { %v2345_v35 = vpop.xlane.xlu1 %2344 }
 0xe78   : > { %v2352_v36 = vadd.f32 1e-05, %v2349_v32  ;;  %v2350_v40 = vmul.f32 0.0078125, %v2345_v35  ;;  %v2396_v32 = vsub.s32 3, %v4313_v12  ;;  %v2385_v35 = vrot.slane %v1119_v31, %v1245_v15 }
 0xe7a   : > { %3886 = vrsqrt.f32 %v2352_v36  ;;  %v2353_v41 = vadd.f32 1e-05, %v2350_v40  ;;  %v2393_v36 = vrot.slane %v1119_v31, %v1253_v13  ;;  %v2389_v40 = vrot.slane %v1119_v31, %v1249_v16 }
 0xe7c   : > { %3888 = vrsqrt.f32 %v2353_v41  ;;  %v2348_v42 = vpop.xlane.xlu0 %2347  ;;  %v2397_v41 = vrot.slane %v1119_v31, %v2396_v32 }
 0xe7d   : > { %v2351_v44 = vmul.f32 0.0078125, %v2348_v42 }
 0xe7f   : > { %v2354_v46 = vadd.f32 1e-05, %v2351_v44 }
 0xe81   : > { %3890 = vrsqrt.f32 %v2354_v46 }
 0xe84   : > { %v3887_v49 = vpop.eup %3886 }
 0xe85   : > { %v2358_v55 = vmul.f32 %v3887_v49, %v4503_v1 }
 0xe86   : > { %v3889_v56 = vpop.eup %3888 }
 0xe87   : > { %v2359_v39 = vmul.f32 %v3889_v56, %v4506_v3  ;;  %v2367_v58 = vmul.f32 %v3341_v54, %v2358_v55 }
 0xe89   : > { %v2368_v59 = vmul.f32 %v3341_v54, %v2359_v39  ;;  %v2376_v61 = vadd.f32 %v3342_v33, %v2367_v58 }
 0xe8b   : > { %v3891_v60 = vpop.eup %3890  ;;  %v2377_v62 = vadd.f32 %v3342_v33, %v2368_v59 }
 0xe8c   : > { %v2360_v63 = vmul.f32 %v3891_v60, %v4513_v7  ;;  %v3804_v7 = vld [vmem:[%s4182_s8 + $0x48] sm:$0xff]  }
 0xe8d   : > { %v2379_v0 = vpack.c.bf16 %v2377_v62, %v2376_v61 }
 0xe8e   : > { %v2369_v1 = vmul.f32 %v3341_v54, %v2360_v63 }
 0xe8f   : > { %2595 = vmatmul.mubr.bf16.vlgmr.msra.gmra.mrb[24].mxu1 %v2379_v0  ;;  %2646 = vmatmul.mubr.bf16.vlgmr.msra.gmra.mrb[24].mxu0 %v2379_v0 }
 0xe90   : > { %2604 = vmatprep.mubr.bf16.mxu1 %v3984_v45  ;;  %2655 = vmatprep.mubr.bf16.mxu0 %v3984_v45  ;;  %v2378_v2 = vadd.f32 %v3342_v33, %v2369_v1  ;;  %v3805_v45 = vld [vmem:[%s4182_s8 + $0xc8] sm:$0xff]  }
 0xe91   : > { %3479 = vmatpush3.bf16.msra.mxu1 %v3802_v38  ;;  %3507 = vmatpush3.bf16.msra.mxu0 %v3803_v6 }
 0xe92   : > { %v2380_v3 = vpack.c.bf16 %v2378_v2, %v2378_v2  ;;  %3480 = vmatprep.subr.bf16.mxu1 %v3804_v7  ;;  %3508 = vmatprep.subr.bf16.mxu0 %v3805_v45 }
 0xe95   : > { %3481 = vmatpush3.bf16.msra.mxu1 %v3806_v8  ;;  %3509 = vmatpush3.bf16.msra.mxu0 %v3807_v9 }
 0xe96   : > { %3482 = vmatprep.subr.bf16.mxu1 %v3808_v10  ;;  %3510 = vmatprep.subr.bf16.mxu0 %v3809_v11 }
 0xe97   : > { %2605 = vmatmul.mubr.bf16.gmra.mrb[28].mxu1 %v2380_v3  ;;  %2656 = vmatmul.mubr.bf16.gmra.mrb[28].mxu0 %v2380_v3 }
 0xe99   : > { %3483 = vmatpush3.bf16.msra.mxu1 %v3810_v14  ;;  %3511 = vmatpush3.bf16.msra.mxu0 %v3811_v17 }
 0xe9a   : > { %3484 = vmatprep.subr.bf16.mxu1 %v3812_v18  ;;  %3512 = vmatprep.subr.bf16.mxu0 %v3813_v19 }
 0xe9d   : > { %3485 = vmatpush3.bf16.msra.mxu1 %v3814_v20  ;;  %3513 = vmatpush3.bf16.msra.mxu0 %v3815_v21 }
 0xe9e   : > { %3486 = vmatprep.subr.bf16.mxu1 %v3816_v22  ;;  %3514 = vmatprep.subr.bf16.mxu0 %v3817_v53 }
 0xea1   : > { %3487 = vmatpush3.bf16.msra.mxu1 %v3818_v23  ;;  %3515 = vmatpush3.bf16.msra.mxu0 %v3819_v57 }
 0xea2   : > { %3488 = vmatprep.subr.bf16.mxu1 %v3820_v24  ;;  %3516 = vmatprep.subr.bf16.mxu0 %v3821_v37 }
 0xea5   : > { %3489 = vmatpush3.bf16.msra.mxu1 %v3822_v52  ;;  %3517 = vmatpush3.bf16.msra.mxu0 %v3823_v25 }
 0xea6   : > { %3490 = vmatprep.subr.bf16.mxu1 %v3824_v26  ;;  %3518 = vmatprep.subr.bf16.mxu0 %v3825_v48 }
 0xea9   : > { %3491 = vmatpush3.bf16.msra.mxu1 %v3826_v27  ;;  %3519 = vmatpush3.bf16.msra.mxu0 %v3827_v34 }
 0xeaa   : > { %3492 = vmatprep.subr.bf16.mxu1 %v3828_v51  ;;  %3520 = vmatprep.subr.bf16.mxu0 %v3829_v28 }
 0xead   : > { %3493 = vmatpush3.bf16.msra.mxu1 %v3830_v29  ;;  %3521 = vmatpush3.bf16.msra.mxu0 %v3831_v30 }
 0xf62   : > { %v2596_v42 = vpop.f32.mrb[24].mxu1  ;;  %v2647_v44 = vpop.f32.mrb[24].mxu0 }
 0xf63   : > { %v4597_v46 = vadd.f32 %v2596_v42, %v2385_v35  ;;  %v4599_v49 = vadd.f32 %v2647_v44, %v2393_v36  ;;  %v2598_v54 = vpop.f32.mrb[25].mxu1  ;;  %v2649_v55 = vpop.f32.mrb[25].mxu0 }
 0xf64   : > { %v4601_v56 = vadd.f32 %v2598_v54, %v2389_v40  ;;  %v4603_v39 = vadd.f32 %v2649_v55, %v2397_v41  ;;  %v2600_v15 = vpop.f32.mrb[26].mxu1  ;;  %v2651_v58 = vpop.f32.mrb[26].mxu0 }
 0xf65   : > { %v3375_v13 = vmul.f32 -1.702, %v4597_v46  ;;  %v3377_v12 = vmul.f32 -1.702, %v4599_v49  ;;  %v4607_v16 = vadd.f32 %v2600_v15, %v2385_v35  ;;  %v4609_v33 = vadd.f32 %v2651_v58, %v2393_v36  ;;  %v2602_v59 = vpop.f32.mrb[27].mxu1  ;;  %v2653_v60 = vpop.f32.mrb[27].mxu0 }
 0xf66   : > { %v3376_v61 = vmul.f32 -1.702, %v4601_v56  ;;  %v3378_v62 = vmul.f32 -1.702, %v4603_v39  ;;  %v4613_v63 = vadd.f32 %v2602_v59, %v2389_v40  ;;  %v4615_v0 = vadd.f32 %v2653_v60, %v2397_v41 }
 0xf67   : > { %v2688_v1 = vmul.f32 1.442695, %v3375_v13  ;;  %v2692_v2 = vmul.f32 1.442695, %v3377_v12  ;;  %v3379_v3 = vmul.f32 -1.702, %v4607_v16 }
 0xf68   : > { %v2690_v4 = vmul.f32 1.442695, %v3376_v61  ;;  %v2694_v5 = vmul.f32 1.442695, %v3378_v62  ;;  %v3381_v38 = vmul.f32 -1.702, %v4609_v33 }
 0xf69   : > { %3892 = vpow2.f32 %v2688_v1  ;;  %v2696_v6 = vmul.f32 1.442695, %v3379_v3  ;;  %v3380_v7 = vmul.f32 -1.702, %v4613_v63  ;;  %v3382_v45 = vmul.f32 -1.702, %v4615_v0 }
 0xf6a   : > { %3894 = vpow2.f32 %v2692_v2  ;;  %v2700_v8 = vmul.f32 1.442695, %v3381_v38  ;;  %v2606_v9 = vpop.f32.mrb[28].mxu1  ;;  %v2657_v10 = vpop.f32.mrb[28].mxu0 }
 0xf6b   : > { %3896 = vpow2.f32 %v2690_v4  ;;  %v2698_v11 = vmul.f32 1.442695, %v3380_v7  ;;  %v2702_v14 = vmul.f32 1.442695, %v3382_v45  ;;  %v4621_v17 = vadd.f32 %v2606_v9, %v2385_v35  ;;  %v2608_v18 = vpop.f32.mrb[29].mxu1  ;;  %v2659_v19 = vpop.f32.mrb[29].mxu0 }
 0xf6c   : > { %3898 = vpow2.f32 %v2694_v5  ;;  %v4623_v20 = vadd.f32 %v2657_v10, %v2393_v36  ;;  %v4625_v21 = vadd.f32 %v2608_v18, %v2389_v40  ;;  %v4627_v22 = vadd.f32 %v2659_v19, %v2397_v41  ;;  %v2610_v53 = vpop.f32.mrb[30].mxu1  ;;  %v2661_v23 = vpop.f32.mrb[30].mxu0 }
 0xf6d   : > { %3900 = vpow2.f32 %v2696_v6  ;;  %v3383_v57 = vmul.f32 -1.702, %v4621_v17  ;;  %v2611_v24 = vpop.f32.mrb[31].mxu1  ;;  %v2662_v37 = vpop.f32.mrb[31].mxu0 }
 0xf6e   : > { %3902 = vpow2.f32 %v2700_v8  ;;  %v3385_v52 = vmul.f32 -1.702, %v4623_v20  ;;  %v3384_v25 = vmul.f32 -1.702, %v4625_v21  ;;  %v3386_v26 = vmul.f32 -1.702, %v4627_v22 }
 0xf6f   : > { %3904 = vpow2.f32 %v2698_v11  ;;  %v2704_v48 = vmul.f32 1.442695, %v3383_v57 }
 0xf70   : > { %3906 = vpow2.f32 %v2702_v14  ;;  %v2708_v27 = vmul.f32 1.442695, %v3385_v52  ;;  %v2706_v34 = vmul.f32 1.442695, %v3384_v25  ;;  %v2710_v51 = vmul.f32 1.442695, %v3386_v26 }
 0xf71   : > { %3908 = vpow2.f32 %v2704_v48 }
 0xf72   : > { %3910 = vpow2.f32 %v2708_v27 }
 0xf73   : > { %v3893_v28 = vpop.eup %3892  ;;  %3912 = vpow2.f32 %v2706_v34 }
 0xf74   : > { %v3895_v29 = vpop.eup %3894  ;;  %v2712_v30 = vadd.f32 1.0, %v3893_v28  ;;  %3914 = vpow2.f32 %v2710_v51 }
 0xf75   : > { %v3897_v31 = vpop.eup %3896  ;;  %v2714_v32 = vadd.f32 1.0, %v3895_v29 }
 0xf76   : > { %v3899_v35 = vpop.eup %3898  ;;  %3916 = vrcp.f32 %v2712_v30  ;;  %v2713_v36 = vadd.f32 1.0, %v3897_v31 }
 0xf77   : > { %v3901_v40 = vpop.eup %3900  ;;  %3918 = vrcp.f32 %v2714_v32  ;;  %v2715_v41 = vadd.f32 1.0, %v3899_v35 }
 0xf78   : > { %v3903_v42 = vpop.eup %3902  ;;  %3920 = vrcp.f32 %v2713_v36  ;;  %v2716_v44 = vadd.f32 1.0, %v3901_v40 }
 0xf79   : > { %v3905_v54 = vpop.eup %3904  ;;  %3922 = vrcp.f32 %v2715_v41  ;;  %v2718_v55 = vadd.f32 1.0, %v3903_v42 }
 0xf7a   : > { %v3907_v15 = vpop.eup %3906  ;;  %3924 = vrcp.f32 %v2716_v44  ;;  %v2717_v58 = vadd.f32 1.0, %v3905_v54 }
 0xf7b   : > { %v3909_v13 = vpop.eup %3908  ;;  %3926 = vrcp.f32 %v2718_v55  ;;  %v2719_v12 = vadd.f32 1.0, %v3907_v15 }
 0xf7c   : > { %v3911_v59 = vpop.eup %3910  ;;  %3928 = vrcp.f32 %v2717_v58  ;;  %v2720_v60 = vadd.f32 1.0, %v3909_v13 }
 0xf7d   : > { %v3913_v61 = vpop.eup %3912  ;;  %3930 = vrcp.f32 %v2719_v12  ;;  %v2722_v1 = vadd.f32 1.0, %v3911_v59 }
 0xf7e   : > { %v3915_v62 = vpop.eup %3914  ;;  %v2721_v2 = vadd.f32 1.0, %v3913_v61  ;;  %3932 = vrcp.f32 %v2720_v60 }
 0xf7f   : > { %v2723_v3 = vadd.f32 1.0, %v3915_v62 }
 0xf80   : > { %v3917_v4 = vpop.eup %3916  ;;  %3934 = vrcp.f32 %v2721_v2 }
 0xf81   : > { %v3919_v5 = vpop.eup %3918  ;;  %3936 = vrcp.f32 %v2723_v3  ;;  %v2748_v8 = vmul.f32 %v3917_v4, %v4597_v46 }
 0xf82   : > { %v3921_v38 = vpop.eup %3920  ;;  %3938 = vrcp.f32 %v2722_v1  ;;  %v2750_v11 = vmul.f32 %v3919_v5, %v4599_v49 }
 0xf83   : > { %v3923_v6 = vpop.eup %3922  ;;  %v2749_v19 = vmul.f32 %v3921_v38, %v4601_v56 }
 0xf84   : > { %v3925_v7 = vpop.eup %3924  ;;  %v2751_v57 = vmul.f32 %v3923_v6, %v4603_v39 }
 0xf85   : > { %v3927_v45 = vpop.eup %3926  ;;  %v2752_v9 = vmul.f32 %v3925_v7, %v4607_v16 }
 0xf86   : > { %v3929_v10 = vpop.eup %3928  ;;  %v2754_v14 = vmul.f32 %v3927_v45, %v4609_v33 }
 0xf87   : > { %v3931_v18 = vpop.eup %3930  ;;  %v2760_v53 = vpack.c.bf16 %v2752_v9, %v2748_v8  ;;  %v2753_v23 = vmul.f32 %v3929_v10, %v4613_v63 }
 0xf88   : > { %v2762_v24 = vpack.c.bf16 %v2754_v14, %v2750_v11  ;;  %v2755_v37 = vmul.f32 %v3931_v18, %v4615_v0  ;;  %v3933_v52 = vpop.eup %3932 }
 0xf89   : > { %v2761_v46 = vpack.c.bf16 %v2753_v23, %v2749_v19  ;;  %v2756_v39 = vmul.f32 %v3933_v52, %v4621_v17 }
 0xf8a   : > { %v3935_v25 = vpop.eup %3934  ;;  %v2763_v16 = vpack.c.bf16 %v2755_v37, %v2751_v57 }
 0xf8b   : > { %v3937_v26 = vpop.eup %3936  ;;  %v2757_v49 = vmul.f32 %v3935_v25, %v4625_v21  ;;  %2998 = vmatprep.mubr.bf16.mxu1 %v2761_v46  ;;  %v2764_v27 = vpack.c.bf16 %v2756_v39, %v2756_v39 }
 0xf8c   : > { %v3939_v33 = vpop.eup %3938  ;;  %v2759_v48 = vmul.f32 %v3937_v26, %v4627_v22  ;;  %3046 = vmatprep.mubr.bf16.mxu0 %v2763_v16  ;;  %2999 = vmatmul.mubr.bf16.vlgmr.msra.gmra.mrb[32].mxu1 %v2760_v53  ;;  %v3387_v22 = vld [vmem:[%s807_s0] ss:$0 sm:$0xff] }
 0xf8d   : > { %v2765_v56 = vpack.c.bf16 %v2757_v49, %v2757_v49  ;;  %3047 = vmatmul.mubr.bf16.vlgmr.msra.gmra.mrb[32].mxu0 %v2762_v24  ;;  %v2758_v0 = vmul.f32 %v3939_v33, %v4623_v20 }
 0xf8e   : > { %v2767_v63 = vpack.c.bf16 %v2759_v48, %v2759_v48 }
 0xf8f   : > { %3006 = vmatprep.mubr.bf16.mxu1 %v2765_v56  ;;  %v2766_v34 = vpack.c.bf16 %v2758_v0, %v2758_v0 }
 0xf90   : > { %3054 = vmatprep.mubr.bf16.mxu0 %v2767_v63 }
 0xf94   : > { %3007 = vmatmul.mubr.bf16.gmra.mrb[36].mxu1 %v2764_v27 }
 0xf95   : > { %3055 = vmatmul.mubr.bf16.gmra.mrb[36].mxu0 %v2766_v34 }
0x105f   : > { %v3494_v21 = vpop.f32.mrb[32].mxu1 }
0x1060   : > { %v3522_v51 = vpop.f32.mrb[32].mxu0  ;;  %v3495_v28 = vpop.f32.mrb[33].mxu1 }
0x1061   : > { %v3496_v29 = vadd.f32 %v3495_v28, %v3494_v21  ;;  %v3523_v30 = vpop.f32.mrb[33].mxu0  ;;  %v3497_v17 = vpop.f32.mrb[34].mxu1 }
0x1062   : > { %v3524_v31 = vadd.f32 %v3523_v30, %v3522_v51  ;;  %v3525_v20 = vpop.f32.mrb[34].mxu0  ;;  %v3498_v32 = vpop.f32.mrb[35].mxu1 }
0x1063   : > { %v3001_v35 = vadd.f32 %v3496_v29, %v3387_v22  ;;  %v3499_v36 = vadd.f32 %v3498_v32, %v3497_v17  ;;  %v3526_v40 = vpop.f32.mrb[35].mxu0 }
0x1064   : > { %v3527_v41 = vadd.f32 %v3526_v40, %v3525_v20 }
0x1065   : > { %v3049_v42 = vadd.f32 %v3524_v31, %v3001_v35  ;;  %v3004_v44 = vadd.f32 %v3499_v36, %v3387_v22 }
0x1067   : > { %v3062_v54 = vadd.f32 %v3049_v42, %v4482_v43  ;;  %v3052_v55 = vadd.f32 %v3527_v41, %v3004_v44  ;;  %v3500_v15 = vpop.f32.mrb[36].mxu1 }
0x1068   : > { %v3528_v58 = vpop.f32.mrb[36].mxu0  ;;  %v3501_v13 = vpop.f32.mrb[37].mxu1 }
0x1069   : > { %3065 = vst [vmem:[%s4191_s11] sm:$0xff] %v3062_v54  ;;  %v3063_v12 = vadd.f32 %v3052_v55, %v4485_v47  ;;  %v3502_v59 = vadd.f32 %v3501_v13, %v3500_v15  ;;  %v3529_v60 = vpop.f32.mrb[37].mxu0  ;;  %v3503_v61 = vpop.f32.mrb[38].mxu1 }
0x106a   : > { %v3530_v62 = vadd.f32 %v3529_v60, %v3528_v58  ;;  %v3531_v1 = vpop.f32.mrb[38].mxu0  ;;  %v3504_v2 = vpop.f32.mrb[39].mxu1 }
0x106b   : > { %3066 = vst [vmem:[%s4191_s11 + $0x8] sm:$0xff] %v3063_v12  ;;  %v3009_v3 = vadd.f32 %v3502_v59, %v3387_v22  ;;  %v3532_v4 = vpop.f32.mrb[39].mxu0 }
0x106d   : > { %v3057_v5 = vadd.f32 %v3530_v62, %v3009_v3 }
0x106f   : > { %v3064_v43 = vadd.f32 %v3057_v5, %v4489_v50 }
0x1071   : > { %3067 = vst [vmem:[%s4191_s11 + $0x10] sm:$0x1] %v3064_v43 }
0x1072 PF: > { %s4735_s23 = sld [smem:[#allocation6_spill]]  ;;  %s4736_s0 = sld [smem:[#allocation4_spill]] }
0x1073   : > { %s4737_s30 = sld [smem:[#allocation5_spill]]  ;;  %s4738_s20 = sld [smem:[#allocation7_spill]] }
0x1074   : > { %s4739_s21 = sld [smem:[#allocation8_spill]] }
0x1078   : > { %s29_s1 = sadd.s32 1, %s4735_s23  }
0x1079   : > { %p26_p8 = scmp.ge.s32.totalorder %s29_s1, 6  }
0x107b   :  { %28 = sbr.rel (!%p26_p8) target bundleno = 13 (0xd), region = 166 }

// kernel: clip_encoder_forward.3
= control target key start
LH: loop header
LB: loop body
LE: loop exit
PB: predicated region body
PF: predicated region fallthrough
CT: control target
= control target key end

     0   :  { %s3638_s0 = inlined_call_operand.vmem [shape: f32[1,3], index: 0, kind: input, shape index: {}]   ;;  %s3639_s1 = inlined_call_operand.vmem [shape: f32[3,128], index: 1, kind: input, shape index: {}]   ;;  %s3640_s2 = inlined_call_operand.vmem [shape: f32[1,128], index: 2, kind: input, shape index: {}]   ;;  %s3641_s3 = inlined_call_operand.vmem [shape: f32[4,2], index: 3, kind: input, shape index: {}]   ;;  %s3642_s4 = inlined_call_operand.vmem [shape: f32[2,128], index: 4, kind: input, shape index: {}]   ;;  %s3643_s5 = inlined_call_operand.vmem [shape: f32[1,128], index: 5, kind: input, shape index: {}]   ;;  %s3644_s6 = inlined_call_operand.vmem [shape: f32[1,128], index: 6, kind: input, shape index: {}]   ;;  %s3645_s7 = inlined_call_operand.vmem [shape: f32[1,128], index: 7, kind: input, shape index: {}]   ;;  %s3646_s8 = inlined_call_operand.vmem [shape: f32[1,128], index: 8, kind: input, shape index: {}]   ;;  %s3647_s9 = inlined_call_operand.vmem [shape: f32[2,128], index: 9, kind: input, shape index: {}]   ;;  %s3648_s10 = inlined_call_operand.vmem [shape: f32[2,1,128], index: 10, kind: input, shape index: {}]   ;;  %s3649_s11 = inlined_call_operand.vmem [shape: f32[2,1,128], index: 11, kind: input, shape index: {}]   ;;  %s3650_s12 = inlined_call_operand.vmem [shape: bf16[2,128,384], index: 12, kind: input, shape index: {}]   ;;  %s3651_s13 = inlined_call_operand.vmem [shape: f32[2,1,384], index: 13, kind: input, shape index: {}]   ;;  %s3652_s14 = inlined_call_operand.vmem [shape: bf16[2,128,128], index: 14, kind: input, shape index: {}]   ;;  %s3653_s15 = inlined_call_operand.vmem [shape: f32[2,1,128], index: 15, kind: input, shape index: {}]   ;;  %s3654_s16 = inlined_call_operand.vmem [shape: f32[2,1,128], index: 16, kind: input, shape index: {}]   ;;  %s3655_s17 = inlined_call_operand.vmem [shape: f32[2,1,128], index: 17, kind: input, shape index: {}]   ;;  %s3656_s18 = inlined_call_operand.vmem [shape: bf16[2,128,256], index: 18, kind: input, shape index: {}]   ;;  %s3657_s19 = inlined_call_operand.vmem [shape: f32[2,1,256], index: 19, kind: input, shape index: {}]   ;;  %s3658_s20 = inlined_call_operand.vmem [shape: bf16[2,256,128], index: 20, kind: input, shape index: {}]   ;;  %s3659_s21 = inlined_call_operand.vmem [shape: f32[2,1,128], index: 21, kind: input, shape index: {}]   ;;  %s3660_s22 = inlined_call_operand.vmem [shape: f32[1,10,128], index: 22, kind: output, shape index: {}]  }
   0x1   :  { %3666 = sst [smem:[#allocation12_spill]] %s3638_s0 }
   0x2   :  { %3667 = sst [smem:[#allocation13_spill]] %s3639_s1 }
   0x3   :  { %3668 = sst [smem:[#allocation14_spill]] %s3640_s2 }
   0x4   :  { %3669 = sst [smem:[#allocation15_spill]] %s3641_s3 }
   0x5   :  { %3670 = sst [smem:[#allocation16_spill]] %s3642_s4 }
   0x6   :  { %3671 = sst [smem:[#allocation17_spill]] %s3643_s5 }
   0x7   :  { %3672 = sst [smem:[#allocation18_spill]] %s3644_s6 }
   0x8   :  { %3673 = sst [smem:[#allocation19_spill]] %s3645_s7 }
   0x9   :  { %3674 = sst [smem:[#allocation20_spill]] %s3646_s8 }
   0xa   :  { %3675 = sst [smem:[#allocation21_spill]] %s3647_s9 }
   0xb   :  { %3676 = sst [smem:[#allocation22_spill]] %s3648_s10 }
   0xc   :  { %3677 = sst [smem:[#allocation23_spill]] %s3649_s11 }
   0xd   :  { %3678 = sst [smem:[#allocation24_spill]] %s3650_s12 }
   0xe   :  { %3679 = sst [smem:[#allocation25_spill]] %s3651_s13 }
   0xf   :  { %3680 = sst [smem:[#allocation26_spill]] %s3652_s14 }
  0x10   :  { %3681 = sst [smem:[#allocation27_spill]] %s3656_s18 }
  0x11   :  { %3682 = sst [smem:[#allocation28_spill]] %s3657_s19 }
  0x12   :  { %3683 = sst [smem:[#allocation29_spill]] %s3658_s20 }
  0x13   :  { %27 = vsyncpa [#allocation4], 0 }
  0x14   :  { %28 = vsyncpa [#allocation6], 0  ;;  %s3200_s3 = smov 0   ;;  %s3202_s28 = smov 0  }
  0x15   :  { %s3204_s29 = smov 0  }
  0x16 LB: > { %3684 = sst [smem:[#allocation9_spill]] %s3070_s28  ;;  %s2577_s30 = sadd.s32 4294967295, %s3074_s29   ;;  %s3074_s29 = sphi %s3204_s29, %s34_s29   ;;  %s3070_s28 = sphi %s3202_s28, %s3720_s28   ;;  %s3066_s3 = sphi %s3200_s3, %s3719_s3  }
  0x17   : > { %3685 = sst [smem:[#allocation10_spill]] %s3074_s29  ;;  %s43_s4 = sadd.s32 1, %s3070_s28 }
  0x18   : > { %p44_p0 = scmp.ge.s32.totalorder %s43_s4, 2  ;;  %p2578_p1 = scmp.ge.s32.totalorder %s3074_s29, 1 }
  0x19   : > { %p594_p2 = scmp.lt.s32.totalorder %s3074_s29, 3  ;;  %p3225_p4 = scmp.eq.s32.totalorder %s2577_s30, 0 }
  0x1a   : > { %s3722_s4 = smov (%p44_p0, %s43_s4), 0  ;;  %s3689_s24 = sld [smem:[#allocation12_spill]] }
  0x1b   : > { %3686 = sst [smem:[#allocation11_spill]] %s3722_s4  ;;  %p3221_p3 = pnand %p2578_p1, %p594_p2 }
  0x1c   : > { %s3688_s23 = scalar_select %p3225_p4, 1, 0 }
  0x1d   : > { %s3687_s0 = scalar_select %p3221_p3, 1, 0 }
  0x1e   : > { %p2840_p5 = pneg %p3221_p3  ;;  %s3690_s2 = sld [smem:[#allocation15_spill]] }
  0x20   : > { %s607_s6 = sshll.u32 %s3689_s24, 4  ;;  %p3239_p6 = pnand %p3225_p4, %p2840_p5  ;;  %s608_s6 = int_to_ptr.vmem [resolvable:$true] %s607_s6 }
  0x21   : > { %s3014_s30 = scalar_lea.vmem %s608_s6, 16  ;;  %p3022_p11 = scmp.lt.s32.totalorder %s608_s6, %s608_s6 }
  0x22   : > { %p3015_p7 = scmp.ne.s32.totalorder %s608_s6, %s3014_s30  ;;  %p3016_p8 = pneg %p3239_p6 }
  0x23   : > { %p3023_p12 = scmp.lt.s32.totalorder %s3014_s30, %s3014_s30 }
  0x24   : > { %s624_s27 = sshll.u32 %s3690_s2, 4  ;;  %p3017_p9 = pnand %p3016_p8, %p3015_p7  ;;  %s625_s27 = int_to_ptr.vmem [resolvable:$true] %s624_s27 }
  0x25   : > { %p3024_p13 = por %p3023_p12, %p3022_p11 }
  0x26   : > { %p3018_p10 = pneg %p3017_p9 }
  0x28   : > { %p3025_p0 = pnand %p3024_p13, %p3018_p10 }
  0x2a   : > { %3028 = shalt.err (!%p3025_p0)
}
  0x2b   : > { %s3076_s1 = smov [#allocation3]   ;;  %s3029_s5 = scalar_lea.vmem %s625_s27, 64 }
  0x2c   : > { %2843 = dma.vmem_to_smem (!%p3239_p6), %s608_s6, 16, %s3076_s1, [#allocation4]  }
  0x2d   : > { %p3030_p1 = scmp.ne.s32.totalorder %s625_s27, %s3029_s5  ;;  %p3037_p4 = scmp.lt.s32.totalorder %s625_s27, %s625_s27 }
  0x2e   : > { %p3038_p3 = scmp.lt.s32.totalorder %s3029_s5, %s3029_s5 }
  0x2f   : > { %p3032_p2 = pnand %p3030_p1, %p3016_p8 }
  0x30   : > { %p3039_p7 = por %p3038_p3, %p3037_p4 }
  0x31   : > { %p3033_p5 = pneg %p3032_p2 }
  0x33   : > { %p3040_p9 = pnand %p3039_p7, %p3033_p5 }
  0x35   : > { %3043 = shalt.err (!%p3040_p9)
}
  0x36   : > { %s3077_s24 = smov [#allocation5]   ;;  %p3692_p10 = scmp.ne.s32.totalorder %s3687_s0, 0 }
  0x37   : > { %2846 = dma.vmem_to_smem (!%p3239_p6), %s625_s27, 64, %s3077_s24, [#allocation6]  }
  0x38   : > { %737 = sbr.rel (%p3692_p10) target bundleno = 3115 (0xc2b), region = 108  ;;  %p3693_p11 = scmp.ne.s32.totalorder (!%p3692_p10), %s3688_s23, 0 }
  0x3f   : > { %3057 = dma.done.wait (%p3693_p11), [#allocation4], 16  }
  0x40   : > { %3059 = vsyncadd (%p3693_p11), [#allocation4], 4294967280 }
  0x41   : > { %3061 = dma.done.wait (%p3693_p11), [#allocation6], 64  }
  0x42   : > { %3063 = vsyncadd (%p3693_p11), [#allocation6], 4294967232 }
  0x43   : > { %747 = sfence }
  0x44   : > { %p840_p3 = scmp.lt.s32.totalorder %s3066_s3, 1  ;;  %s3696_s14 = sld [smem:[#allocation26_spill]] }
  0x45   : > { %s3697_s12 = sld [smem:[#allocation24_spill]]  ;;  %s3698_s13 = sld [smem:[#allocation25_spill]] }
  0x46   : > { %s3261_s4 = scalar_select %p840_p3, %s3066_s3, 1 }
  0x47   : > { %s3699_s18 = sld [smem:[#allocation27_spill]]  ;;  %s3700_s19 = sld [smem:[#allocation28_spill]] }
  0x48   : > { %s2830_s27 = smul.u32 192, %s3261_s4  ;;  %s2683_s30 = sshll.u32 %s3261_s4, 6 }
  0x49   : > { %s2831_s1 = smul.u32 3, %s3261_s4  ;;  %s2684_s28 = sshll.u32 %s3261_s4, 7 }
  0x4a   : > { %s3277_s0 = scalar_lea.vmem %s3696_s14, %s2683_s30  ;;  %s2590_s9 = sshll.u32 %s3261_s4, 1 }
  0x4b   : > { %s3282_s29 = scalar_lea.vmem %s3697_s12, %s2830_s27  ;;  %s3291_s2 = scalar_lea.vmem %s3698_s13, %s2831_s1 }
  0x4c   : > { %s3701_s20 = sld [smem:[#allocation29_spill]]  ;;  %p2593_p4 = scmp.ne.s32.totalorder %s3066_s3, 0 }
  0x4d   : > { %s3305_s12 = scalar_lea.vmem %s3699_s18, %s2684_s28  ;;  %s3311_s1 = scalar_lea.vmem %s3700_s19, %s2590_s9  ;;  %v904_v1 = vlaneseq (!%p2593_p4)  ;;  %v3078_v2 = vmov (!%p2593_p4), 1966171168  }
  0x4e   : > { %890 = sbr.rel (%p2593_p4) target bundleno = 120 (0x78), region = 120  ;;  %s3702_s14 = sld [smem:[#allocation18_spill]] (!%p2593_p4)  ;;  %v902_v3 = vunpack.c.l.s4 (!%p2593_p4), %v3078_v2 }
  0x4f   : > { %s893_s23 = sld [smem:[#allocation3]] (!%p2593_p4)  ;;  %s2594_s25 = sld [smem:[#allocation3 + $0x1]] (!%p2593_p4)  ;;  %v905_v4 = vshrl.u32 (!%p2593_p4), %v904_v1, 7 }
  0x50   : > { %s3703_s7 = sld [smem:[#allocation19_spill]] (!%p2593_p4)  ;;  %s3704_s5 = sld [smem:[#allocation13_spill]] (!%p2593_p4)  ;;  %v903_v7 = vunpack.c.0.s8 (!%p2593_p4), %v902_v3 }
  0x51   : > { %s942_s6 = sld [smem:[#allocation5]] (!%p2593_p4)  ;;  %s2596_s10 = sld [smem:[#allocation5 + $0x1]] (!%p2593_p4) }
  0x52   : > { %s3316_s8 = scalar_lea.vmem %s3701_s20, %s2684_s28  ;;  %s2595_s28 = sld [smem:[#allocation3 + $0x2]] (!%p2593_p4)  ;;  %v906_v10 = vsub.s32 (!%p2593_p4), %v903_v7, %v905_v4 }
  0x53   : > { %s2597_s9 = sld [smem:[#allocation5 + $0x80]] (!%p2593_p4)  ;;  %s3705_s18 = sld [smem:[#allocation20_spill]] (!%p2593_p4) }
  0x54   : > { %v1046_v0 = vld [vmem:[%s3702_s14] sm:$0x1] (!%p2593_p4)  ;;  %s2598_s19 = sld [smem:[#allocation5 + $0x81]] (!%p2593_p4)  ;;  %s3341_s20 = sld [smem:[#allocation5 + $0x100]] (!%p2593_p4) }
  0x55   : > { %1047 = vst [vmem:[%s3660_s22] sm:$0x1] %v1046_v0  ;;  %s3706_s30 = sld [smem:[#allocation21_spill]]  ;;  %s3349_s14 = sld [smem:[#allocation5 + $0x101]]  ;;  %v894_v11 = vstv %s893_s23  ;;  %v898_v12 = vstv %s2594_s25 }
  0x56   : > { %v1049_v5 = vld [vmem:[%s3703_s7] sm:$0x1]  ;;  %s3354_s13 = sld [smem:[#allocation5 + $0x180]]  ;;  %s3707_s26 = sld [smem:[#allocation16_spill]] }
  0x57   : > { %v891_v6 = vld [vmem:[%s3704_s5] sm:$0x7]  ;;  %1050 = vst [vmem:[%s3660_s22 + $0x2] sm:$0x1] %v1049_v5  ;;  %s3708_s3 = sld [smem:[#allocation14_spill]]  ;;  %v943_v19 = vstv %s942_s6  ;;  %s3362_s7 = sld [smem:[#allocation5 + $0x181]]  ;;  %v947_v22 = vstv %s2596_s10 }
  0x58   : > { %v895_v13 = vmul.f32 %v894_v11, %v891_v6  ;;  %v899_v14 = vmul.f32 %v898_v12, %v891_v6  ;;  %v919_v15 = vstv %s2595_s28  ;;  %s3709_s28 = sld [smem:[#allocation17_spill]] }
  0x59   : > { %v1055_v8 = vld [vmem:[%s3705_s18] sm:$0x1]  ;;  %v920_v18 = vmul.f32 %v919_v15, %v891_v6  ;;  %v969_v26 = vstv %s2597_s9 }
  0x5a   : > { %1056 = vst [vmem:[%s3660_s22 + $0x7] sm:$0x1] %v1055_v8  ;;  %v907_v20 = vrot.slane %v899_v14, %v906_v10  ;;  %v973_v27 = vstv %s2598_s19  ;;  %v995_v34 = vstv %s3341_s20 }
  0x5b   : > { %v1057_v9 = vld [vmem:[%s3706_s30] sm:$0x3]  ;;  %v928_v23 = vrot.slane %v920_v18, %v906_v10  ;;  %v999_v35 = vstv %s3349_s14 }
  0x5c   : > { %1058 = vst [vmem:[%s3660_s22 + $0x8] sm:$0x3] %v1057_v9  ;;  %v940_v16 = vld [vmem:[%s3707_s26] sm:$0x3]  ;;  %v908_v29 = vcombine.high %v907_v20, %v907_v20  ;;  %v1021_v43 = vstv %s3354_s13 }
  0x5d   : > { %v892_v17 = vld [vmem:[%s3708_s3] sm:$0x1]  ;;  %v944_v21 = vmul.f32 %v943_v19, %v940_v16  ;;  %v948_v25 = vmul.f32 %v947_v22, %v940_v16  ;;  %v970_v30 = vmul.f32 %v969_v26, %v940_v16  ;;  %v974_v31 = vmul.f32 %v973_v27, %v940_v16 }
  0x5e   : > { %v941_v24 = vld [vmem:[%s3709_s28] sm:$0x1]  ;;  %v896_v28 = vadd.f32 %v895_v13, %v892_v17  ;;  %v935_v32 = vrot.slane %v928_v23, %v906_v10  ;;  %v915_v36 = vrot.slane %v908_v29, %v906_v10  ;;  %v996_v39 = vmul.f32 %v995_v34, %v940_v16 }
  0x5f   : > { %v956_v33 = vrot.slane %v948_v25, %v906_v10  ;;  %v945_v37 = vadd.f32 %v944_v21, %v941_v24  ;;  %v982_v38 = vrot.slane %v974_v31, %v906_v10  ;;  %v1000_v42 = vmul.f32 %v999_v35, %v940_v16 }
  0x60   : > { %v936_v40 = vcombine.high %v935_v32, %v935_v32  ;;  %v917_v44 = vadd.f32 %v915_v36, %v896_v28  ;;  %v971_v45 = vadd.f32 %v970_v30, %v941_v24  ;;  %v1025_v49 = vstv %s3362_s7 }
  0x61   : > { %v957_v41 = vcombine.high %v956_v33, %v956_v33  ;;  %v983_v46 = vcombine.high %v982_v38, %v982_v38  ;;  %v1008_v48 = vrot.slane %v1000_v42, %v906_v10  ;;  %v1022_v52 = vmul.f32 %v1021_v43, %v940_v16 }
  0x62   : > { %v938_v50 = vadd.f32 %v936_v40, %v917_v44  ;;  %v1026_v53 = vmul.f32 %v1025_v49, %v940_v16  ;;  %v997_v55 = vadd.f32 %v996_v39, %v941_v24 }
  0x63   : > { %v964_v47 = vrot.slane %v957_v41, %v906_v10  ;;  %v990_v51 = vrot.slane %v983_v46, %v906_v10  ;;  %v1009_v56 = vcombine.high %v1008_v48, %v1008_v48  ;;  %v1023_v60 = vadd.f32 %v1022_v52, %v941_v24 }
  0x64   : > { %2884 = vtanh.f32 %v938_v50  ;;  %v1034_v58 = vrot.slane %v1026_v53, %v906_v10 }
  0x65   : > { %v966_v54 = vadd.f32 %v964_v47, %v945_v37  ;;  %v992_v57 = vadd.f32 %v990_v51, %v971_v45  ;;  %v1016_v59 = vrot.slane %v1009_v56, %v906_v10 }
  0x66   : > { %v1035_v61 = vcombine.high %v1034_v58, %v1034_v58 }
  0x67   : > { %2886 = vtanh.f32 %v966_v54  ;;  %v1018_v62 = vadd.f32 %v1016_v59, %v997_v55 }
  0x68   : > { %2888 = vtanh.f32 %v992_v57  ;;  %v1042_v63 = vrot.slane %v1035_v61, %v906_v10 }
  0x69   : > { %2890 = vtanh.f32 %v1018_v62 }
  0x6a   : > { %v1044_v0 = vadd.f32 %v1042_v63, %v1023_v60 }
  0x6c   : > { %2892 = vtanh.f32 %v1044_v0 }
  0x6e   : > { %v2885_v1 = vpop.eup %2884 }
  0x6f   : > { %1048 = vst [vmem:[%s3660_s22 + $0x1] sm:$0x1] %v2885_v1 }
  0x71   : > { %v2887_v2 = vpop.eup %2886 }
  0x72   : > { %v2889_v3 = vpop.eup %2888  ;;  %1051 = vst [vmem:[%s3660_s22 + $0x3] sm:$0x1] %v2887_v2 }
  0x73   : > { %1052 = vst [vmem:[%s3660_s22 + $0x4] sm:$0x1] %v2889_v3  ;;  %v2891_v4 = vpop.eup %2890 }
  0x74   : > { %1053 = vst [vmem:[%s3660_s22 + $0x5] sm:$0x1] %v2891_v4 }
  0x76   : > { %v2893_v5 = vpop.eup %2892 }
  0x77   : > { %1054 = vst [vmem:[%s3660_s22 + $0x6] sm:$0x1] %v2893_v5 }
  0x78 PF: > { %v2894_v6 = vld [vmem:[%s3282_s29 + $0x4] ss:$12 sps:$4 sm:$0xff]   ;;  %v2896_v7 = vld [vmem:[%s3282_s29] ss:$12 sps:$4 sm:$0xff]   ;;  %v3079_v8 = vmov 0   ;;  %v3080_v9 = vmov 0.0   ;;  %v1167_v35 = vlaneseq  ;;  %s3710_s23 = scalar_lea.vmem %s3653_s15, %s3261_s4  ;;  %s3715_s30 = scalar_lea.vmem %s3659_s21, %s3261_s4 }
  0x79   : > { %1342 = vmatprep.mubr.bf16.mxu0 %v3079_v8  ;;  %2742 = vmatprep.subr.bf16.mxu1 %v3080_v9  ;;  %v2897_v10 = vld [vmem:[%s3282_s29 + $0x1c] ss:$12 sps:$4 sm:$0xff]   ;;  %v2899_v11 = vld [vmem:[%s3282_s29 + $0x18] ss:$12 sps:$4 sm:$0xff]   ;;  %v2900_v12 = vld [vmem:[%s3282_s29 + $0x34] ss:$12 sps:$4 sm:$0xff]   ;;  %s3716_s13 = scalar_lea.vmem %s3654_s16, %s3261_s4  ;;  %s3717_s26 = scalar_lea.vmem %s3655_s17, %s3261_s4 }
  0x7a   : > { %1310 = vmatprep.subr.bf16.mxu0 %v2894_v6  ;;  %v2902_v13 = vld [vmem:[%s3282_s29 + $0x30] ss:$12 sps:$4 sm:$0xff]   ;;  %v2903_v14 = vld [vmem:[%s3282_s29 + $0x4c] ss:$12 sps:$4 sm:$0xff]   ;;  %v2905_v15 = vld [vmem:[%s3282_s29 + $0x48] ss:$12 sps:$4 sm:$0xff]  }
  0x7b   : > { %1311 = vmatpush1.bf16.msra.mxu0 %v2896_v7  ;;  %v2906_v16 = vld [vmem:[%s3282_s29 + $0x64] ss:$12 sps:$4 sm:$0xff]   ;;  %v2918_v17 = vld [vmem:[%s3282_s29 + $0x8] ss:$12 sps:$4 sm:$0xff]   ;;  %v2919_v18 = vld [vmem:[%s3282_s29 + $0x20] ss:$12 sps:$4 sm:$0xff]  }
  0x7c   : > { %1312 = vmatprep.subr.bf16.mxu0 %v2897_v10  ;;  %2743 = vmatpush3.bf16.msra.mxu1 %v2918_v17  ;;  %v2908_v19 = vld [vmem:[%s3282_s29 + $0x60] ss:$12 sps:$4 sm:$0xff]   ;;  %v2909_v20 = vld [vmem:[%s3282_s29 + $0x7c] ss:$12 sps:$4 sm:$0xff]   ;;  %v2911_v21 = vld [vmem:[%s3282_s29 + $0x78] ss:$12 sps:$4 sm:$0xff]  }
  0x7d   : > { %2744 = vmatprep.subr.bf16.mxu1 %v3080_v9  ;;  %v2912_v22 = vld [vmem:[%s3282_s29 + $0x94] ss:$12 sps:$4 sm:$0xff]   ;;  %v2920_v23 = vld [vmem:[%s3282_s29 + $0x38] ss:$12 sps:$4 sm:$0xff]   ;;  %v2921_v24 = vld [vmem:[%s3282_s29 + $0x50] ss:$12 sps:$4 sm:$0xff]  }
  0x7e   : > { %v2914_v25 = vld [vmem:[%s3282_s29 + $0x90] ss:$12 sps:$4 sm:$0xff]   ;;  %v2915_v26 = vld [vmem:[%s3282_s29 + $0xac] ss:$12 sps:$4 sm:$0xff]   ;;  %v2922_v27 = vld [vmem:[%s3282_s29 + $0x68] ss:$12 sps:$4 sm:$0xff]  }
  0x7f   : > { %1313 = vmatpush1.bf16.msra.mxu0 %v2899_v11  ;;  %v2917_v28 = vld [vmem:[%s3282_s29 + $0xa8] ss:$12 sps:$4 sm:$0xff]   ;;  %v3415_v29 = vld [vmem:[%s3660_s22] sm:$0xff]  ;;  %v2925_v34 = vld [vmem:[%s3282_s29 + $0xb0] ss:$12 sps:$4 sm:$0xff]   ;;  %vm3081_vm0 = vmmov 0  }
  0x80   : > { %1314 = vmatprep.subr.bf16.mxu0 %v2900_v12  ;;  %2745 = vmatpush3.bf16.msra.mxu1 %v2919_v18  ;;  %v3420_v30 = vld [vmem:[%s3660_s22 + $0x8] sm:$0x3]  ;;  %v2923_v31 = vld [vmem:[%s3282_s29 + $0x80] ss:$12 sps:$4 sm:$0xff]   ;;  %v2924_v33 = vld [vmem:[%s3282_s29 + $0x98] ss:$12 sps:$4 sm:$0xff]  }
  0x81   : > { %2746 = vmatprep.subr.bf16.mxu1 %v3080_v9  ;;  %v1165_v32 = vpack.c.bf16 %v3420_v30, %v3415_v29  ;;  %2758 = vmatprep.mubr.msk.bf16.mxu1 %vm3081_vm0, %v3080_v9  ;;  %v3439_v36 = vshrl.u32 %v1167_v35, 7  ;;  %v1095_v38 = vld [vmem:[%s3291_s2] sm:$0x7]  ;;  %vm1396_vm1 = vcmask 261120   ;;  %vm1475_vm2 = vcmask 1044480   ;;  %s3082_s29 = smov 96  }
  0x82   : > { %vm1446_vm3 = vcmask 80896   ;;  %vm1450_vm4 = vcmask 74752   ;;  %s3083_s2 = smov 32   ;;  %s3084_s3 = smov 64   ;;  %vm1521_vm5 = vcmask 254976   ;;  %vm1659_vm6 = vcmask 523520  }
  0x83   : > { %1315 = vmatpush1.bf16.msra.mxu0 %v2902_v13  ;;  %v1169_v37 = vsub.s32 0, %v3439_v36  ;;  %v1173_v39 = vsub.s32 1, %v3439_v36  ;;  %v1177_v53 = vsub.s32 2, %v3439_v36  ;;  %vm1661_vm7 = vcmask 517376   ;;  %s3711_s28 = sld [smem:[#allocation22_spill]]  ;;  %s3713_s10 = sld [smem:[#allocation23_spill]] }
  0x84   : > { %1316 = vmatprep.subr.bf16.mxu0 %v2903_v14  ;;  %2747 = vmatpush3.bf16.msra.mxu1 %v2920_v23  ;;  %vm1796_vm8 = vcmask 785920   ;;  %vm1798_vm9 = vcmask 779776   ;;  %vm1933_vm10 = vcmask 1048320   ;;  %vm1935_vm11 = vcmask 1042176   ;;  %v2662_v36 = vld [vmem:[%s3715_s30] ss:$0 sm:$0xff] }
  0x85   : > { %2748 = vmatprep.subr.bf16.mxu1 %v3080_v9  ;;  %v1170_v40 = vrot.slane %v1095_v38, %v1169_v37  ;;  %v1174_v42 = vrot.slane %v1095_v38, %v1173_v39  ;;  %v1178_v54 = vrot.slane %v1095_v38, %v1177_v53  ;;  %vm2039_vm12 = vcmask 1041408  }
  0x87   : > { %1317 = vmatpush1.bf16.msra.mxu0 %v2905_v15 }
  0x88   : > { %1318 = vmatprep.subr.bf16.mxu0 %v2906_v16  ;;  %2749 = vmatpush3.bf16.msra.mxu1 %v2921_v24 }
  0x89   : > { %2750 = vmatprep.subr.bf16.mxu1 %v3080_v9  ;;  %s3712_s19 = scalar_lea.vmem %s3711_s28, %s3261_s4  ;;  %s3714_s9 = scalar_lea.vmem %s3713_s10, %s3261_s4 }
  0x8b   : > { %1319 = vmatpush1.bf16.msra.mxu0 %v2908_v19 }
  0x8c   : > { %1320 = vmatprep.subr.bf16.mxu0 %v2909_v20  ;;  %2751 = vmatpush3.bf16.msra.mxu1 %v2922_v27 }
  0x8d   : > { %2752 = vmatprep.subr.bf16.mxu1 %v3080_v9 }
  0x8f   : > { %1321 = vmatpush1.bf16.msra.mxu0 %v2911_v21 }
  0x90   : > { %1322 = vmatprep.subr.bf16.mxu0 %v2912_v22  ;;  %2753 = vmatpush3.bf16.msra.mxu1 %v2923_v31 }
  0x91   : > { %2754 = vmatprep.subr.bf16.mxu1 %v3080_v9 }
  0x93   : > { %1323 = vmatpush1.bf16.msra.mxu0 %v2914_v25 }
  0x94   : > { %1324 = vmatprep.subr.bf16.mxu0 %v2915_v26  ;;  %2755 = vmatpush3.bf16.msra.mxu1 %v2924_v33 }
  0x95   : > { %2756 = vmatprep.subr.bf16.mxu1 %v3080_v9 }
  0x97   : > { %1325 = vmatpush1.bf16.msra.mxu0 %v2917_v28 }
  0x98   : > { %2786 = vmatprep.subr.bf16.mxu0 %v3080_v9  ;;  %2757 = vmatpush3.bf16.msra.mxu1 %v2925_v34 }
  0x99   : > { %2762 = vmatprep.subr.bf16.mxu1 %v3080_v9 }
  0x9a   : > { %1343 = vmatmul.mubr.bf16.vlgmr.msra.gmra.mrb[0].mxu0 %v1165_v32 }
  0x9b   : > { %2788 = vmatprep.mubr.msk.bf16.mxu0 %vm3081_vm0, %v3080_v9  ;;  %2759 = vmatmul.mubr.bf16.vlgmr.msra.gmra.mrb[0].mxu1 %v1165_v32 }
  0x9c   : > { %2764 = vmatprep.mubr.msk.bf16.mxu1 %vm3081_vm0, %v3080_v9 }
 0x16d   : > { %v1344_v41 = vpop.f32.mrb[0].mxu0 }
 0x16e   : > { %v1346_v43 = vpop.f32.mrb[1].mxu0  ;;  %v1345_v45 = vadd.f32 %v1344_v41, %v1170_v40  ;;  %v1387_v55 = vpop.f32.mrb[0].mxu1 }
 0x16f   : > { %v1348_v44 = vpop.f32.mrb[2].mxu0  ;;  %v1347_v48 = vadd.f32 %v1346_v43, %v1174_v42  ;;  %v1388_v56 = vadd.f32 %v1387_v55, %v1178_v54  ;;  %v2760_v57 = vpop.f32.mrb[1].mxu1 }
 0x170   : > { %v1349_v46 = vadd.f32 %v1348_v44, %v1170_v40  ;;  %v1350_v47 = vpop.f32.mrb[3].mxu0  ;;  %v1390_v58 = vpop.f32.mrb[2].mxu1 }
 0x171   : > { %v1351_v49 = vadd.f32 %v1350_v47, %v1174_v42  ;;  %v1391_v59 = vadd.f32 %v1390_v58, %v1178_v54  ;;  %v2761_v60 = vpop.f32.mrb[3].mxu1 }
 0x172   : > { %v1394_v50 = vpack.c.bf16 %v1349_v46, %v1345_v45 }
 0x173   : > { %v1395_v51 = vpack.c.bf16 %v1351_v49, %v1347_v48  ;;  %v3454_v61 = vpack.c.bf16 %v1391_v59, %v1388_v56 }
 0x175   : > { %v1401_v52 = vsel %vm1396_vm1, %v1395_v51, 0  ;;  %v1477_v62 = vsel %vm1475_vm2, %v3454_v61, 0 }
 0x176   : > { %2763 = vmatpush3.bf16.xpose.msra.mxu1 %v1401_v52 }
 0x177   : > { %2768 = vmatprep.subr.bf16.mxu1 %v3080_v9 }
 0x17d   : > { %2765 = vmatmul.mubr.msk.bf16.vlgmr.msra.gmra.mrb[4].mxu1 %vm1396_vm1, %v1394_v50 }
 0x17e   : > { %2770 = vmatprep.mubr.msk.bf16.mxu1 %vm3081_vm0, %v3080_v9  ;;  %2769 = vmatpush3.bf16.msra.mxu1 %v1477_v62 }
 0x17f   : > { %2774 = vmatprep.subr.bf16.mxu1 %v3080_v9 }
 0x250   : > { %v1437_v63 = vpop.f32.mrb[4].mxu1 }
 0x251   : > { %v1444_v0 = vmul.f32 0.17677669, %v1437_v63  ;;  %v2766_v1 = vpop.f32.mrb[5].mxu1 }
 0x252   : > { %v1440_v2 = vpop.f32.mrb[6].mxu1 }
 0x253   : > { %v1445_v3 = vmul.f32 0.17677669, %v1440_v2  ;;  %v2767_v4 = vpop.f32.mrb[7].mxu1  ;;  %v1447_v5 = vsel %vm1446_vm3, %v1444_v0, -inf }
 0x254   : > { %1448 = vmax.xlane.f32.xlu0 %v1447_v5 }
 0x255   : > { %v1451_v6 = vsel %vm1450_vm4, %v1445_v3, -inf }
 0x258   : > { %1452 = vmax.xlane.f32.xlu0 %v1451_v6 }
 0x26e   : > { %1527 = vrot.lane.b32.xlu0 %v1395_v51, %s3082_s29 }
 0x272   : > { %1802 = vrot.lane.b32.xlu0 %v1395_v51, %s3083_s2 }
 0x2e1   : > { %v1449_v7 = vpop.xlane.xlu0 %1448 }
 0x2e2   : > { %v1454_v10 = vsub.f32 %v1444_v0, %v1449_v7 }
 0x2e4   : > { %v1456_v11 = vmul.f32 1.442695, %v1454_v10 }
 0x2e5   : > { %v1453_v12 = vpop.xlane.xlu0 %1452 }
 0x2e6   : > { %2974 = vpow2.f32 %v1456_v11  ;;  %v1455_v13 = vsub.f32 %v1445_v3, %v1453_v12 }
 0x2e8   : > { %v1458_v14 = vmul.f32 1.442695, %v1455_v13 }
 0x2e9   : > { %v1528_v22 = vpop.permute.xlu0 %1527 }
 0x2ea   : > { %2976 = vpow2.f32 %v1458_v14  ;;  %v1533_v33 = vsel %vm1396_vm1, %v1528_v22, 0 }
 0x2ed   : > { %v1803_v31 = vpop.permute.xlu0 %1802 }
 0x2ee   : > { %v1808_v35 = vsel %vm1396_vm1, %v1803_v31, 0 }
 0x2f0   : > { %v2975_v15 = vpop.eup %2974 }
 0x2f1   : > { %v1460_v16 = vsel %vm1446_vm3, %v2975_v15, 0.0 }
 0x2f2   : > { %1461 = vadd.xlane.f32.xlu1 %v1460_v16 }
 0x2f4   : > { %v2977_v17 = vpop.eup %2976 }
 0x2f5   : > { %v1463_v18 = vsel %vm1450_vm4, %v2977_v17, 0.0 }
 0x2f6   : > { %1464 = vadd.xlane.f32.xlu1 %v1463_v18 }
 0x307   : > { %1524 = vrot.lane.b32.xlu1 %v1394_v50, %s3082_s29 }
 0x30b   : > { %1665 = vrot.lane.b32.xlu1 %v1395_v51, %s3084_s3 }
 0x30f   : > { %1663 = vrot.lane.b32.xlu1 %v1394_v50, %s3084_s3 }
 0x313   : > { %1800 = vrot.lane.b32.xlu1 %v1394_v50, %s3083_s2 }
 0x37f   : > { %v1462_v19 = vpop.xlane.xlu1 %1461 }
 0x380   : > { %2978 = vrcp.f32 %v1462_v19 }
 0x383   : > { %v1465_v20 = vpop.xlane.xlu1 %1464 }
 0x384   : > { %2980 = vrcp.f32 %v1465_v20 }
 0x387   : > { %v1525_v21 = vpop.permute.xlu1 %1524 }
 0x38a   : > { %v2979_v24 = vpop.eup %2978 }
 0x38b   : > { %v1666_v23 = vpop.permute.xlu1 %1665  ;;  %v1467_v27 = vmul.f32 %v2979_v24, %v2975_v15 }
 0x38c   : > { %v1671_v25 = vsel %vm1396_vm1, %v1666_v23, 0 }
 0x38d   : > { %2787 = vmatpush3.bf16.xpose.msra.mxu0 %v1671_v25 }
 0x38e   : > { %v2981_v26 = vpop.eup %2980  ;;  %2798 = vmatprep.subr.bf16.mxu0 %v3080_v9 }
 0x38f   : > { %v1469_v28 = vmul.f32 %v2981_v26, %v2977_v17  ;;  %v1664_v34 = vpop.permute.xlu1 %1663 }
 0x391   : > { %v1470_v32 = vpack.c.bf16 %v1469_v28, %v1467_v27 }
 0x393   : > { %2771 = vmatmul.mubr.msk.bf16.vlgmr.msra.gmra.mrb[8].mxu1 %vm1446_vm3, %v1470_v32  ;;  %v1801_v38 = vpop.permute.xlu1 %1800 }
 0x394   : > { %2775 = vmatpush3.bf16.xpose.msra.mxu1 %v1533_v33  ;;  %2789 = vmatmul.mubr.msk.bf16.vlgmr.msra.gmra.mrb[4].mxu0 %vm1396_vm1, %v1664_v34 }
 0x395   : > { %2799 = vmatpush3.bf16.xpose.msra.mxu0 %v1808_v35  ;;  %2776 = vmatprep.mubr.msk.bf16.mxu1 %vm3081_vm0, %v3080_v9 }
 0x396   : > { %2800 = vmatprep.mubr.msk.bf16.mxu0 %vm3081_vm0, %v3080_v9  ;;  %2780 = vmatprep.subr.bf16.mxu1 %v3080_v9 }
 0x397   : > { %2810 = vmatprep.subr.bf16.mxu0 %v3080_v9 }
 0x39b   : > { %2777 = vmatmul.mubr.msk.bf16.vlgmr.msra.gmra.mrb[12].mxu1 %vm1396_vm1, %v1525_v21 }
 0x39c   : > { %2801 = vmatmul.mubr.msk.bf16.vlgmr.msra.gmra.mrb[8].mxu0 %vm1396_vm1, %v1801_v38  ;;  %2782 = vmatprep.mubr.msk.bf16.mxu1 %vm3081_vm0, %v3080_v9 }
 0x39d   : > { %2826 = vmatprep.mubr.msk.bf16.mxu0 %vm3081_vm0, %v3080_v9 }
 0x466   : > { %v1513_v40 = vpop.f32.mrb[8].mxu1 }
 0x467   : > { %1520 = vst.msk [vmem:[#allocation2] sm:$0xff] %vm1396_vm1, %v1513_v40  ;;  %v2772_v41 = vpop.f32.mrb[9].mxu1  ;;  %v1707_v42 = vpop.f32.mrb[4].mxu0 }
 0x468   : > { %v1516_v43 = vpop.f32.mrb[10].mxu1  ;;  %v2790_v44 = vpop.f32.mrb[5].mxu0  ;;  %v1714_v52 = vmul.f32 0.17677669, %v1707_v42 }
 0x469   : > { %1522 = vst.msk [vmem:[#allocation2 + $0x8] sm:$0x3] %vm1521_vm5, %v1516_v43  ;;  %v2773_v45 = vpop.f32.mrb[11].mxu1  ;;  %v1710_v46 = vpop.f32.mrb[6].mxu0 }
 0x46a   : > { %v2791_v47 = vpop.f32.mrb[7].mxu0  ;;  %v1715_v63 = vmul.f32 0.17677669, %v1710_v46  ;;  %v1716_v0 = vsel %vm1446_vm3, %v1714_v52, -inf }
 0x46c   : > { %v1719_v3 = vsel %vm1450_vm4, %v1715_v63, -inf }
 0x46e   : > { %v1569_v48 = vpop.f32.mrb[12].mxu1 }
 0x46f   : > { %v1576_v49 = vmul.f32 0.17677669, %v1569_v48  ;;  %v2778_v50 = vpop.f32.mrb[13].mxu1  ;;  %v1844_v51 = vpop.f32.mrb[8].mxu0 }
 0x470   : > { %v1572_v53 = vpop.f32.mrb[14].mxu1  ;;  %v2802_v54 = vpop.f32.mrb[9].mxu0  ;;  %v1851_v2 = vmul.f32 0.17677669, %v1844_v51 }
 0x471   : > { %v1577_v55 = vmul.f32 0.17677669, %v1572_v53  ;;  %v2779_v56 = vpop.f32.mrb[15].mxu1  ;;  %v1847_v57 = vpop.f32.mrb[10].mxu0  ;;  %v1578_v58 = vsel %vm1446_vm3, %v1576_v49, -inf }
 0x472   : > { %v2803_v59 = vpop.f32.mrb[11].mxu0  ;;  %1579 = vmax.xlane.f32.xlu0 %v1578_v58  ;;  %v1852_v60 = vmul.f32 0.17677669, %v1847_v57  ;;  %v1853_v4 = vsel %vm1446_vm3, %v1851_v2, -inf }
 0x473   : > { %v1581_v62 = vsel %vm1450_vm4, %v1577_v55, -inf }
 0x474   : > { %1582 = vmax.xlane.f32.xlu1 %v1581_v62  ;;  %v1856_v1 = vsel %vm1450_vm4, %v1852_v60, -inf }
 0x476   : > { %1717 = vmax.xlane.f32.xlu0 %v1716_v0 }
 0x478   : > { %1857 = vmax.xlane.f32.xlu1 %v1856_v1 }
 0x47a   : > { %1720 = vmax.xlane.f32.xlu0 %v1719_v3 }
 0x47e   : > { %1854 = vmax.xlane.f32.xlu0 %v1853_v4 }
 0x4ff   : > { %v1580_v5 = vpop.xlane.xlu0 %1579 }
 0x500   : > { %v1584_v16 = vsub.f32 %v1576_v49, %v1580_v5  ;;  %v2926_v5 = vld [vmem:[%s3277_s0] sm:$0xff]  }
 0x501   : > { %v1583_v6 = vpop.xlane.xlu1 %1582  ;;  %2811 = vmatpush3.bf16.msra.mxu0 %v2926_v5  ;;  %v2952_v5 = vld [vmem:[%s3305_s12 + $0x60] ss:$8 sps:$4 sm:$0xff]  }
 0x502   : > { %v1585_v17 = vsub.f32 %v1577_v55, %v1583_v6  ;;  %v1586_v22 = vmul.f32 1.442695, %v1584_v16  ;;  %2812 = vmatprep.subr.bf16.mxu0 %v3080_v9  ;;  %v2927_v6 = vld [vmem:[%s3277_s0 + $0x8] sm:$0xff]   ;;  %v2932_v16 = vld [vmem:[%s3277_s0 + $0x30] sm:$0xff]  }
 0x503   : > { %v1718_v7 = vpop.xlane.xlu0 %1717 }
 0x504   : > { %v1722_v10 = vsub.f32 %v1714_v52, %v1718_v7  ;;  %v1588_v23 = vmul.f32 1.442695, %v1585_v17  ;;  %v2928_v7 = vld [vmem:[%s3277_s0 + $0x10] sm:$0xff]  }
 0x505   : > { %v1858_v11 = vpop.xlane.xlu1 %1857  ;;  %2813 = vmatpush3.bf16.msra.mxu0 %v2927_v6  ;;  %v2957_v6 = vld [vmem:[%s3305_s12 + $0x74] ss:$8 sps:$4 sm:$0xff]  }
 0x506   : > { %v1724_v12 = vmul.f32 1.442695, %v1722_v10  ;;  %v1860_v13 = vsub.f32 %v1852_v60, %v1858_v11  ;;  %2814 = vmatprep.subr.bf16.mxu0 %v3080_v9  ;;  %v2929_v10 = vld [vmem:[%s3277_s0 + $0x18] sm:$0xff]   ;;  %v2930_v11 = vld [vmem:[%s3277_s0 + $0x20] sm:$0xff]  }
 0x507   : > { %v1721_v14 = vpop.xlane.xlu0 %1720 }
 0x508   : > { %2982 = vpow2.f32 %v1724_v12  ;;  %v1723_v15 = vsub.f32 %v1715_v63, %v1721_v14  ;;  %v1863_v18 = vmul.f32 1.442695, %v1860_v13 }
 0x509   : > { %2815 = vmatpush3.bf16.msra.mxu0 %v2928_v7  ;;  %v2955_v7 = vld [vmem:[%s3305_s12 + $0x70] ss:$8 sps:$4 sm:$0xff]  }
 0x50a   : > { %v1726_v19 = vmul.f32 1.442695, %v1723_v15  ;;  %2816 = vmatprep.subr.bf16.mxu0 %v3080_v9  ;;  %v2931_v15 = vld [vmem:[%s3277_s0 + $0x28] sm:$0xff]  }
 0x50b   : > { %v1855_v20 = vpop.xlane.xlu0 %1854 }
 0x50c   : > { %2984 = vpow2.f32 %v1726_v19  ;;  %v1859_v21 = vsub.f32 %v1851_v2, %v1855_v20  ;;  %v2933_v20 = vld [vmem:[%s3277_s0 + $0x38] sm:$0xff]  }
 0x50d   : > { %2986 = vpow2.f32 %v1863_v18  ;;  %2817 = vmatpush3.bf16.msra.mxu0 %v2929_v10  ;;  %v2958_v10 = vld [vmem:[%s3316_s8 + $0x40] sm:$0xff]  }
 0x50e   : > { %v1861_v24 = vmul.f32 1.442695, %v1859_v21  ;;  %2818 = vmatprep.subr.bf16.mxu0 %v3080_v9 }
 0x510   : > { %2988 = vpow2.f32 %v1861_v24 }
 0x511   : > { %2990 = vpow2.f32 %v1586_v22  ;;  %2819 = vmatpush3.bf16.msra.mxu0 %v2930_v11  ;;  %v2959_v11 = vld [vmem:[%s3316_s8] sm:$0xff]  }
 0x512   : > { %v2983_v25 = vpop.eup %2982  ;;  %2992 = vpow2.f32 %v1588_v23  ;;  %2820 = vmatprep.subr.bf16.mxu0 %v3080_v9 }
 0x513   : > { %v1728_v26 = vsel %vm1446_vm3, %v2983_v25, 0.0 }
 0x514   : > { %1729 = vadd.xlane.f32.xlu0 %v1728_v26 }
 0x515   : > { %2821 = vmatpush3.bf16.msra.mxu0 %v2931_v15  ;;  %v2964_v15 = vld [vmem:[%s3316_s8 + $0x58] sm:$0xff]  }
 0x516   : > { %v2985_v27 = vpop.eup %2984  ;;  %2822 = vmatprep.subr.bf16.mxu0 %v3080_v9 }
 0x517   : > { %v1731_v28 = vsel %vm1450_vm4, %v2985_v27, 0.0  ;;  %v2987_v31 = vpop.eup %2986 }
 0x518   : > { %1732 = vadd.xlane.f32.xlu1 %v1731_v28  ;;  %v1868_v35 = vsel %vm1450_vm4, %v2987_v31, 0.0 }
 0x519   : > { %2823 = vmatpush3.bf16.msra.mxu0 %v2932_v16  ;;  %v2965_v16 = vld [vmem:[%s3316_s8 + $0x18] sm:$0xff]  }
 0x51a   : > { %v2989_v32 = vpop.eup %2988  ;;  %2824 = vmatprep.subr.bf16.mxu0 %v3080_v9 }
 0x51b   : > { %v2991_v33 = vpop.eup %2990  ;;  %v1865_v34 = vsel %vm1446_vm3, %v2989_v32, 0.0 }
 0x51c   : > { %v2993_v38 = vpop.eup %2992  ;;  %1866 = vadd.xlane.f32.xlu0 %v1865_v34  ;;  %1869 = vadd.xlane.f32.xlu1 %v1868_v35  ;;  %v1590_v40 = vsel %vm1446_vm3, %v2991_v33, 0.0 }
 0x51d   : > { %v1593_v41 = vsel %vm1450_vm4, %v2993_v38, 0.0  ;;  %2825 = vmatpush3.bf16.msra.mxu0 %v2933_v20 }
 0x51e   : > { %2720 = vmatprep.subr.bf16.mxu0 %v2958_v10 }
 0x520   : > { %1591 = vadd.xlane.f32.xlu0 %v1590_v40  ;;  %1594 = vadd.xlane.f32.xlu1 %v1593_v41 }
 0x531   : > { %1739 = vrot.lane.b32.xlu1 %v3454_v61, %s3084_s3 }
 0x535   : > { %1876 = vrot.lane.b32.xlu1 %v3454_v61, %s3083_s2 }
 0x536   : > { %1602 = vrot.lane.b32.xlu0 %v3454_v61, %s3082_s29 }
 0x5a1   : > { %v1730_v42 = vpop.xlane.xlu0 %1729 }
 0x5a5   : > { %v1733_v43 = vpop.xlane.xlu1 %1732 }
 0x5a9   : > { %v1867_v44 = vpop.xlane.xlu0 %1866  ;;  %v1870_v45 = vpop.xlane.xlu1 %1869 }
 0x5ad   : > { %v1592_v46 = vpop.xlane.xlu0 %1591  ;;  %v1595_v47 = vpop.xlane.xlu1 %1594 }
 0x5ae   : > { %2994 = vrcp.f32 %v1592_v46 }
 0x5af   : > { %2996 = vrcp.f32 %v1595_v47 }
 0x5b0   : > { %2998 = vrcp.f32 %v1733_v43 }
 0x5b1   : > { %v1603_v48 = vpop.permute.xlu0 %1602  ;;  %3000 = vrcp.f32 %v1730_v42  ;;  %v1740_v53 = vpop.permute.xlu1 %1739 }
 0x5b2   : > { %v1608_v49 = vsel %vm1475_vm2, %v1603_v48, 0  ;;  %3002 = vrcp.f32 %v1867_v44  ;;  %v1745_v56 = vsel %vm1475_vm2, %v1740_v53, 0 }
 0x5b3   : > { %2781 = vmatpush3.bf16.msra.mxu1 %v1608_v49  ;;  %3004 = vrcp.f32 %v1870_v45  ;;  %v2934_v49 = vld [vmem:[%s3305_s12] ss:$8 sps:$4 sm:$0xff]  }
 0x5b4   : > { %2792 = vmatprep.subr.bf16.mxu1 %v3080_v9 }
 0x5b5   : > { %v1877_v60 = vpop.permute.xlu1 %1876 }
 0x5b6   : > { %v1882_v1 = vsel %vm1475_vm2, %v1877_v60, 0  ;;  %v2940_v60 = vld [vmem:[%s3305_s12 + $0x20] ss:$8 sps:$4 sm:$0xff]  }
 0x5b8   : > { %v2995_v50 = vpop.eup %2994 }
 0x5b9   : > { %v2997_v51 = vpop.eup %2996  ;;  %v1597_v52 = vmul.f32 %v2995_v50, %v2991_v33  ;;  %v2936_v50 = vld [vmem:[%s3305_s12 + $0x4] ss:$8 sps:$4 sm:$0xff]  }
 0x5ba   : > { %v1599_v61 = vmul.f32 %v2997_v51, %v2993_v38  ;;  %v2999_v55 = vpop.eup %2998  ;;  %v2635_v38 = vld [vmem:[%s3710_s23] ss:$0 sm:$0xff]  ;;  %v2939_v51 = vld [vmem:[%s3305_s12 + $0x14] ss:$8 sps:$4 sm:$0xff]  }
 0x5bb   : > { %v3001_v57 = vpop.eup %3000  ;;  %v1737_v58 = vmul.f32 %v2999_v55, %v2985_v27 }
 0x5bc   : > { %v1600_v54 = vpack.c.bf16 %v1599_v61, %v1597_v52  ;;  %v1735_v59 = vmul.f32 %v3001_v57, %v2983_v25  ;;  %v3003_v62 = vpop.eup %3002  ;;  %v2937_v52 = vld [vmem:[%s3305_s12 + $0x10] ss:$8 sps:$4 sm:$0xff]  }
 0x5bd   : > { %v3005_v0 = vpop.eup %3004  ;;  %v1872_v2 = vmul.f32 %v3003_v62, %v2989_v32  ;;  %v2945_v62 = vld [vmem:[%s3305_s12 + $0x34] ss:$8 sps:$4 sm:$0xff]  }
 0x5be   : > { %2783 = vmatmul.mubr.msk.bf16.vlgmr.msra.gmra.mrb[16].mxu1 %vm1446_vm3, %v1600_v54  ;;  %v1738_v63 = vpack.c.bf16 %v1737_v58, %v1735_v59  ;;  %v1874_v3 = vmul.f32 %v3005_v0, %v2987_v31  ;;  %v2942_v59 = vld [vmem:[%s3305_s12 + $0x24] ss:$8 sps:$4 sm:$0xff]  }
 0x5bf   : > { %2793 = vmatpush3.bf16.msra.mxu1 %v1745_v56  ;;  %2794 = vmatprep.mubr.msk.bf16.mxu1 %vm3081_vm0, %v3080_v9  ;;  %v2948_v0 = vld [vmem:[%s3305_s12 + $0x44] ss:$8 sps:$4 sm:$0xff]  }
 0x5c0   : > { %2804 = vmatprep.subr.bf16.mxu1 %v3080_v9  ;;  %v1875_v4 = vpack.c.bf16 %v1874_v3, %v1872_v2  ;;  %v2951_v2 = vld [vmem:[%s3305_s12 + $0x54] ss:$8 sps:$4 sm:$0xff]   ;;  %v2949_v3 = vld [vmem:[%s3305_s12 + $0x50] ss:$8 sps:$4 sm:$0xff]  }
 0x5c6   : > { %2795 = vmatmul.mubr.msk.bf16.vlgmr.msra.gmra.mrb[20].mxu1 %vm1446_vm3, %v1738_v63  ;;  %v2943_v63 = vld [vmem:[%s3305_s12 + $0x30] ss:$8 sps:$4 sm:$0xff]  }
 0x5c7   : > { %2805 = vmatpush3.bf16.msra.mxu1 %v1882_v1  ;;  %2806 = vmatprep.mubr.msk.bf16.mxu1 %vm3081_vm0, %v3080_v9  ;;  %v2946_v1 = vld [vmem:[%s3305_s12 + $0x40] ss:$8 sps:$4 sm:$0xff]  }
 0x5c8   : > { %2171 = vmatprep.subr.bf16.mxu1 %v2936_v50 }
 0x5ce   : > { %2807 = vmatmul.mubr.msk.bf16.vlgmr.msra.gmra.mrb[24].mxu1 %vm1446_vm3, %v1875_v4  ;;  %v2954_v4 = vld [vmem:[%s3305_s12 + $0x64] ss:$8 sps:$4 sm:$0xff]  }
 0x5cf   : > { %2203 = vmatprep.mubr.bf16.mxu1 %v3079_v8  ;;  %2172 = vmatpush1.bf16.msra.mxu1 %v2934_v49 }
 0x5d0   : > { %2173 = vmatprep.subr.bf16.mxu1 %v2939_v51 }
 0x5d3   : > { %2174 = vmatpush1.bf16.msra.mxu1 %v2937_v52 }
 0x5d4   : > { %2175 = vmatprep.subr.bf16.mxu1 %v2942_v59 }
 0x5d7   : > { %2176 = vmatpush1.bf16.msra.mxu1 %v2940_v60 }
 0x5d8   : > { %2177 = vmatprep.subr.bf16.mxu1 %v2945_v62 }
 0x5db   : > { %2178 = vmatpush1.bf16.msra.mxu1 %v2943_v63 }
 0x5dc   : > { %2179 = vmatprep.subr.bf16.mxu1 %v2948_v0 }
 0x5df   : > { %2180 = vmatpush1.bf16.msra.mxu1 %v2946_v1 }
 0x5e0   : > { %2181 = vmatprep.subr.bf16.mxu1 %v2951_v2 }
 0x5e3   : > { %2182 = vmatpush1.bf16.msra.mxu1 %v2949_v3 }
 0x5e4   : > { %2183 = vmatprep.subr.bf16.mxu1 %v2954_v4 }
 0x5e7   : > { %2184 = vmatpush1.bf16.msra.mxu1 %v2952_v5 }
 0x5e8   : > { %2185 = vmatprep.subr.bf16.mxu1 %v2957_v6 }
 0x5eb   : > { %2186 = vmatpush1.bf16.msra.mxu1 %v2955_v7 }
 0x691   : > { %v1644_v8 = vpop.f32.mrb[16].mxu1 }
 0x692   : > { %1653 = vrot.lane.b32.xlu1 %v1644_v8, %s3083_s2  ;;  %v2784_v12 = vpop.f32.mrb[17].mxu1  ;;  %v2960_v8 = vld [vmem:[%s3316_s8 + $0x48] sm:$0xff]  }
 0x693   : > { %v1647_v13 = vpop.f32.mrb[18].mxu1  ;;  %v2961_v12 = vld [vmem:[%s3316_s8 + $0x8] sm:$0xff]  }
 0x694   : > { %1655 = vrot.lane.b32.xlu0 %v1647_v13, %s3083_s2  ;;  %v2785_v14 = vpop.f32.mrb[19].mxu1  ;;  %v2962_v13 = vld [vmem:[%s3316_s8 + $0x50] sm:$0xff]  }
 0x695   : > { %v2963_v14 = vld [vmem:[%s3316_s8 + $0x10] sm:$0xff]  }
 0x699   : > { %v1781_v17 = vpop.f32.mrb[20].mxu1 }
 0x69a   : > { %1790 = vrot.lane.b32.xlu1 %v1781_v17, %s3084_s3  ;;  %v2796_v18 = vpop.f32.mrb[21].mxu1  ;;  %v2966_v17 = vld [vmem:[%s3316_s8 + $0x60] sm:$0xff]  }
 0x69b   : > { %v1784_v19 = vpop.f32.mrb[22].mxu1  ;;  %v2967_v18 = vld [vmem:[%s3316_s8 + $0x20] sm:$0xff]  }
 0x69c   : > { %1792 = vrot.lane.b32.xlu0 %v1784_v19, %s3084_s3  ;;  %v2797_v21 = vpop.f32.mrb[23].mxu1  ;;  %v2968_v19 = vld [vmem:[%s3316_s8 + $0x68] sm:$0xff]  }
 0x6a1   : > { %v1918_v22 = vpop.f32.mrb[24].mxu1 }
 0x6a2   : > { %1927 = vrot.lane.b32.xlu1 %v1918_v22, %s3082_s29  ;;  %v2808_v23 = vpop.f32.mrb[25].mxu1 }
 0x6a3   : > { %v1921_v24 = vpop.f32.mrb[26].mxu1 }
 0x6a4   : > { %1929 = vrot.lane.b32.xlu0 %v1921_v24, %s3082_s29  ;;  %v2809_v25 = vpop.f32.mrb[27].mxu1 }
 0x704   : > { %v1654_v26 = vpop.permute.xlu1 %1653 }
 0x705   : > { %1660 = vst.msk [vmem:[#allocation2] sm:$0xff] %vm1659_vm6, %v1654_v26 }
 0x706   : > { %v1656_v27 = vpop.permute.xlu0 %1655 }
 0x707   : > { %1662 = vst.msk [vmem:[#allocation2 + $0x8] sm:$0x3] %vm1661_vm7, %v1656_v27 }
 0x70c   : > { %v1791_v28 = vpop.permute.xlu1 %1790 }
 0x70d   : > { %1797 = vst.msk [vmem:[#allocation2] sm:$0xff] %vm1796_vm8, %v1791_v28  ;;  %v2644_v28 = vld [vmem:[%s3712_s19] ss:$0 sm:$0xff] }
 0x70e   : > { %v1793_v9 = vpop.permute.xlu0 %1792 }
 0x70f   : > { %1799 = vst.msk [vmem:[#allocation2 + $0x8] sm:$0x3] %vm1798_vm9, %v1793_v9 }
 0x714   : > { %v1928_v31 = vpop.permute.xlu1 %1927 }
 0x715   : > { %1934 = vst.msk [vmem:[#allocation2] sm:$0xff] %vm1933_vm10, %v1928_v31 }
 0x716   : > { %v1930_v32 = vpop.permute.xlu0 %1929 }
 0x717   : > { %1936 = vst.msk [vmem:[#allocation2 + $0x8] sm:$0x3] %vm1935_vm11, %v1930_v32 }
 0x71c   : > { %v1937_v33 = vld [vmem:[#allocation2] sm:$0xff] }
 0x71e   : > { %v1938_v34 = vld [vmem:[#allocation2 + $0x8] sm:$0x3] }
 0x71f   : > { %v1939_v35 = vpack.c.bf16 %v1938_v34, %v1937_v33  ;;  %v2645_v33 = vld [vmem:[%s3714_s9] ss:$0 sm:$0xff] }
 0x721   : > { %2827 = vmatmul.mubr.bf16.vlgmr.msra.gmra.mrb[12].mxu0 %v1939_v35 }
 0x722   : > { %2721 = vmatpush3.bf16.msra.mxu0 %v2959_v11 }
 0x723   : > { %2722 = vmatprep.subr.bf16.mxu0 %v2960_v8 }
 0x726   : > { %2723 = vmatpush3.bf16.msra.mxu0 %v2961_v12 }
 0x727   : > { %2724 = vmatprep.subr.bf16.mxu0 %v2962_v13 }
 0x72a   : > { %2725 = vmatpush3.bf16.msra.mxu0 %v2963_v14 }
 0x72b   : > { %2726 = vmatprep.subr.bf16.mxu0 %v2964_v15 }
 0x72e   : > { %2727 = vmatpush3.bf16.msra.mxu0 %v2965_v16 }
 0x72f   : > { %2728 = vmatprep.subr.bf16.mxu0 %v2966_v17 }
 0x732   : > { %2729 = vmatpush3.bf16.msra.mxu0 %v2967_v18 }
 0x733   : > { %2730 = vmatprep.subr.bf16.mxu0 %v2968_v19 }
 0x7f4   : > { %v2028_v40 = vpop.f32.mrb[12].mxu0 }
 0x7f5   : > { %v2029_v41 = vadd.f32 %v2635_v38, %v2028_v40  ;;  %v2828_v42 = vpop.f32.mrb[13].mxu0 }
 0x7f6   : > { %v2031_v43 = vpop.f32.mrb[14].mxu0  ;;  %v2970_v42 = vld [vmem:[%s3316_s8 + $0x70] sm:$0xff]  }
 0x7f7   : > { %v2032_v44 = vadd.f32 %v2635_v38, %v2031_v43  ;;  %v2829_v45 = vpop.f32.mrb[15].mxu0  ;;  %v2035_v46 = vadd.f32 %v2029_v41, %v3415_v29  ;;  %v2969_v41 = vld [vmem:[%s3316_s8 + $0x28] sm:$0xff]   ;;  %v2971_v43 = vld [vmem:[%s3316_s8 + $0x30] sm:$0xff]  }
 0x7f8   : > { %2731 = vmatpush3.bf16.msra.mxu0 %v2969_v41  ;;  %v2973_v45 = vld [vmem:[%s3316_s8 + $0x38] sm:$0xff]  }
 0x7f9   : > { %2037 = vadd.xlane.f32.xlu0 %v2035_v46  ;;  %v2036_v47 = vadd.f32 %v2032_v44, %v3420_v30  ;;  %2732 = vmatprep.subr.bf16.mxu0 %v2970_v42  ;;  %v2972_v44 = vld [vmem:[%s3316_s8 + $0x78] sm:$0xff]  }
 0x7fb   : > { %v2040_v48 = vsel %vm2039_vm12, %v2036_v47, 0.0 }
 0x7fc   : > { %2041 = vadd.xlane.f32.xlu1 %v2040_v48  ;;  %2733 = vmatpush3.bf16.msra.mxu0 %v2971_v43 }
 0x7fd   : > { %2734 = vmatprep.subr.bf16.mxu0 %v2972_v44 }
 0x800   : > { %2735 = vmatpush3.bf16.msra.mxu0 %v2973_v45 }
 0x886   : > { %v2038_v61 = vpop.xlane.xlu0 %2037 }
 0x887   : > { %v2044_v29 = vmul.f32 0.0078125, %v2038_v61 }
 0x889   : > { %v3552_v53 = vsub.f32 %v2035_v46, %v2044_v29  ;;  %v2042_v30 = vpop.xlane.xlu1 %2041  ;;  %v1131_v46 = vld [vmem:[%s3311_s1] sm:$0x3] }
 0x88a   : > { %v2045_v54 = vmul.f32 0.0078125, %v2042_v30  ;;  %v2088_v48 = vrot.slane %v1131_v46, %v1173_v39 }
 0x88b   : > { %v2048_v55 = vmul.f32 %v3552_v53, %v3552_v53 }
 0x88c   : > { %v3556_v56 = vsub.f32 %v2036_v47, %v2045_v54  ;;  %v2084_v47 = vrot.slane %v1131_v46, %v1169_v37 }
 0x88d   : > { %2050 = vadd.xlane.f32.xlu0 %v2048_v55 }
 0x88e   : > { %v2049_v57 = vmul.f32 %v3556_v56, %v3556_v56 }
 0x890   : > { %v2052_v58 = vsel %vm2039_vm12, %v2049_v57, 0.0 }
 0x891   : > { %2053 = vadd.xlane.f32.xlu0 %v2052_v58 }
 0x91a   : > { %v2051_v20 = vpop.xlane.xlu0 %2050 }
 0x91b   : > { %v2055_v21 = vmul.f32 0.0078125, %v2051_v20 }
 0x91d   : > { %v2057_v22 = vadd.f32 1e-05, %v2055_v21 }
 0x91e   : > { %v2054_v23 = vpop.xlane.xlu0 %2053 }
 0x91f   : > { %3006 = vrsqrt.f32 %v2057_v22  ;;  %v2056_v24 = vmul.f32 0.0078125, %v2054_v23  ;;  %v2679_v23 = vld [vmem:[%s3716_s13] ss:$0 sm:$0xff] }
 0x921   : > { %v2058_v25 = vadd.f32 1e-05, %v2056_v24 }
 0x923   : > { %3008 = vrsqrt.f32 %v2058_v25  ;;  %v2680_v25 = vld [vmem:[%s3717_s26] ss:$0 sm:$0xff] }
 0x929   : > { %v3007_v26 = vpop.eup %3006 }
 0x92a   : > { %v2061_v27 = vmul.f32 %v3007_v26, %v3552_v53 }
 0x92c   : > { %v2069_v32 = vmul.f32 %v2644_v28, %v2061_v27 }
 0x92d   : > { %v3009_v9 = vpop.eup %3008 }
 0x92e   : > { %v2062_v31 = vmul.f32 %v3009_v9, %v3556_v56  ;;  %v2077_v35 = vadd.f32 %v2645_v33, %v2069_v32 }
 0x930   : > { %v2070_v34 = vmul.f32 %v2644_v28, %v2062_v31 }
 0x932   : > { %v2078_v38 = vadd.f32 %v2645_v33, %v2070_v34 }
 0x934   : > { %v2079_v40 = vpack.c.bf16 %v2078_v38, %v2077_v35 }
 0x936   : > { %2204 = vmatmul.mubr.bf16.vlgmr.msra.gmra.mrb[28].mxu1 %v2079_v40 }
 0xa09   : > { %v2205_v49 = vpop.f32.mrb[28].mxu1 }
 0xa0a   : > { %v2206_v50 = vadd.f32 %v2205_v49, %v2084_v47  ;;  %v2207_v51 = vpop.f32.mrb[29].mxu1 }
 0xa0b   : > { %v2208_v52 = vadd.f32 %v2207_v51, %v2088_v48  ;;  %v2209_v61 = vpop.f32.mrb[30].mxu1 }
 0xa0c   : > { %v2210_v29 = vadd.f32 %v2209_v61, %v2084_v47  ;;  %v2211_v53 = vpop.f32.mrb[31].mxu1  ;;  %v2214_v54 = vmax.f32 %v2206_v50, 0.0 }
 0xa0d   : > { %v2212_v30 = vadd.f32 %v2211_v53, %v2088_v48  ;;  %v2215_v56 = vmax.f32 %v2208_v52, 0.0 }
 0xa0e   : > { %v2216_v55 = vmax.f32 %v2210_v29, 0.0 }
 0xa0f   : > { %v2217_v57 = vmax.f32 %v2212_v30, 0.0 }
 0xa10   : > { %v2218_v58 = vpack.c.bf16 %v2216_v55, %v2214_v54 }
 0xa11   : > { %v2219_v59 = vpack.c.bf16 %v2217_v57, %v2215_v56 }
 0xa13   : > { %2354 = vmatprep.mubr.bf16.mxu0 %v2219_v59 }
 0xa14   : > { %2355 = vmatmul.mubr.bf16.vlgmr.msra.gmra.mrb[16].mxu0 %v2218_v58 }
 0xae7   : > { %v2736_v37 = vpop.f32.mrb[16].mxu0 }
 0xae8   : > { %v2737_v39 = vpop.f32.mrb[17].mxu0 }
 0xae9   : > { %v2738_v60 = vadd.f32 %v2737_v39, %v2736_v37  ;;  %v2739_v62 = vpop.f32.mrb[18].mxu0 }
 0xaea   : > { %v2740_v63 = vpop.f32.mrb[19].mxu0 }
 0xaeb   : > { %v2357_v0 = vadd.f32 %v2738_v60, %v2662_v36  ;;  %v2741_v1 = vadd.f32 %v2740_v63, %v2739_v62 }
 0xaed   : > { %v2360_v2 = vadd.f32 %v2741_v1, %v2662_v36  ;;  %v2363_v3 = vadd.f32 %v2357_v0, %v2077_v35 }
 0xaef   : > { %2365 = vadd.xlane.f32.xlu0 %v2363_v3  ;;  %v2364_v4 = vadd.f32 %v2360_v2, %v2078_v38 }
 0xaf1   : > { %v2367_v5 = vsel %vm2039_vm12, %v2364_v4, 0.0 }
 0xaf2   : > { %2368 = vadd.xlane.f32.xlu1 %v2367_v5 }
 0xb7c   : > { %v2366_v6 = vpop.xlane.xlu0 %2365 }
 0xb7d   : > { %v2370_v7 = vmul.f32 0.0078125, %v2366_v6 }
 0xb7f   : > { %v2372_v10 = vsub.f32 %v2363_v3, %v2370_v7  ;;  %v2369_v11 = vpop.xlane.xlu1 %2368 }
 0xb80   : > { %v2371_v8 = vmul.f32 0.0078125, %v2369_v11 }
 0xb81   : > { %v2374_v12 = vmul.f32 %v2372_v10, %v2372_v10 }
 0xb82   : > { %v2373_v13 = vsub.f32 %v2364_v4, %v2371_v8 }
 0xb83   : > { %2376 = vadd.xlane.f32.xlu1 %v2374_v12 }
 0xb84   : > { %v2375_v14 = vmul.f32 %v2373_v13, %v2373_v13 }
 0xb86   : > { %v2378_v15 = vsel %vm2039_vm12, %v2375_v14, 0.0 }
 0xb87   : > { %2379 = vadd.xlane.f32.xlu0 %v2378_v15 }
 0xc10   : > { %v2377_v16 = vpop.xlane.xlu1 %2376 }
 0xc11   : > { %v2381_v17 = vmul.f32 0.0078125, %v2377_v16 }
 0xc13   : > { %v2383_v18 = vadd.f32 1e-05, %v2381_v17 }
 0xc14   : > { %v2380_v19 = vpop.xlane.xlu0 %2379 }
 0xc15   : > { %3010 = vrsqrt.f32 %v2383_v18  ;;  %v2382_v20 = vmul.f32 0.0078125, %v2380_v19 }
 0xc17   : > { %v2384_v21 = vadd.f32 1e-05, %v2382_v20 }
 0xc19   : > { %3012 = vrsqrt.f32 %v2384_v21 }
 0xc1f   : > { %v3011_v22 = vpop.eup %3010 }
 0xc20   : > { %v2387_v24 = vmul.f32 %v3011_v22, %v2372_v10 }
 0xc22   : > { %v2395_v26 = vmul.f32 %v2679_v23, %v2387_v24 }
 0xc23   : > { %v3013_v27 = vpop.eup %3012 }
 0xc24   : > { %v2403_v28 = vadd.f32 %v2680_v25, %v2395_v26  ;;  %v2388_v9 = vmul.f32 %v3013_v27, %v2373_v13 }
 0xc26   : > { %2405 = vst [vmem:[%s3660_s22] sm:$0xff] %v2403_v28  ;;  %v2396_v31 = vmul.f32 %v2679_v23, %v2388_v9 }
 0xc28   : > { %v2404_v32 = vadd.f32 %v2680_v25, %v2396_v31 }
 0xc2a   : > { %2406 = vst [vmem:[%s3660_s22 + $0x8] sm:$0x3] %v2404_v32 }
 0xc2b PF: > { %s3718_s3 = sld [smem:[#allocation10_spill]]  ;;  %s3720_s28 = sld [smem:[#allocation11_spill]] }
 0xc31   : > { %s34_s29 = sadd.s32 1, %s3718_s3   ;;  %s3719_s3 = sld [smem:[#allocation9_spill]] }
 0xc32   : > { %p31_p6 = scmp.ge.s32.totalorder %s34_s29, 4  }
 0xc34   :  { %33 = sbr.rel (!%p31_p6) target bundleno = 22 (0x16), region = 180 }
 0xc3b   :  { %2418 = vsyncpa [#allocation4], 1 }
 0xc3c   :  { %2420 = vsyncpa [#allocation4 + $0x1], 1 }
 0xc3d   :  { %2421 = vsyncpa [#allocation6], 1 }

</bundles_post_ra>
